<compile_context>
chip_gen: v5e
topology: v5e:2x2
jax: 0.10.0
libtpu: 0.0.40
codegen_flags: <defaults>
</compile_context>

<pallas_src>
import jax
import jax.numpy as jnp
from jax import lax
from jax.experimental import pallas as pl
from jax.experimental.pallas import tpu as pltpu
import numpy as np

EPS = 1e-5


# ----------------------------------------------------------------------------
# In-kernel helpers
# ----------------------------------------------------------------------------
def _shift_rows(v, k, fill):
    """y[q] = v[q + k] (static k != 0); rows shifted past either end = fill."""
    pad = jnp.full((abs(k), v.shape[1]), fill, v.dtype)
    if k > 0:
        return jnp.concatenate([v[k:], pad], axis=0)
    return jnp.concatenate([pad, v[:k]], axis=0)


# ----------------------------------------------------------------------------
# Fused Inception kernel (one image per grid step)
# ----------------------------------------------------------------------------
def _inception_kernel(x_ref, wcat_ref, bcat_ref, w4_ref, b4_ref,
                      w2_ref, b2_ref, w3a_ref, b3a_ref, w3b_ref, b3b_ref,
                      o_ref):
    _, H, W, Cin = x_ref.shape
    HW = H * W
    n2r = w2_ref.shape[1] // 3          # n3x3red
    n3r = w3a_ref.shape[1] // 3         # n5x5red
    n1 = wcat_ref.shape[1] - n2r - n3r  # n1x1
    n3x3 = w2_ref.shape[2]
    n5x5 = w3b_ref.shape[2]

    # Flat (h*W + w, channel) view; channels on lanes, rows on sublanes.
    xf = x_ref[0].reshape(HW, Cin).astype(jnp.bfloat16)

    # Per-row w coordinate, used to mask the w-direction (sublane) shifts.
    wcol = lax.broadcasted_iota(jnp.int32, (H, W, 1), 1).reshape(HW, 1)

    # ---- branches 1 / 2-reduce / 3-reduce: one fused 1x1 matmul -------------
    ycat = jnp.dot(xf, wcat_ref[...], preferred_element_type=jnp.float32)
    ycat = jnp.maximum(ycat + bcat_ref[...], 0.0)
    y1 = ycat[:, 0:n1]
    y2r = ycat[:, n1:n1 + n2r].astype(jnp.bfloat16)
    y3r = ycat[:, n1 + n2r:n1 + n2r + n3r].astype(jnp.bfloat16)

    # ---- 3x3 conv (stride 1, pad 1) as 3 K-deep matmuls ---------------------
    def conv3x3(act, w_ref, b_ref):
        c = act.shape[1]
        zero = jnp.zeros((), act.dtype)
        # Pack kw taps along lanes: [x(h, w-1) | x(h, w) | x(h, w+1)].
        lft = jnp.where(wcol == 0, zero, _shift_rows(act, -1, 0.0))
        rgt = jnp.where(wcol == W - 1, zero, _shift_rows(act, 1, 0.0))
        xpack = jnp.concatenate([lft, act, rgt], axis=-1)          # (HW, 3c)
        # Row-only zero halo (one image row above / below), sublane-aligned.
        zrow = jnp.zeros((W, 3 * c), act.dtype)
        xpad = jnp.concatenate([zrow, xpack, zrow], axis=0)        # ((H+2)W, 3c)
        # kh taps = 3 contiguous row-offset slices; K = 3c per matmul.
        acc = jnp.dot(xpad[0:HW], w_ref[0],
                      preferred_element_type=jnp.float32)
        acc += jnp.dot(xpad[W:W + HW], w_ref[1],
                       preferred_element_type=jnp.float32)
        acc += jnp.dot(xpad[2 * W:2 * W + HW], w_ref[2],
                       preferred_element_type=jnp.float32)
        return jnp.maximum(acc + b_ref[...], 0.0)

    # branch 2: 1x1 -> 3x3
    y2 = conv3x3(y2r, w2_ref, b2_ref)

    # branch 3: 1x1 -> 3x3 -> 3x3 (intermediate never leaves VMEM)
    t3 = conv3x3(y3r, w3a_ref, b3a_ref).astype(jnp.bfloat16)
    y3 = conv3x3(t3, w3b_ref, b3b_ref)

    # ---- branch 4: 3x3 maxpool (stride 1, pad 1) + 1x1 conv -----------------
    neg = float(jnp.finfo(jnp.bfloat16).min)
    negs = jnp.asarray(neg, xf.dtype)
    pl_l = jnp.where(wcol == 0, negs, _shift_rows(xf, -1, neg))    # x(h, w-1)
    pl_r = jnp.where(wcol == W - 1, negs, _shift_rows(xf, 1, neg))  # x(h, w+1)
    mw = jnp.maximum(jnp.maximum(pl_l, xf), pl_r)
    pooled = jnp.maximum(jnp.maximum(_shift_rows(mw, -W, neg), mw),
                         _shift_rows(mw, W, neg))
    y4 = jnp.dot(pooled, w4_ref[...], preferred_element_type=jnp.float32)
    y4 = jnp.maximum(y4 + b4_ref[...], 0.0)

    # ---- single lane-dense output slab (in-kernel channel concat) -----------
    o_ref[0] = jnp.concatenate(
        [y1.astype(o_ref.dtype), y2.astype(o_ref.dtype),
         y3.astype(o_ref.dtype), y4.astype(o_ref.dtype)], axis=-1)


# ----------------------------------------------------------------------------
# pallas_call wrapper
# ----------------------------------------------------------------------------
def inception_pallas(x_nhwc, w_cat, b_cat, w4, b4, w2, b2, w3a, b3a, w3b, b3b):
    N, H, W, Cin = x_nhwc.shape
    HW = H * W
    C1 = w_cat.shape[1]
    n3x3 = w2.shape[2]
    n5x5 = w3b.shape[2]
    pool = w4.shape[1]
    n2r = w2.shape[1] // 3
    n3r = w3a.shape[1] // 3
    n1 = C1 - n2r - n3r
    Ctot = n1 + n3x3 + n5x5 + pool

    bf, f32 = jnp.bfloat16, jnp.float32
    args = (
        x_nhwc.astype(f32),
        w_cat.astype(bf), b_cat.reshape(1, C1).astype(f32),
        w4.astype(bf), b4.reshape(1, pool).astype(f32),
        w2.astype(bf), b2.reshape(1, n3x3).astype(f32),
        w3a.astype(bf), b3a.reshape(1, n5x5).astype(f32),
        w3b.astype(bf), b3b.reshape(1, n5x5).astype(f32),
    )
    in_specs = [
        pl.BlockSpec((1, H, W, Cin), lambda n: (n, 0, 0, 0)),
        pl.BlockSpec(w_cat.shape, lambda n: (0, 0)),
        pl.BlockSpec((1, C1), lambda n: (0, 0)),
        pl.BlockSpec(w4.shape, lambda n: (0, 0)),
        pl.BlockSpec((1, pool), lambda n: (0, 0)),
        pl.BlockSpec(w2.shape, lambda n: (0, 0, 0)),
        pl.BlockSpec((1, n3x3), lambda n: (0, 0)),
        pl.BlockSpec(w3a.shape, lambda n: (0, 0, 0)),
        pl.BlockSpec((1, n5x5), lambda n: (0, 0)),
        pl.BlockSpec(w3b.shape, lambda n: (0, 0, 0)),
        pl.BlockSpec((1, n5x5), lambda n: (0, 0)),
    ]
    return pl.pallas_call(
        _inception_kernel,
        out_shape=jax.ShapeDtypeStruct((N, HW, Ctot), jnp.bfloat16),
        grid=(N,),
        in_specs=in_specs,
        out_specs=pl.BlockSpec((1, HW, Ctot), lambda n: (n, 0, 0)),
        compiler_params=pltpu.CompilerParams(
            dimension_semantics=("parallel",),
            vmem_limit_bytes=32 * 1024 * 1024),
    )(*args)


# ----------------------------------------------------------------------------
# Host-side parameter folding (BN scale folded into conv weights)
# ----------------------------------------------------------------------------
def _bn_fold(p):
    inv = p["gamma"] / jnp.sqrt(p["var"] + EPS)
    bias = (p["b"] - p["mean"]) * inv + p["beta"]
    return inv, bias


def folded_w_1x1(p):
    inv, bias = _bn_fold(p)
    cout, cin = p["w"].shape[:2]
    w = p["w"].reshape(cout, cin).T * inv[None, :]                # (Cin, Cout)
    return w, bias


def folded_w_3x3_packed(p):
    inv, bias = _bn_fold(p)
    cout, cin = p["w"].shape[:2]
    # (Cout, Cin, kh, kw) -> (kh, kw, Cin, Cout) -> (kh, kw*Cin, Cout)
    w = jnp.transpose(p["w"], (2, 3, 1, 0)).reshape(3, 3 * cin, cout) * inv
    return w, bias


# ----------------------------------------------------------------------------
# Inception forward
# ----------------------------------------------------------------------------
@jax.jit
def inception_forward(x_nchw, params):
    """x_nchw: (N, Cin, H, W) float32. Returns (N, Ctot, H, W) float32."""
    N, Cin, H, W = x_nchw.shape
    x = jnp.transpose(x_nchw, (0, 2, 3, 1))                        # NHWC

    w1, b1 = folded_w_1x1(params["b1_c1"])
    w2r, b2r = folded_w_1x1(params["b2_c1"])
    w3r, b3r = folded_w_1x1(params["b3_c1"])
    w4, b4 = folded_w_1x1(params["b4_c1"])
    w_cat = jnp.concatenate([w1, w2r, w3r], axis=1)
    b_cat = jnp.concatenate([b1, b2r, b3r], axis=0)

    w22, b22 = folded_w_3x3_packed(params["b2_c2"])
    w32, b32 = folded_w_3x3_packed(params["b3_c2"])
    w33, b33 = folded_w_3x3_packed(params["b3_c3"])

    out2d = inception_pallas(x, w_cat, b_cat, w4, b4,
                             w22, b22, w32, b32, w33, b33)          # (N, HW, Ctot)
    out = out2d.reshape(N, H, W, -1)
    return jnp.transpose(out, (0, 3, 1, 2)).astype(jnp.float32)     # -> NCHW


# ----------------------------------------------------------------------------
# Deterministic synthetic parameters (conv + BN per layer)
# ----------------------------------------------------------------------------
def conv_bn_params(key, cin, cout, k):
    ks = jax.random.split(key, 6)
    return dict(
        w=0.1 * jax.random.normal(ks[0], (cout, cin, k, k), jnp.float32),
        b=0.1 * jax.random.normal(ks[1], (cout,), jnp.float32),
        gamma=1.0 + 0.1 * jax.random.normal(ks[2], (cout,), jnp.float32),
        beta=0.1 * jax.random.normal(ks[3], (cout,), jnp.float32),
        mean=0.1 * jax.random.normal(ks[4], (cout,), jnp.float32),
        var=1.0 + 0.1 * jax.random.uniform(ks[5], (cout,), jnp.float32),
    )


def make_inception_params(key, in_planes, n1x1, n3x3red, n3x3,
                          n5x5red, n5x5, pool_planes):
    ks = jax.random.split(key, 7)
    return dict(
        b1_c1=conv_bn_params(ks[0], in_planes, n1x1, 1),
        b2_c1=conv_bn_params(ks[1], in_planes, n3x3red, 1),
        b2_c2=conv_bn_params(ks[2], n3x3red, n3x3, 3),
        b3_c1=conv_bn_params(ks[3], in_planes, n5x5red, 1),
        b3_c2=conv_bn_params(ks[4], n5x5red, n5x5, 3),
        b3_c3=conv_bn_params(ks[5], n5x5, n5x5, 3),
        b4_c1=conv_bn_params(ks[6], in_planes, pool_planes, 1),
    )


# ----------------------------------------------------------------------------
# Pure-JAX reference (for correctness check only)
# ----------------------------------------------------------------------------
def _ref_conv_bn_relu(x_nhwc, p, k):
    w = jnp.transpose(p["w"], (2, 3, 1, 0))  # HWIO
    pad = [(k // 2, k // 2)] * 2
    y = lax.conv_general_dilated(
        x_nhwc, w, (1, 1), pad,
        dimension_numbers=("NHWC", "HWIO", "NHWC"),
        precision=lax.Precision.HIGHEST) + p["b"]
    inv = p["gamma"] / jnp.sqrt(p["var"] + EPS)
    return jnp.maximum((y - p["mean"]) * inv + p["beta"], 0.0)


def _ref_maxpool3x3(x_nhwc):
    return lax.reduce_window(x_nhwc, -jnp.inf, lax.max,
                             (1, 3, 3, 1), (1, 1, 1, 1),
                             [(0, 0), (1, 1), (1, 1), (0, 0)])


def inception_reference(x_nchw, params):
    x = jnp.transpose(x_nchw, (0, 2, 3, 1))
    y1 = _ref_conv_bn_relu(x, params["b1_c1"], 1)
    y2 = _ref_conv_bn_relu(x, params["b2_c1"], 1)
    y2 = _ref_conv_bn_relu(y2, params["b2_c2"], 3)
    y3 = _ref_conv_bn_relu(x, params["b3_c1"], 1)
    y3 = _ref_conv_bn_relu(y3, params["b3_c2"], 3)
    y3 = _ref_conv_bn_relu(y3, params["b3_c3"], 3)
    y4 = _ref_conv_bn_relu(_ref_maxpool3x3(x), params["b4_c1"], 1)
    out = jnp.concatenate([y1, y2, y3, y4], axis=-1)
    return jnp.transpose(out, (0, 3, 1, 2))


# ----------------------------------------------------------------------------
if __name__ == "__main__":
    key = jax.random.PRNGKey(0)
    kx, kp = jax.random.split(key)

    # Small shapes consistent with the module's forward: NCHW input.
    N, Cin, H, W = 2, 4, 16, 16
    n1x1, n3x3red, n3x3, n5x5red, n5x5, pool_planes = 8, 4, 8, 4, 8, 8

    x = jax.random.normal(kx, (N, Cin, H, W), jnp.float32)
    params = make_inception_params(kp, Cin, n1x1, n3x3red, n3x3,
                                   n5x5red, n5x5, pool_planes)

    out = jax.block_until_ready(inception_forward(x, params))

    expected_channels = n1x1 + n3x3 + n5x5 + pool_planes
    assert out.shape == (N, expected_channels, H, W), out.shape

    ref = jax.block_until_ready(inception_reference(x, params))
    max_err = float(jnp.max(jnp.abs(out - ref)))
    # bf16 activations/weights with f32 accumulation -> loosened tolerance.
    assert np.allclose(np.asarray(out), np.asarray(ref),
                       rtol=5e-2, atol=5e-2), "max abs err = %g" % max_err

    print("KERNEL_OK")
</pallas_src>

<mosaic_0001>
module attributes {stable_mosaic.version = 11 : i64} {
  func.func @_inception_kernel(%arg0: i32, %arg1: memref<1x16x16x4xf32, #tpu.memory_space<vmem>>, %arg2: memref<4x16xbf16, #tpu.memory_space<vmem>>, %arg3: memref<1x16xf32, #tpu.memory_space<vmem>>, %arg4: memref<4x8xbf16, #tpu.memory_space<vmem>>, %arg5: memref<1x8xf32, #tpu.memory_space<vmem>>, %arg6: memref<3x12x8xbf16, #tpu.memory_space<vmem>>, %arg7: memref<1x8xf32, #tpu.memory_space<vmem>>, %arg8: memref<3x12x8xbf16, #tpu.memory_space<vmem>>, %arg9: memref<1x8xf32, #tpu.memory_space<vmem>>, %arg10: memref<3x24x8xbf16, #tpu.memory_space<vmem>>, %arg11: memref<1x8xf32, #tpu.memory_space<vmem>>, %arg12: memref<1x256x32xbf16, #tpu.memory_space<vmem>>) attributes {dimension_semantics = [#tpu.dimension_semantics<parallel>], iteration_bounds = array<i64: 2>, scalar_prefetch = 0 : i64, scratch_operands = 0 : i64, tpu.core_type = #tpu.core_type<tc>, window_params = [{transform_indices = @transform_0, window_bounds = array<i64: 1, 16, 16, 4>}, {pipeline_mode = #tpu.pipeline_mode<synchronous>, transform_indices = @transform_1, window_bounds = array<i64: 4, 16>}, {pipeline_mode = #tpu.pipeline_mode<synchronous>, transform_indices = @transform_2, window_bounds = array<i64: 1, 16>}, {pipeline_mode = #tpu.pipeline_mode<synchronous>, transform_indices = @transform_3, window_bounds = array<i64: 4, 8>}, {pipeline_mode = #tpu.pipeline_mode<synchronous>, transform_indices = @transform_4, window_bounds = array<i64: 1, 8>}, {pipeline_mode = #tpu.pipeline_mode<synchronous>, transform_indices = @transform_5, window_bounds = array<i64: 3, 12, 8>}, {pipeline_mode = #tpu.pipeline_mode<synchronous>, transform_indices = @transform_6, window_bounds = array<i64: 1, 8>}, {pipeline_mode = #tpu.pipeline_mode<synchronous>, transform_indices = @transform_7, window_bounds = array<i64: 3, 12, 8>}, {pipeline_mode = #tpu.pipeline_mode<synchronous>, transform_indices = @transform_8, window_bounds = array<i64: 1, 8>}, {pipeline_mode = #tpu.pipeline_mode<synchronous>, transform_indices = @transform_9, window_bounds = array<i64: 3, 24, 8>}, {pipeline_mode = #tpu.pipeline_mode<synchronous>, transform_indices = @transform_10, window_bounds = array<i64: 1, 8>}, {transform_indices = @transform_11, window_bounds = array<i64: 1, 256, 32>}]} {
    %c0 = arith.constant 0 : index
    %c0_0 = arith.constant 0 : index
    %c0_1 = arith.constant 0 : index
    %c0_2 = arith.constant 0 : index
    %0 = vector.load %arg1[%c0, %c0_0, %c0_1, %c0_2] : memref<1x16x16x4xf32, #tpu.memory_space<vmem>>, vector<1x16x16x4xf32>
    %1 = vector.shape_cast %0 : vector<1x16x16x4xf32> to vector<16x16x4xf32>
    %2 = vector.shape_cast %1 : vector<16x16x4xf32> to vector<256x4xf32>
    %3 = arith.truncf %2 : vector<256x4xf32> to vector<256x4xbf16>
    %4 = tpu.iota {dimensions = array<i32: 1>} : vector<16x16x1xi32>
    %5 = vector.shape_cast %4 : vector<16x16x1xi32> to vector<256x1xi32>
    %c0_3 = arith.constant 0 : index
    %c0_4 = arith.constant 0 : index
    %6 = vector.load %arg2[%c0_3, %c0_4] : memref<4x16xbf16, #tpu.memory_space<vmem>>, vector<4x16xbf16>
    %cst = arith.constant dense<0.000000e+00> : vector<256x16xf32>
    %7 = tpu.matmul %3, %6, %cst {dimension_numbers = #tpu.dot_dimension_numbers<[1], [0], [0], [1], [0, 0, 1, 1], [], []>} : vector<256x4xbf16>, vector<4x16xbf16>, vector<256x16xf32> -> vector<256x16xf32>
    %c0_5 = arith.constant 0 : index
    %c0_6 = arith.constant 0 : index
    %8 = vector.load %arg3[%c0_5, %c0_6] : memref<1x16xf32, #tpu.memory_space<vmem>>, vector<1x16xf32>
    %9 = vector.broadcast %8 : vector<1x16xf32> to vector<256x16xf32>
    %10 = arith.addf %7, %9 : vector<256x16xf32>
    %cst_7 = arith.constant 0.000000e+00 : f32
    %11 = vector.broadcast %cst_7 : f32 to vector<256x16xf32>
    %12 = arith.maximumf %10, %11 : vector<256x16xf32>
    %13 = vector.extract_strided_slice %12 {offsets = [0, 0], sizes = [256, 8], strides = [1, 1]} : vector<256x16xf32> to vector<256x8xf32>
    %14 = vector.extract_strided_slice %12 {offsets = [0, 8], sizes = [256, 4], strides = [1, 1]} : vector<256x16xf32> to vector<256x4xf32>
    %15 = arith.truncf %14 : vector<256x4xf32> to vector<256x4xbf16>
    %16 = vector.extract_strided_slice %12 {offsets = [0, 12], sizes = [256, 4], strides = [1, 1]} : vector<256x16xf32> to vector<256x4xf32>
    %17 = arith.truncf %16 : vector<256x4xf32> to vector<256x4xbf16>
    %c0_i32 = arith.constant 0 : i32
    %18 = vector.broadcast %c0_i32 : i32 to vector<256x1xi32>
    %19 = arith.cmpi eq, %5, %18 : vector<256x1xi32>
    %cst_8 = arith.constant 0.000000e+00 : bf16
    %20 = vector.broadcast %cst_8 : bf16 to vector<1x4xbf16>
    %21 = vector.extract_strided_slice %15 {offsets = [0, 0], sizes = [255, 4], strides = [1, 1]} : vector<256x4xbf16> to vector<255x4xbf16>
    %22 = tpu.concatenate %20, %21 in 0 : vector<1x4xbf16>, vector<255x4xbf16> -> vector<256x4xbf16>
    %cst_9 = arith.constant 0.000000e+00 : bf16
    %23 = vector.shape_cast %19 : vector<256x1xi1> to vector<256x1xi1>
    %24 = vector.broadcast %23 : vector<256x1xi1> to vector<256x4xi1>
    %25 = vector.broadcast %cst_9 : bf16 to vector<256x4xbf16>
    %26 = arith.select %24, %25, %22 : vector<256x4xi1>, vector<256x4xbf16>
    %c15_i32 = arith.constant 15 : i32
    %27 = vector.broadcast %c15_i32 : i32 to vector<256x1xi32>
    %28 = arith.cmpi eq, %5, %27 : vector<256x1xi32>
    %cst_10 = arith.constant 0.000000e+00 : bf16
    %29 = vector.broadcast %cst_10 : bf16 to vector<1x4xbf16>
    %30 = vector.extract_strided_slice %15 {offsets = [1, 0], sizes = [255, 4], strides = [1, 1]} : vector<256x4xbf16> to vector<255x4xbf16>
    %31 = tpu.concatenate %30, %29 in 0 : vector<255x4xbf16>, vector<1x4xbf16> -> vector<256x4xbf16>
    %cst_11 = arith.constant 0.000000e+00 : bf16
    %32 = vector.shape_cast %28 : vector<256x1xi1> to vector<256x1xi1>
    %33 = vector.broadcast %32 : vector<256x1xi1> to vector<256x4xi1>
    %34 = vector.broadcast %cst_11 : bf16 to vector<256x4xbf16>
    %35 = arith.select %33, %34, %31 : vector<256x4xi1>, vector<256x4xbf16>
    %36 = tpu.concatenate %26, %15, %35 in 1 : vector<256x4xbf16>, vector<256x4xbf16>, vector<256x4xbf16> -> vector<256x12xbf16>
    %cst_12 = arith.constant 0.000000e+00 : bf16
    %37 = vector.broadcast %cst_12 : bf16 to vector<16x12xbf16>
    %38 = tpu.concatenate %37, %36, %37 in 0 : vector<16x12xbf16>, vector<256x12xbf16>, vector<16x12xbf16> -> vector<288x12xbf16>
    %39 = vector.extract_strided_slice %38 {offsets = [0, 0], sizes = [256, 12], strides = [1, 1]} : vector<288x12xbf16> to vector<256x12xbf16>
    %c0_13 = arith.constant 0 : index
    %c0_14 = arith.constant 0 : index
    %c0_15 = arith.constant 0 : index
    %40 = vector.load %arg6[%c0_13, %c0_14, %c0_15] : memref<3x12x8xbf16, #tpu.memory_space<vmem>>, vector<1x12x8xbf16>
    %41 = vector.shape_cast %40 : vector<1x12x8xbf16> to vector<12x8xbf16>
    %cst_16 = arith.constant dense<0.000000e+00> : vector<256x8xf32>
    %42 = tpu.matmul %39, %41, %cst_16 {dimension_numbers = #tpu.dot_dimension_numbers<[1], [0], [0], [1], [0, 0, 1, 1], [], []>} : vector<256x12xbf16>, vector<12x8xbf16>, vector<256x8xf32> -> vector<256x8xf32>
    %43 = vector.extract_strided_slice %38 {offsets = [16, 0], sizes = [256, 12], strides = [1, 1]} : vector<288x12xbf16> to vector<256x12xbf16>
    %c1 = arith.constant 1 : index
    %c0_17 = arith.constant 0 : index
    %c0_18 = arith.constant 0 : index
    %44 = vector.load %arg6[%c1, %c0_17, %c0_18] : memref<3x12x8xbf16, #tpu.memory_space<vmem>>, vector<1x12x8xbf16>
    %45 = vector.shape_cast %44 : vector<1x12x8xbf16> to vector<12x8xbf16>
    %cst_19 = arith.constant dense<0.000000e+00> : vector<256x8xf32>
    %46 = tpu.matmul %43, %45, %cst_19 {dimension_numbers = #tpu.dot_dimension_numbers<[1], [0], [0], [1], [0, 0, 1, 1], [], []>} : vector<256x12xbf16>, vector<12x8xbf16>, vector<256x8xf32> -> vector<256x8xf32>
    %47 = arith.addf %42, %46 : vector<256x8xf32>
    %48 = vector.extract_strided_slice %38 {offsets = [32, 0], sizes = [256, 12], strides = [1, 1]} : vector<288x12xbf16> to vector<256x12xbf16>
    %c2 = arith.constant 2 : index
    %c0_20 = arith.constant 0 : index
    %c0_21 = arith.constant 0 : index
    %49 = vector.load %arg6[%c2, %c0_20, %c0_21] : memref<3x12x8xbf16, #tpu.memory_space<vmem>>, vector<1x12x8xbf16>
    %50 = vector.shape_cast %49 : vector<1x12x8xbf16> to vector<12x8xbf16>
    %cst_22 = arith.constant dense<0.000000e+00> : vector<256x8xf32>
    %51 = tpu.matmul %48, %50, %cst_22 {dimension_numbers = #tpu.dot_dimension_numbers<[1], [0], [0], [1], [0, 0, 1, 1], [], []>} : vector<256x12xbf16>, vector<12x8xbf16>, vector<256x8xf32> -> vector<256x8xf32>
    %52 = arith.addf %47, %51 : vector<256x8xf32>
    %c0_23 = arith.constant 0 : index
    %c0_24 = arith.constant 0 : index
    %53 = vector.load %arg7[%c0_23, %c0_24] : memref<1x8xf32, #tpu.memory_space<vmem>>, vector<1x8xf32>
    %54 = vector.broadcast %53 : vector<1x8xf32> to vector<256x8xf32>
    %55 = arith.addf %52, %54 : vector<256x8xf32>
    %cst_25 = arith.constant 0.000000e+00 : f32
    %56 = vector.broadcast %cst_25 : f32 to vector<256x8xf32>
    %57 = arith.maximumf %55, %56 : vector<256x8xf32>
    %c0_i32_26 = arith.constant 0 : i32
    %58 = vector.broadcast %c0_i32_26 : i32 to vector<256x1xi32>
    %59 = arith.cmpi eq, %5, %58 : vector<256x1xi32>
    %cst_27 = arith.constant 0.000000e+00 : bf16
    %60 = vector.broadcast %cst_27 : bf16 to vector<1x4xbf16>
    %61 = vector.extract_strided_slice %17 {offsets = [0, 0], sizes = [255, 4], strides = [1, 1]} : vector<256x4xbf16> to vector<255x4xbf16>
    %62 = tpu.concatenate %60, %61 in 0 : vector<1x4xbf16>, vector<255x4xbf16> -> vector<256x4xbf16>
    %cst_28 = arith.constant 0.000000e+00 : bf16
    %63 = vector.shape_cast %59 : vector<256x1xi1> to vector<256x1xi1>
    %64 = vector.broadcast %63 : vector<256x1xi1> to vector<256x4xi1>
    %65 = vector.broadcast %cst_28 : bf16 to vector<256x4xbf16>
    %66 = arith.select %64, %65, %62 : vector<256x4xi1>, vector<256x4xbf16>
    %c15_i32_29 = arith.constant 15 : i32
    %67 = vector.broadcast %c15_i32_29 : i32 to vector<256x1xi32>
    %68 = arith.cmpi eq, %5, %67 : vector<256x1xi32>
    %cst_30 = arith.constant 0.000000e+00 : bf16
    %69 = vector.broadcast %cst_30 : bf16 to vector<1x4xbf16>
    %70 = vector.extract_strided_slice %17 {offsets = [1, 0], sizes = [255, 4], strides = [1, 1]} : vector<256x4xbf16> to vector<255x4xbf16>
    %71 = tpu.concatenate %70, %69 in 0 : vector<255x4xbf16>, vector<1x4xbf16> -> vector<256x4xbf16>
    %cst_31 = arith.constant 0.000000e+00 : bf16
    %72 = vector.shape_cast %68 : vector<256x1xi1> to vector<256x1xi1>
    %73 = vector.broadcast %72 : vector<256x1xi1> to vector<256x4xi1>
    %74 = vector.broadcast %cst_31 : bf16 to vector<256x4xbf16>
    %75 = arith.select %73, %74, %71 : vector<256x4xi1>, vector<256x4xbf16>
    %76 = tpu.concatenate %66, %17, %75 in 1 : vector<256x4xbf16>, vector<256x4xbf16>, vector<256x4xbf16> -> vector<256x12xbf16>
    %cst_32 = arith.constant 0.000000e+00 : bf16
    %77 = vector.broadcast %cst_32 : bf16 to vector<16x12xbf16>
    %78 = tpu.concatenate %77, %76, %77 in 0 : vector<16x12xbf16>, vector<256x12xbf16>, vector<16x12xbf16> -> vector<288x12xbf16>
    %79 = vector.extract_strided_slice %78 {offsets = [0, 0], sizes = [256, 12], strides = [1, 1]} : vector<288x12xbf16> to vector<256x12xbf16>
    %c0_33 = arith.constant 0 : index
    %c0_34 = arith.constant 0 : index
    %c0_35 = arith.constant 0 : index
    %80 = vector.load %arg8[%c0_33, %c0_34, %c0_35] : memref<3x12x8xbf16, #tpu.memory_space<vmem>>, vector<1x12x8xbf16>
    %81 = vector.shape_cast %80 : vector<1x12x8xbf16> to vector<12x8xbf16>
    %cst_36 = arith.constant dense<0.000000e+00> : vector<256x8xf32>
    %82 = tpu.matmul %79, %81, %cst_36 {dimension_numbers = #tpu.dot_dimension_numbers<[1], [0], [0], [1], [0, 0, 1, 1], [], []>} : vector<256x12xbf16>, vector<12x8xbf16>, vector<256x8xf32> -> vector<256x8xf32>
    %83 = vector.extract_strided_slice %78 {offsets = [16, 0], sizes = [256, 12], strides = [1, 1]} : vector<288x12xbf16> to vector<256x12xbf16>
    %c1_37 = arith.constant 1 : index
    %c0_38 = arith.constant 0 : index
    %c0_39 = arith.constant 0 : index
    %84 = vector.load %arg8[%c1_37, %c0_38, %c0_39] : memref<3x12x8xbf16, #tpu.memory_space<vmem>>, vector<1x12x8xbf16>
    %85 = vector.shape_cast %84 : vector<1x12x8xbf16> to vector<12x8xbf16>
    %cst_40 = arith.constant dense<0.000000e+00> : vector<256x8xf32>
    %86 = tpu.matmul %83, %85, %cst_40 {dimension_numbers = #tpu.dot_dimension_numbers<[1], [0], [0], [1], [0, 0, 1, 1], [], []>} : vector<256x12xbf16>, vector<12x8xbf16>, vector<256x8xf32> -> vector<256x8xf32>
    %87 = arith.addf %82, %86 : vector<256x8xf32>
    %88 = vector.extract_strided_slice %78 {offsets = [32, 0], sizes = [256, 12], strides = [1, 1]} : vector<288x12xbf16> to vector<256x12xbf16>
    %c2_41 = arith.constant 2 : index
    %c0_42 = arith.constant 0 : index
    %c0_43 = arith.constant 0 : index
    %89 = vector.load %arg8[%c2_41, %c0_42, %c0_43] : memref<3x12x8xbf16, #tpu.memory_space<vmem>>, vector<1x12x8xbf16>
    %90 = vector.shape_cast %89 : vector<1x12x8xbf16> to vector<12x8xbf16>
    %cst_44 = arith.constant dense<0.000000e+00> : vector<256x8xf32>
    %91 = tpu.matmul %88, %90, %cst_44 {dimension_numbers = #tpu.dot_dimension_numbers<[1], [0], [0], [1], [0, 0, 1, 1], [], []>} : vector<256x12xbf16>, vector<12x8xbf16>, vector<256x8xf32> -> vector<256x8xf32>
    %92 = arith.addf %87, %91 : vector<256x8xf32>
    %c0_45 = arith.constant 0 : index
    %c0_46 = arith.constant 0 : index
    %93 = vector.load %arg9[%c0_45, %c0_46] : memref<1x8xf32, #tpu.memory_space<vmem>>, vector<1x8xf32>
    %94 = vector.broadcast %93 : vector<1x8xf32> to vector<256x8xf32>
    %95 = arith.addf %92, %94 : vector<256x8xf32>
    %cst_47 = arith.constant 0.000000e+00 : f32
    %96 = vector.broadcast %cst_47 : f32 to vector<256x8xf32>
    %97 = arith.maximumf %95, %96 : vector<256x8xf32>
    %98 = arith.truncf %97 : vector<256x8xf32> to vector<256x8xbf16>
    %c0_i32_48 = arith.constant 0 : i32
    %99 = vector.broadcast %c0_i32_48 : i32 to vector<256x1xi32>
    %100 = arith.cmpi eq, %5, %99 : vector<256x1xi32>
    %cst_49 = arith.constant 0.000000e+00 : bf16
    %101 = vector.broadcast %cst_49 : bf16 to vector<1x8xbf16>
    %102 = vector.extract_strided_slice %98 {offsets = [0, 0], sizes = [255, 8], strides = [1, 1]} : vector<256x8xbf16> to vector<255x8xbf16>
    %103 = tpu.concatenate %101, %102 in 0 : vector<1x8xbf16>, vector<255x8xbf16> -> vector<256x8xbf16>
    %cst_50 = arith.constant 0.000000e+00 : bf16
    %104 = vector.shape_cast %100 : vector<256x1xi1> to vector<256x1xi1>
    %105 = vector.broadcast %104 : vector<256x1xi1> to vector<256x8xi1>
    %106 = vector.broadcast %cst_50 : bf16 to vector<256x8xbf16>
    %107 = arith.select %105, %106, %103 : vector<256x8xi1>, vector<256x8xbf16>
    %c15_i32_51 = arith.constant 15 : i32
    %108 = vector.broadcast %c15_i32_51 : i32 to vector<256x1xi32>
    %109 = arith.cmpi eq, %5, %108 : vector<256x1xi32>
    %cst_52 = arith.constant 0.000000e+00 : bf16
    %110 = vector.broadcast %cst_52 : bf16 to vector<1x8xbf16>
    %111 = vector.extract_strided_slice %98 {offsets = [1, 0], sizes = [255, 8], strides = [1, 1]} : vector<256x8xbf16> to vector<255x8xbf16>
    %112 = tpu.concatenate %111, %110 in 0 : vector<255x8xbf16>, vector<1x8xbf16> -> vector<256x8xbf16>
    %cst_53 = arith.constant 0.000000e+00 : bf16
    %113 = vector.shape_cast %109 : vector<256x1xi1> to vector<256x1xi1>
    %114 = vector.broadcast %113 : vector<256x1xi1> to vector<256x8xi1>
    %115 = vector.broadcast %cst_53 : bf16 to vector<256x8xbf16>
    %116 = arith.select %114, %115, %112 : vector<256x8xi1>, vector<256x8xbf16>
    %117 = tpu.concatenate %107, %98, %116 in 1 : vector<256x8xbf16>, vector<256x8xbf16>, vector<256x8xbf16> -> vector<256x24xbf16>
    %cst_54 = arith.constant 0.000000e+00 : bf16
    %118 = vector.broadcast %cst_54 : bf16 to vector<16x24xbf16>
    %119 = tpu.concatenate %118, %117, %118 in 0 : vector<16x24xbf16>, vector<256x24xbf16>, vector<16x24xbf16> -> vector<288x24xbf16>
    %120 = vector.extract_strided_slice %119 {offsets = [0, 0], sizes = [256, 24], strides = [1, 1]} : vector<288x24xbf16> to vector<256x24xbf16>
    %c0_55 = arith.constant 0 : index
    %c0_56 = arith.constant 0 : index
    %c0_57 = arith.constant 0 : index
    %121 = vector.load %arg10[%c0_55, %c0_56, %c0_57] : memref<3x24x8xbf16, #tpu.memory_space<vmem>>, vector<1x24x8xbf16>
    %122 = vector.shape_cast %121 : vector<1x24x8xbf16> to vector<24x8xbf16>
    %cst_58 = arith.constant dense<0.000000e+00> : vector<256x8xf32>
    %123 = tpu.matmul %120, %122, %cst_58 {dimension_numbers = #tpu.dot_dimension_numbers<[1], [0], [0], [1], [0, 0, 1, 1], [], []>} : vector<256x24xbf16>, vector<24x8xbf16>, vector<256x8xf32> -> vector<256x8xf32>
    %124 = vector.extract_strided_slice %119 {offsets = [16, 0], sizes = [256, 24], strides = [1, 1]} : vector<288x24xbf16> to vector<256x24xbf16>
    %c1_59 = arith.constant 1 : index
    %c0_60 = arith.constant 0 : index
    %c0_61 = arith.constant 0 : index
    %125 = vector.load %arg10[%c1_59, %c0_60, %c0_61] : memref<3x24x8xbf16, #tpu.memory_space<vmem>>, vector<1x24x8xbf16>
    %126 = vector.shape_cast %125 : vector<1x24x8xbf16> to vector<24x8xbf16>
    %cst_62 = arith.constant dense<0.000000e+00> : vector<256x8xf32>
    %127 = tpu.matmul %124, %126, %cst_62 {dimension_numbers = #tpu.dot_dimension_numbers<[1], [0], [0], [1], [0, 0, 1, 1], [], []>} : vector<256x24xbf16>, vector<24x8xbf16>, vector<256x8xf32> -> vector<256x8xf32>
    %128 = arith.addf %123, %127 : vector<256x8xf32>
    %129 = vector.extract_strided_slice %119 {offsets = [32, 0], sizes = [256, 24], strides = [1, 1]} : vector<288x24xbf16> to vector<256x24xbf16>
    %c2_63 = arith.constant 2 : index
    %c0_64 = arith.constant 0 : index
    %c0_65 = arith.constant 0 : index
    %130 = vector.load %arg10[%c2_63, %c0_64, %c0_65] : memref<3x24x8xbf16, #tpu.memory_space<vmem>>, vector<1x24x8xbf16>
    %131 = vector.shape_cast %130 : vector<1x24x8xbf16> to vector<24x8xbf16>
    %cst_66 = arith.constant dense<0.000000e+00> : vector<256x8xf32>
    %132 = tpu.matmul %129, %131, %cst_66 {dimension_numbers = #tpu.dot_dimension_numbers<[1], [0], [0], [1], [0, 0, 1, 1], [], []>} : vector<256x24xbf16>, vector<24x8xbf16>, vector<256x8xf32> -> vector<256x8xf32>
    %133 = arith.addf %128, %132 : vector<256x8xf32>
    %c0_67 = arith.constant 0 : index
    %c0_68 = arith.constant 0 : index
    %134 = vector.load %arg11[%c0_67, %c0_68] : memref<1x8xf32, #tpu.memory_space<vmem>>, vector<1x8xf32>
    %135 = vector.broadcast %134 : vector<1x8xf32> to vector<256x8xf32>
    %136 = arith.addf %133, %135 : vector<256x8xf32>
    %cst_69 = arith.constant 0.000000e+00 : f32
    %137 = vector.broadcast %cst_69 : f32 to vector<256x8xf32>
    %138 = arith.maximumf %136, %137 : vector<256x8xf32>
    %c0_i32_70 = arith.constant 0 : i32
    %139 = vector.broadcast %c0_i32_70 : i32 to vector<256x1xi32>
    %140 = arith.cmpi eq, %5, %139 : vector<256x1xi32>
    %cst_71 = arith.constant -3.389530e+38 : bf16
    %141 = vector.broadcast %cst_71 : bf16 to vector<1x4xbf16>
    %142 = vector.extract_strided_slice %3 {offsets = [0, 0], sizes = [255, 4], strides = [1, 1]} : vector<256x4xbf16> to vector<255x4xbf16>
    %143 = tpu.concatenate %141, %142 in 0 : vector<1x4xbf16>, vector<255x4xbf16> -> vector<256x4xbf16>
    %cst_72 = arith.constant -3.389530e+38 : bf16
    %144 = vector.shape_cast %140 : vector<256x1xi1> to vector<256x1xi1>
    %145 = vector.broadcast %144 : vector<256x1xi1> to vector<256x4xi1>
    %146 = vector.broadcast %cst_72 : bf16 to vector<256x4xbf16>
    %147 = arith.select %145, %146, %143 : vector<256x4xi1>, vector<256x4xbf16>
    %c15_i32_73 = arith.constant 15 : i32
    %148 = vector.broadcast %c15_i32_73 : i32 to vector<256x1xi32>
    %149 = arith.cmpi eq, %5, %148 : vector<256x1xi32>
    %cst_74 = arith.constant -3.389530e+38 : bf16
    %150 = vector.broadcast %cst_74 : bf16 to vector<1x4xbf16>
    %151 = vector.extract_strided_slice %3 {offsets = [1, 0], sizes = [255, 4], strides = [1, 1]} : vector<256x4xbf16> to vector<255x4xbf16>
    %152 = tpu.concatenate %151, %150 in 0 : vector<255x4xbf16>, vector<1x4xbf16> -> vector<256x4xbf16>
    %cst_75 = arith.constant -3.389530e+38 : bf16
    %153 = vector.shape_cast %149 : vector<256x1xi1> to vector<256x1xi1>
    %154 = vector.broadcast %153 : vector<256x1xi1> to vector<256x4xi1>
    %155 = vector.broadcast %cst_75 : bf16 to vector<256x4xbf16>
    %156 = arith.select %154, %155, %152 : vector<256x4xi1>, vector<256x4xbf16>
    %157 = arith.maximumf %147, %3 : vector<256x4xbf16>
    %158 = arith.maximumf %157, %156 : vector<256x4xbf16>
    %cst_76 = arith.constant -3.389530e+38 : bf16
    %159 = vector.broadcast %cst_76 : bf16 to vector<16x4xbf16>
    %160 = vector.extract_strided_slice %158 {offsets = [0, 0], sizes = [240, 4], strides = [1, 1]} : vector<256x4xbf16> to vector<240x4xbf16>
    %161 = tpu.concatenate %159, %160 in 0 : vector<16x4xbf16>, vector<240x4xbf16> -> vector<256x4xbf16>
    %162 = arith.maximumf %161, %158 : vector<256x4xbf16>
    %cst_77 = arith.constant -3.389530e+38 : bf16
    %163 = vector.broadcast %cst_77 : bf16 to vector<16x4xbf16>
    %164 = vector.extract_strided_slice %158 {offsets = [16, 0], sizes = [240, 4], strides = [1, 1]} : vector<256x4xbf16> to vector<240x4xbf16>
    %165 = tpu.concatenate %164, %163 in 0 : vector<240x4xbf16>, vector<16x4xbf16> -> vector<256x4xbf16>
    %166 = arith.maximumf %162, %165 : vector<256x4xbf16>
    %c0_78 = arith.constant 0 : index
    %c0_79 = arith.constant 0 : index
    %167 = vector.load %arg4[%c0_78, %c0_79] : memref<4x8xbf16, #tpu.memory_space<vmem>>, vector<4x8xbf16>
    %cst_80 = arith.constant dense<0.000000e+00> : vector<256x8xf32>
    %168 = tpu.matmul %166, %167, %cst_80 {dimension_numbers = #tpu.dot_dimension_numbers<[1], [0], [0], [1], [0, 0, 1, 1], [], []>} : vector<256x4xbf16>, vector<4x8xbf16>, vector<256x8xf32> -> vector<256x8xf32>
    %c0_81 = arith.constant 0 : index
    %c0_82 = arith.constant 0 : index
    %169 = vector.load %arg5[%c0_81, %c0_82] : memref<1x8xf32, #tpu.memory_space<vmem>>, vector<1x8xf32>
    %170 = vector.broadcast %169 : vector<1x8xf32> to vector<256x8xf32>
    %171 = arith.addf %168, %170 : vector<256x8xf32>
    %cst_83 = arith.constant 0.000000e+00 : f32
    %172 = vector.broadcast %cst_83 : f32 to vector<256x8xf32>
    %173 = arith.maximumf %171, %172 : vector<256x8xf32>
    %174 = arith.truncf %13 : vector<256x8xf32> to vector<256x8xbf16>
    %175 = arith.truncf %57 : vector<256x8xf32> to vector<256x8xbf16>
    %176 = arith.truncf %138 : vector<256x8xf32> to vector<256x8xbf16>
    %177 = arith.truncf %173 : vector<256x8xf32> to vector<256x8xbf16>
    %178 = tpu.concatenate %174, %175, %176, %177 in 1 : vector<256x8xbf16>, vector<256x8xbf16>, vector<256x8xbf16>, vector<256x8xbf16> -> vector<256x32xbf16>
    %c0_84 = arith.constant 0 : index
    %c0_85 = arith.constant 0 : index
    %c0_86 = arith.constant 0 : index
    %179 = vector.load %arg12[%c0_84, %c0_85, %c0_86] : memref<1x256x32xbf16, #tpu.memory_space<vmem>>, vector<1x256x32xbf16>
    %180 = vector.shape_cast %179 : vector<1x256x32xbf16> to vector<256x32xbf16>
    %181 = vector.shape_cast %178 : vector<256x32xbf16> to vector<1x256x32xbf16>
    tpu.vector_store %arg12[%c0_84, %c0_85, %c0_86], %181 {strides = array<i32>} : memref<1x256x32xbf16, #tpu.memory_space<vmem>>, vector<1x256x32xbf16>,
    return
  }
  func.func @transform_0(%arg0: i32) -> (i32, i32, i32, i32) {
    %c0_i32 = arith.constant 0 : i32
    %c0_i32_0 = arith.constant 0 : i32
    %c0_i32_1 = arith.constant 0 : i32
    %c0_i32_2 = arith.constant 0 : i32
    return %arg0, %c0_i32, %c0_i32_0, %c0_i32_1 : i32, i32, i32, i32
  }
  func.func @transform_1(%arg0: i32) -> (i32, i32) {
    %c0_i32 = arith.constant 0 : i32
    %c0_i32_0 = arith.constant 0 : i32
    %c0_i32_1 = arith.constant 0 : i32
    return %c0_i32, %c0_i32_0 : i32, i32
  }
  func.func @transform_2(%arg0: i32) -> (i32, i32) {
    %c0_i32 = arith.constant 0 : i32
    %c0_i32_0 = arith.constant 0 : i32
    %c0_i32_1 = arith.constant 0 : i32
    return %c0_i32, %c0_i32_0 : i32, i32
  }
  func.func @transform_3(%arg0: i32) -> (i32, i32) {
    %c0_i32 = arith.constant 0 : i32
    %c0_i32_0 = arith.constant 0 : i32
    %c0_i32_1 = arith.constant 0 : i32
    return %c0_i32, %c0_i32_0 : i32, i32
  }
  func.func @transform_4(%arg0: i32) -> (i32, i32) {
    %c0_i32 = arith.constant 0 : i32
    %c0_i32_0 = arith.constant 0 : i32
    %c0_i32_1 = arith.constant 0 : i32
    return %c0_i32, %c0_i32_0 : i32, i32
  }
  func.func @transform_5(%arg0: i32) -> (i32, i32, i32) {
    %c0_i32 = arith.constant 0 : i32
    %c0_i32_0 = arith.constant 0 : i32
    %c0_i32_1 = arith.constant 0 : i32
    %c0_i32_2 = arith.constant 0 : i32
    return %c0_i32, %c0_i32_0, %c0_i32_1 : i32, i32, i32
  }
  func.func @transform_6(%arg0: i32) -> (i32, i32) {
    %c0_i32 = arith.constant 0 : i32
    %c0_i32_0 = arith.constant 0 : i32
    %c0_i32_1 = arith.constant 0 : i32
    return %c0_i32, %c0_i32_0 : i32, i32
  }
  func.func @transform_7(%arg0: i32) -> (i32, i32, i32) {
    %c0_i32 = arith.constant 0 : i32
    %c0_i32_0 = arith.constant 0 : i32
    %c0_i32_1 = arith.constant 0 : i32
    %c0_i32_2 = arith.constant 0 : i32
    return %c0_i32, %c0_i32_0, %c0_i32_1 : i32, i32, i32
  }
  func.func @transform_8(%arg0: i32) -> (i32, i32) {
    %c0_i32 = arith.constant 0 : i32
    %c0_i32_0 = arith.constant 0 : i32
    %c0_i32_1 = arith.constant 0 : i32
    return %c0_i32, %c0_i32_0 : i32, i32
  }
  func.func @transform_9(%arg0: i32) -> (i32, i32, i32) {
    %c0_i32 = arith.constant 0 : i32
    %c0_i32_0 = arith.constant 0 : i32
    %c0_i32_1 = arith.constant 0 : i32
    %c0_i32_2 = arith.constant 0 : i32
    return %c0_i32, %c0_i32_0, %c0_i32_1 : i32, i32, i32
  }
  func.func @transform_10(%arg0: i32) -> (i32, i32) {
    %c0_i32 = arith.constant 0 : i32
    %c0_i32_0 = arith.constant 0 : i32
    %c0_i32_1 = arith.constant 0 : i32
    return %c0_i32, %c0_i32_0 : i32, i32
  }
  func.func @transform_11(%arg0: i32) -> (i32, i32, i32) {
    %c0_i32 = arith.constant 0 : i32
    %c0_i32_0 = arith.constant 0 : i32
    %c0_i32_1 = arith.constant 0 : i32
    return %arg0, %c0_i32, %c0_i32_0 : i32, i32, i32
  }
}

</mosaic_0001>

<bundles_post_ra>
// kernel: inception_forward.1
= control target key start
LH: loop header
LB: loop body
LE: loop exit
PB: predicated region body
PF: predicated region fallthrough
CT: control target
= control target key end

     0   :  { %s5362_s17 = smov 0   ;;  %s8519_s0 = inlined_call_operand.vmem [shape: f32[2,16,16,4], index: 0, kind: input, shape index: {}]   ;;  %s8520_s1 = inlined_call_operand.vmem [shape: bf16[4,16], index: 1, kind: input, shape index: {}]   ;;  %s8521_s2 = inlined_call_operand.vmem [shape: f32[1,16], index: 2, kind: input, shape index: {}]   ;;  %s8522_s3 = inlined_call_operand.vmem [shape: bf16[4,8], index: 3, kind: input, shape index: {}]   ;;  %s8523_s4 = inlined_call_operand.vmem [shape: f32[1,8], index: 4, kind: input, shape index: {}]   ;;  %s8524_s5 = inlined_call_operand.vmem [shape: bf16[3,12,8], index: 5, kind: input, shape index: {}]   ;;  %s8525_s6 = inlined_call_operand.vmem [shape: f32[1,8], index: 6, kind: input, shape index: {}]   ;;  %s8526_s7 = inlined_call_operand.vmem [shape: bf16[3,12,8], index: 7, kind: input, shape index: {}]   ;;  %s8527_s8 = inlined_call_operand.vmem [shape: f32[1,8], index: 8, kind: input, shape index: {}]   ;;  %s8528_s9 = inlined_call_operand.vmem [shape: bf16[3,24,8], index: 9, kind: input, shape index: {}]   ;;  %s8529_s10 = inlined_call_operand.vmem [shape: f32[1,8], index: 10, kind: input, shape index: {}]   ;;  %s8530_s11 = inlined_call_operand.vmem [shape: bf16[2,256,32], index: 11, kind: output, shape index: {}]  }
   0x1 LB: > { %s5006_s18 = sadd.s32 4294967295, %s5291_s17   ;;  %p5010_p0 = scmp.ge.s32.totalorder %s5291_s17, 1  ;;  %s5291_s17 = sphi %s5362_s17, %s21_s17  }
   0x2   : > { %p337_p1 = scmp.lt.s32.totalorder %s5291_s17, 3 }
   0x4   : > { %p338_p2 = pnand %p5010_p0, %p337_p1 }
   0x6   : > { %341 = sbr.rel (%p338_p2) target bundleno = 1381 (0x565), region = 64 }
   0xb   : > { %v458_v0 = vld [vmem:[%s8520_s1] sm:$0x3]  ;;  %vm592_vm0 = vcmask 1041408   ;;  %p377_p3 = scmp.lt.s32.totalorder %s5006_s18, 1  ;;  %v455_v1 = vlaneseq  ;;  %vm5293_vm1 = vmmov 0   ;;  %v8532_v5 = vmov 0  }
   0xc   : > { %v594_v2 = vsel %vm592_vm0, %v458_v0, 0  ;;  %vm1015_vm2 = vmpackc.low %vm5293_vm1, %vm5293_vm1  ;;  %vm543_vm7 = vcmask 31744   ;;  %v1023_v25 = vunpack.c.l.b16 %v8532_v5  ;;  %v1024_v28 = vunpack.c.h.b16 %v8532_v5  ;;  %s5295_s27 = smov 120   ;;  %s5296_s28 = smov 124  }
   0xd   : > { %603 = vmatpush.bf16.msra.mxu0 %v594_v2  ;;  %s8844_s18 = smov (!%p377_p3, %s5006_s18), 1  ;;  %v456_v3 = vshrl.u32 %v455_v1, 7  ;;  %5252 = vmatpush.bf16.msra.mxu3 %v594_v2  ;;  %v1017_v6 = vsel %vm1015_vm2, 65537, %v8532_v5  ;;  %vm831_vm8 = vsmask.f32 256  ;;  %vm1303_vm1 = vcmask 1045504  }
   0xe   : > { %s5241_s21 = sshll.u32 %s8844_s18, 8  ;;  %v1019_v11 = vunpack.c.l.b16 %v1017_v6  ;;  %vm1046_vm10 = vsmask.f32 7424  ;;  %vm1007_vm2 = vcmask 1040384   ;;  %s5297_s20 = smov 116  }
   0xf   : > { %v457_v4 = vadd.s32 8, %v456_v3  ;;  %vm749_vm3 = vcmp.eq.s32.totalorder %v456_v3, 0  ;;  %s5381_s24 = scalar_lea.vmem %s8519_s0, %s5241_s21  ;;  %s5299_s25 = smov 16  }
  0x10   : > { %vm1014_vm4 = vmpackc.low %vm749_vm3, %vm749_vm3  ;;  %v391_v7 = vld [vmem:[%s5381_s24] sm:$0xff]  ;;  %v392_v8 = vld [vmem:[%s5381_s24 + $0x8] sm:$0xff]  ;;  %v5032_v27 = vunpack.i.l.s16 %v1019_v11  ;;  %s5301_s16 = smov 24   ;;  %s5242_s19 = sshll.u32 %s8844_s18, 7 }
  0x11   : > { %v5386_v9 = vld [vmem:[%s5381_s24 + $0x10] sm:$0xff]  ;;  %v1016_v10 = vsel %vm1014_vm4, 65537, %v8532_v5  ;;  %vm1045_vm5 = vcmp.eq.s32.totalorder %v457_v4, 15  ;;  %v423_v12 = vpack.c.bf16 %v391_v7, %v391_v7  ;;  %v424_v13 = vpack.c.bf16 %v392_v8, %v392_v8  ;;  %v5390_v14 = vld [vmem:[%s5381_s24 + $0x18] sm:$0xff]  ;;  %v5395_v17 = vld [vmem:[%s5381_s24 + $0x20] sm:$0xff] }
  0x12   : > { %v425_v15 = vpack.c.bf16 %v5386_v9, %v5386_v9  ;;  %v1018_v16 = vunpack.c.l.b16 %v1016_v10  ;;  %vm1118_vm6 = vmpackc.low %vm1045_vm5, %vm1045_vm5  ;;  %v426_v18 = vpack.c.bf16 %v5390_v14, %v5390_v14  ;;  %v5401_v20 = vld [vmem:[%s5381_s24 + $0x28] sm:$0xff]  ;;  %v427_v21 = vpack.c.bf16 %v5395_v17, %v5395_v17  ;;  %v415_v39 = vld [vmem:[%s5381_s24 + $0xc0] sm:$0xff] }
  0x13   : > { %v1120_v19 = vsel %vm1118_vm6, 65537, %v8532_v5  ;;  %v495_v22 = vunpack.c.l.b16 %v423_v12  ;;  %v496_v23 = vunpack.c.l.b16 %v424_v13  ;;  %v428_v32 = vpack.c.bf16 %v5401_v20, %v5401_v20  ;;  %v416_v40 = vld [vmem:[%s5381_s24 + $0xc8] sm:$0xff]  ;;  %v5426_v47 = vld [vmem:[%s5381_s24 + $0x30] sm:$0xff]  ;;  %v5431_v52 = vld [vmem:[%s5381_s24 + $0x38] sm:$0xff] }
  0x14   : > { %v497_v24 = vunpack.c.l.b16 %v425_v15  ;;  %v498_v26 = vunpack.c.l.b16 %v426_v18  ;;  %v1122_v29 = vunpack.c.l.b16 %v1120_v19  ;;  %v5031_v31 = vunpack.i.l.s16 %v1018_v16  ;;  %vm5908_vm3 = vmand %vm1007_vm2, %vm831_vm8 }
  0x15   : > { %v5407_v30 = vpack.c.b16 %v496_v23, %v495_v22  ;;  %v499_v33 = vunpack.c.l.b16 %v427_v21  ;;  %vm1026_vm9 = vcmp.ne.s32.totalorder %v5032_v27, %v1024_v28  ;;  %v500_v38 = vunpack.c.l.b16 %v428_v32  ;;  %v417_v32 = vld [vmem:[%s5381_s24 + $0xd0] sm:$0xff] }
  0x16   : > { %v5411_v34 = vpack.c.b16 %v498_v26, %v497_v24  ;;  %v5034_v37 = vunpack.i.l.s16 %v1122_v29  ;;  %vm1128_vm11 = vcmp.ne.s32.totalorder %v5032_v27, %v1023_v25  ;;  %v447_v43 = vpack.c.bf16 %v415_v39, %v415_v39 }
  0x17   : > { %5015 = vmatmul.msk.bf16.vlgmr.msra.gmra.mxu0 %vm543_vm7, %v5407_v30  ;;  %v3315_v35 = vshrl.u32 %v5407_v30, 16  ;;  %v8531_v36 = vshll.u32 %v5407_v30, 16  ;;  %vm1025_vm12 = vcmp.ne.s32.totalorder %v5031_v31, %v1023_v25  ;;  %v5423_v45 = vpack.c.b16 %v500_v38, %v499_v33 }
  0x18   : > { %v3321_v41 = vshrl.u32 %v5411_v34, 16  ;;  %v3324_v42 = vshll.u32 %v5411_v34, 16  ;;  %v448_v46 = vpack.c.bf16 %v416_v40, %v416_v40  ;;  %v519_v51 = vunpack.c.l.b16 %v447_v43  ;;  %vm5444_vm14 = vmpackc.low %vm1026_vm9, %vm1025_vm12 }
  0x19   : > { %v3459_v44 = vrot.slane %v8531_v36, 1  ;;  %v5428_v48 = vrot.slane %v3315_v35, 7  ;;  %vm1129_vm13 = vcmp.ne.s32.totalorder %v5034_v37, %v1024_v28  ;;  %v3328_v54 = vshrl.u32 %v5423_v45, 16 }
  0x1a   : > { %v3323_v49 = vrot.slane %v3321_v41, 7  ;;  %v3461_v50 = vrot.slane %v3324_v42, 1  ;;  %v3331_v55 = vshll.u32 %v5423_v45, 16  ;;  %v520_v58 = vunpack.c.l.b16 %v448_v46  ;;  %vm5456_vm15 = vmpackc.low %vm1129_vm13, %vm1128_vm11 }
  0x1b   : > { %v3460_v53 = vor.u32 %v3459_v44, %v3315_v35  ;;  %v429_v59 = vpack.c.bf16 %v5426_v47, %v5426_v47  ;;  %v3330_v61 = vrot.slane %v3328_v54, 7  ;;  %v430_v63 = vpack.c.bf16 %v5431_v52, %v5431_v52 }
  0x1c   : > { %v3326_v56 = vor.u32 %v3324_v42, %v3323_v49  ;;  %v3463_v57 = vor.u32 %v3461_v50, %v3321_v41  ;;  %v3464_v62 = vrot.slane %v3331_v55, 1  ;;  %v5450_v2 = vpack.c.b16 %v520_v58, %v519_v51  ;;  %v399_v41 = vld [vmem:[%s5381_s24 + $0x40] sm:$0xff]  ;;  %v400_v42 = vld [vmem:[%s5381_s24 + $0x48] sm:$0xff] }
  0x1d   : > { %v5438_v60 = vsel %vm1046_vm10, %v3460_v53, %v3461_v50  ;;  %v3333_v4 = vor.u32 %v3331_v55, %v3330_v61  ;;  %v501_v13 = vunpack.c.l.b16 %v429_v59  ;;  %v502_v15 = vunpack.c.l.b16 %v430_v63 }
  0x1e   : > { %v3327_v1 = vsel %vm831_vm8, %v5428_v48, %v3326_v56  ;;  %v3465_v10 = vsel %vm1046_vm10, %v3463_v57, %v3464_v62  ;;  %5027 = vmatmul.msk.bf16.vlgmr.msra.gmra.mxu3 %vm543_vm7, %v5450_v2  ;;  %v3466_v28 = vor.u32 %v3464_v62, %v3328_v54  ;;  %v8534_v33 = vshll.u32 %v5450_v2, 16 }
  0x1f   : > { %v3444_v3 = vsel %vm5444_vm14, 4286578559, %v3327_v1  ;;  %v3334_v11 = vsel %vm831_vm8, %v3323_v49, %v3333_v4  ;;  %v3524_v12 = vsel %vm5456_vm15, 4286578559, %v3465_v10  ;;  %v3398_v44 = vshrl.u32 %v5450_v2, 16 }
  0x20   : > { %v3541_v7 = vunpack.c.l.bf16 %v3444_v3  ;;  %v3542_v8 = vunpack.c.h.bf16 %v3444_v3  ;;  %v3445_v19 = vsel %vm5444_vm14, 4286578559, %v3334_v11  ;;  %v3701_v21 = vunpack.c.l.bf16 %v3524_v12 }
  0x21   : > { %v3543_v22 = vunpack.c.l.bf16 %v3445_v19  ;;  %v3544_v23 = vunpack.c.h.bf16 %v3445_v19  ;;  %v3702_v24 = vunpack.c.h.bf16 %v3524_v12  ;;  %v5497_v46 = vrot.slane %v8534_v33, 1  ;;  %v419_v19 = vld [vmem:[%s5381_s24 + $0xe0] sm:$0xff] }
  0x22   : > { %v3605_v16 = vmax.f32 %v3541_v7, %v5386_v9  ;;  %v3606_v18 = vmax.f32 %v3542_v8, %v5390_v14  ;;  %v5480_v14 = vpack.c.b16 %v502_v15, %v501_v13  ;;  %v431_v51 = vpack.c.bf16 %v399_v41, %v399_v41 }
  0x23   : > { %v5473_v26 = vmax.f32 %v3543_v22, %v5395_v17  ;;  %v5476_v27 = vmax.f32 %v3544_v23, %v5401_v20  ;;  %v418_v17 = vld [vmem:[%s5381_s24 + $0xd8] sm:$0xff]  ;;  %v449_v20 = vpack.c.bf16 %v417_v32, %v417_v32  ;;  %v432_v53 = vpack.c.bf16 %v400_v42, %v400_v42 }
  0x24   : > { %v5470_v25 = vmax.f32 %v3605_v16, %v3701_v21  ;;  %v5478_v9 = vmax.f32 %v3606_v18, %v3702_v24  ;;  %v3335_v29 = vshrl.u32 %v5480_v14, 16  ;;  %v3338_v31 = vshll.u32 %v5480_v14, 16  ;;  %v420_v21 = vld [vmem:[%s5381_s24 + $0xe8] sm:$0xff] }
  0x25   : > { %8612 = vst [vmem:[#allocation3_spill] sm:$0xff] %v5473_v26  ;;  %v450_v35 = vpack.c.bf16 %v418_v17, %v418_v17  ;;  %v521_v39 = vunpack.c.l.b16 %v449_v20  ;;  %v3496_v54 = vor.u32 %v5497_v46, %v3398_v44  ;;  %v503_v3 = vunpack.c.l.b16 %v431_v51 }
  0x26   : > { %8611 = vst [vmem:[#allocation2_spill] sm:$0xff] %v5470_v25  ;;  %v3337_v37 = vrot.slane %v3335_v29, 7  ;;  %v3467_v38 = vrot.slane %v3338_v31, 1  ;;  %v504_v4 = vunpack.c.l.b16 %v432_v53  ;;  %v5510_v7 = vrot.slane %v3398_v44, 7 }
  0x27   : > { %8613 = vst [vmem:[#allocation4_spill] sm:$0xff] %v5476_v27  ;;  %5016 = vmatmul.msk.bf16.gmra.mxu0 %vm543_vm7, %v5411_v34  ;;  %v522_v40 = vunpack.c.l.b16 %v450_v35  ;;  %v451_v24 = vpack.c.bf16 %v419_v19, %v419_v19  ;;  %vm1227_vm4 = vcmask 64512   ;;  %vm1270_vm5 = vcmask 97280  }
  0x28   : > { %8614 = vst [vmem:[#allocation5_spill] sm:$0xff] %v5478_v9  ;;  %v3340_v43 = vor.u32 %v3338_v31, %v3337_v37  ;;  %v5492_v34 = vsel %vm1046_vm10, %v3466_v28, %v3467_v38  ;;  %v5519_v12 = vpack.c.b16 %v504_v4, %v503_v3  ;;  %v3469_v15 = vor.u32 %v3467_v38, %v3335_v29 }
  0x29   : > { %8615 = vst [vmem:[#allocation6_spill] sm:$0xff] %v5492_v34  ;;  %v540_v49 = vpack.c.b16 %v522_v40, %v521_v39  ;;  %v452_v28 = vpack.c.bf16 %v420_v21, %v420_v21  ;;  %v523_v35 = vunpack.c.l.b16 %v451_v24  ;;  %v401_v40 = vld [vmem:[%s5381_s24 + $0x50] sm:$0xff]  ;;  %vm2914_vm9 = vcmask 1043456  }
  0x2a   : > { %v3341_v50 = vsel %vm831_vm8, %v3330_v61, %v3340_v43  ;;  %v3342_v16 = vshrl.u32 %v5519_v12, 16  ;;  %v3345_v18 = vshll.u32 %v5519_v12, 16  ;;  %v402_v43 = vld [vmem:[%s5381_s24 + $0x58] sm:$0xff]  ;;  %vm2832_vm11 = vcmask 130048  }
  0x2b   : > { %v3446_v55 = vsel %vm5444_vm14, 4286578559, %v3341_v50  ;;  %v3405_v56 = vshrl.u32 %v540_v49, 16  ;;  %v3408_v57 = vshll.u32 %v540_v49, 16  ;;  %v524_v39 = vunpack.c.l.b16 %v452_v28 }
  0x2c   : > { %v3545_v58 = vunpack.c.l.bf16 %v3446_v55  ;;  %v3546_v59 = vunpack.c.h.bf16 %v3446_v55  ;;  %v3344_v31 = vrot.slane %v3342_v16, 7  ;;  %v3470_v20 = vrot.slane %v3345_v18, 1 }
  0x2d   : > { %v3407_v62 = vrot.slane %v3405_v56, 7  ;;  %v3497_v63 = vrot.slane %v3408_v57, 1  ;;  %v5536_v38 = vpack.c.b16 %v524_v39, %v523_v35  ;;  %v403_v39 = vld [vmem:[%s5381_s24 + $0x60] sm:$0xff]  ;;  %vm2881_vm12 = vcmask 195584  }
  0x2e   : > { %5028 = vmatmul.msk.bf16.gmra.mxu3 %vm543_vm7, %v540_v49  ;;  %v5505_v1 = vmax.f32 %v3545_v58, %v5426_v47  ;;  %v5508_v61 = vmax.f32 %v3546_v59, %v5431_v52  ;;  %v5534_v29 = vsel %vm1046_vm10, %v3469_v15, %v3470_v20  ;;  %v434_v49 = vpack.c.bf16 %v402_v43, %v402_v43 }
  0x2f   : > { %v3410_v8 = vor.u32 %v3408_v57, %v3407_v62  ;;  %v5513_v10 = vsel %vm1046_vm10, %v3496_v54, %v3497_v63  ;;  %8621 = vst [vmem:[#allocation12_spill] sm:$0xff] %v5534_v29  ;;  %v8535_v51 = vshrl.u32 %v5536_v38, 16  ;;  %v3415_v53 = vshll.u32 %v5536_v38, 16 }
  0x30   : > { %8616 = vst [vmem:[#allocation7_spill] sm:$0xff] %v5505_v1 }
  0x31   : > { %8617 = vst [vmem:[#allocation8_spill] sm:$0xff] %v5508_v61  ;;  %v3411_v11 = vsel %vm831_vm8, %v5510_v7, %v3410_v8  ;;  %v5547_v57 = vrot.slane %v8535_v51, 7  ;;  %v5648_v51 = vld [vmem:[%s5381_s24 + $0xf8] sm:$0xff] }
  0x32   : > { %8618 = vst [vmem:[#allocation9_spill] sm:$0xff] %v5513_v10  ;;  %v3456_v47 = vsel %vm5444_vm14, 4286578559, %v3411_v11 }
  0x33   : > { %v3565_v13 = vunpack.c.l.bf16 %v3456_v47  ;;  %v3566_v52 = vunpack.c.h.bf16 %v3456_v47  ;;  %v3417_v3 = vor.u32 %v3415_v53, %v5547_v57 }
  0x35   : > { %v5527_v22 = vmax.f32 %v3565_v13, %v417_v32  ;;  %v5529_v23 = vmax.f32 %v3566_v52, %v418_v17  ;;  %v433_v32 = vpack.c.bf16 %v401_v40, %v401_v40  ;;  %v3499_v17 = vor.u32 %v3497_v63, %v3405_v56 }
  0x36   : > { %v506_v63 = vunpack.c.l.b16 %v434_v49  ;;  %v3418_v8 = vsel %vm831_vm8, %v3407_v62, %v3417_v3  ;;  %v404_v62 = vld [vmem:[%s5381_s24 + $0x68] sm:$0xff]  ;;  %v435_v49 = vpack.c.bf16 %v403_v39, %v403_v39 }
  0x37   : > { %5017 = vmatmul.msk.bf16.gmra.mxu0 %vm543_vm7, %v5423_v45  ;;  %8619 = vst [vmem:[#allocation10_spill] sm:$0xff] %v5527_v22  ;;  %v3347_v45 = vor.u32 %v3345_v18, %v3344_v31  ;;  %v505_v59 = vunpack.c.l.b16 %v433_v32  ;;  %v3457_v11 = vsel %vm5444_vm14, 4286578559, %v3418_v8  ;;  %v405_v8 = vld [vmem:[%s5381_s24 + $0x70] sm:$0xff] }
  0x38   : > { %8620 = vst [vmem:[#allocation11_spill] sm:$0xff] %v5529_v23  ;;  %v3568_v13 = vunpack.c.h.bf16 %v3457_v11 }
  0x39   : > { %v3348_v44 = vsel %vm831_vm8, %v3337_v37, %v3347_v45  ;;  %v5549_v37 = vrot.slane %v3415_v53, 1  ;;  %v532_v47 = vpack.c.b16 %v506_v63, %v505_v59 }
  0x3a   : > { %v3447_v50 = vsel %vm5444_vm14, 4286578559, %v3348_v44  ;;  %v5567_v24 = vmax.f32 %v3568_v13, %v420_v21 }
  0x3b   : > { %v3547_v54 = vunpack.c.l.bf16 %v3447_v50  ;;  %v3548_v55 = vunpack.c.h.bf16 %v3447_v50  ;;  %v5558_v4 = vsel %vm1046_vm10, %v3499_v17, %v5549_v37  ;;  %v3349_v52 = vshrl.u32 %v532_v47, 16 }
  0x3c   : > { %8624 = vst [vmem:[#allocation15_spill] sm:$0xff] %v5558_v4  ;;  %v3352_v15 = vshll.u32 %v532_v47, 16  ;;  %v507_v50 = vunpack.c.l.b16 %v435_v49 }
  0x3d   : > { %v5551_v58 = vmax.f32 %v3547_v54, %v399_v41  ;;  %v5553_v56 = vmax.f32 %v3548_v55, %v400_v42  ;;  %v3567_v41 = vunpack.c.l.bf16 %v3457_v11  ;;  %v3472_v42 = vor.u32 %v3470_v20, %v3342_v16  ;;  %8626 = vst [vmem:[#allocation17_spill] sm:$0xff] %v5567_v24  ;;  %v406_v11 = vld [vmem:[%s5381_s24 + $0x78] sm:$0xff] }
  0x3e   : > { %5029 = vmatmul.msk.bf16.gmra.mxu3 %vm543_vm7, %v5536_v38  ;;  %v3351_v28 = vrot.slane %v3349_v52, 7  ;;  %v3473_v35 = vrot.slane %v3352_v15, 1 }
  0x3f   : > { %8622 = vst [vmem:[#allocation13_spill] sm:$0xff] %v5551_v58  ;;  %v5565_v18 = vmax.f32 %v3567_v41, %v419_v19 }
  0x40   : > { %8623 = vst [vmem:[#allocation14_spill] sm:$0xff] %v5553_v56  ;;  %v3354_v45 = vor.u32 %v3352_v15, %v3351_v28  ;;  %v5572_v44 = vsel %vm1046_vm10, %v3472_v42, %v3473_v35  ;;  %v438_v42 = vpack.c.bf16 %v406_v11, %v406_v11 }
  0x41   : > { %8625 = vst [vmem:[#allocation16_spill] sm:$0xff] %v5565_v18 }
  0x42   : > { %8627 = vst [vmem:[#allocation18_spill] sm:$0xff] %v5572_v44  ;;  %v3355_v32 = vsel %vm831_vm8, %v3344_v31, %v3354_v45  ;;  %v3475_v31 = vor.u32 %v3473_v35, %v3349_v52  ;;  %v510_v49 = vunpack.c.l.b16 %v438_v42 }
  0x43   : > { %v3448_v16 = vsel %vm5444_vm14, 4286578559, %v3355_v32 }
  0x44   : > { %v3549_v19 = vunpack.c.l.bf16 %v3448_v16  ;;  %v3550_v21 = vunpack.c.h.bf16 %v3448_v16 }
  0x46   : > { %v5577_v20 = vmax.f32 %v3549_v19, %v401_v40  ;;  %v5579_v17 = vmax.f32 %v3550_v21, %v402_v43  ;;  %v437_v43 = vpack.c.bf16 %v405_v8, %v405_v8 }
  0x47   : > { %5018 = vmatmul.msk.bf16.gmra.mxu0 %vm543_vm7, %v5480_v14  ;;  %v436_v14 = vpack.c.bf16 %v404_v62, %v404_v62 }
  0x48   : > { %8628 = vst [vmem:[#allocation19_spill] sm:$0xff] %v5577_v20  ;;  %v509_v32 = vunpack.c.l.b16 %v437_v43  ;;  %v408_v43 = vld [vmem:[%s5381_s24 + $0x88] sm:$0xff] }
  0x49   : > { %8629 = vst [vmem:[#allocation20_spill] sm:$0xff] %v5579_v17  ;;  %v508_v53 = vunpack.c.l.b16 %v436_v14  ;;  %v440_v42 = vpack.c.bf16 %v408_v43, %v408_v43 }
  0x4a   : > { %v534_v14 = vpack.c.b16 %v510_v49, %v509_v32 }
  0x4b   : > { %v533_v54 = vpack.c.b16 %v508_v53, %v507_v50 }
  0x4c   : > { %v3366_v19 = vshll.u32 %v534_v14, 16 }
  0x4d   : > { %v3356_v55 = vshrl.u32 %v533_v54, 16  ;;  %v3359_v59 = vshll.u32 %v533_v54, 16 }
  0x4e   : > { %v3479_v50 = vrot.slane %v3366_v19, 1 }
  0x4f   : > { %v3358_v63 = vrot.slane %v3356_v55, 7  ;;  %v3476_v3 = vrot.slane %v3359_v59, 1 }
  0x51   : > { %v3361_v41 = vor.u32 %v3359_v59, %v3358_v63  ;;  %v5586_v13 = vsel %vm1046_vm10, %v3475_v31, %v3476_v3  ;;  %v3478_v16 = vor.u32 %v3476_v3, %v3356_v55 }
  0x52   : > { %8630 = vst [vmem:[#allocation21_spill] sm:$0xff] %v5586_v13  ;;  %v5277_v13 = vld [vmem:[%s5381_s24] sm:$0xff] }
  0x53   : > { %v3362_v40 = vsel %vm831_vm8, %v3351_v28, %v3361_v41  ;;  %v3363_v28 = vshrl.u32 %v534_v14, 16  ;;  %v5597_v31 = vsel %vm1046_vm10, %v3478_v16, %v3479_v50 }
  0x54   : > { %v3449_v15 = vsel %vm5444_vm14, 4286578559, %v3362_v40  ;;  %8633 = vst [vmem:[#allocation24_spill] sm:$0xff] %v5597_v31  ;;  %v407_v40 = vld [vmem:[%s5381_s24 + $0x80] sm:$0xff]  ;;  %v8665_v31 = vshll.u32 %v5407_v30, 16  ;;  %v8666_v30 = vmov 0 }
  0x55   : > { %v3551_v45 = vunpack.c.l.bf16 %v3449_v15  ;;  %v3365_v21 = vrot.slane %v3363_v28, 7  ;;  %v439_v3 = vpack.c.bf16 %v407_v40, %v407_v40  ;;  %v8667_v30 = vsel %vm5908_vm3, 4294967295, %v8666_v30 }
  0x56   : > { %v3320_v17 = vor.u32 %v8665_v31, %v5428_v48  ;;  %8668 = vst [vmem:[#allocation53_spill] sm:$0xff] %v8667_v30 }
  0x57   : > { %5019 = vmatmul.msk.bf16.gmra.mxu0 %vm543_vm7, %v5519_v12  ;;  %v3552_v12 = vunpack.c.h.bf16 %v3449_v15  ;;  %v5591_v52 = vmax.f32 %v3551_v45, %v403_v39  ;;  %v3368_v53 = vor.u32 %v3366_v19, %v3365_v21  ;;  %v511_v15 = vunpack.c.l.b16 %v439_v3 }
  0x58   : > { %v512_v45 = vunpack.c.l.b16 %v440_v42 }
  0x59   : > { %8631 = vst [vmem:[#allocation22_spill] sm:$0xff] %v5591_v52  ;;  %v5593_v35 = vmax.f32 %v3552_v12, %v404_v62  ;;  %v3369_v39 = vsel %vm831_vm8, %v3358_v63, %v3368_v53  ;;  %v3481_v12 = vor.u32 %v3479_v50, %v3363_v28 }
  0x5a   : > { %v3450_v62 = vsel %vm5444_vm14, 4286578559, %v3369_v39  ;;  %v535_v63 = vpack.c.b16 %v512_v45, %v511_v15 }
  0x5b   : > { %8632 = vst [vmem:[#allocation23_spill] sm:$0xff] %v5593_v35  ;;  %v3553_v59 = vunpack.c.l.bf16 %v3450_v62  ;;  %v3554_v41 = vunpack.c.h.bf16 %v3450_v62  ;;  %v410_v62 = vld [vmem:[%s5381_s24 + $0x98] sm:$0xff] }
  0x5c   : > { %v3370_v32 = vshrl.u32 %v535_v63, 16  ;;  %v3373_v49 = vshll.u32 %v535_v63, 16  ;;  %v442_v3 = vpack.c.bf16 %v410_v62, %v410_v62 }
  0x5d   : > { %v5606_v55 = vmax.f32 %v3554_v41, %v406_v11 }
  0x5e   : > { %v3372_v16 = vrot.slane %v3370_v32, 7  ;;  %v3482_v19 = vrot.slane %v3373_v49, 1  ;;  %v514_v45 = vunpack.c.l.b16 %v442_v3 }
  0x5f   : > { %8635 = vst [vmem:[#allocation26_spill] sm:$0xff] %v5606_v55 }
  0x60   : > { %v3375_v53 = vor.u32 %v3373_v49, %v3372_v16  ;;  %v5610_v39 = vsel %vm1046_vm10, %v3481_v12, %v3482_v19 }
  0x61   : > { %8636 = vst [vmem:[#allocation27_spill] sm:$0xff] %v5610_v39 }
  0x62   : > { %v3376_v11 = vsel %vm831_vm8, %v3365_v21, %v3375_v53  ;;  %v3484_v21 = vor.u32 %v3482_v19, %v3370_v32  ;;  %v5635_v32 = vld [vmem:[%s8521_s2] ss:$0 sm:$0xff] }
  0x63   : > { %v3451_v41 = vsel %vm5444_vm14, 4286578559, %v3376_v11 }
  0x64   : > { %v3556_v28 = vunpack.c.h.bf16 %v3451_v41 }
  0x66   : > { %v5619_v42 = vmax.f32 %v3556_v28, %v408_v43  ;;  %v412_v43 = vld [vmem:[%s5381_s24 + $0xa8] sm:$0xff] }
  0x67   : > { %5020 = vmatmul.msk.bf16.gmra.mxu0 %vm543_vm7, %v532_v47  ;;  %v5604_v47 = vmax.f32 %v3553_v59, %v405_v8  ;;  %v409_v8 = vld [vmem:[%s5381_s24 + $0x90] sm:$0xff]  ;;  %v444_v3 = vpack.c.bf16 %v412_v43, %v412_v43 }
  0x68   : > { %v441_v59 = vpack.c.bf16 %v409_v8, %v409_v8  ;;  %8638 = vst [vmem:[#allocation29_spill] sm:$0xff] %v5619_v42 }
  0x69   : > { %8634 = vst [vmem:[#allocation25_spill] sm:$0xff] %v5604_v47  ;;  %v516_v33 = vunpack.c.l.b16 %v444_v3 }
  0x6a   : > { %v513_v15 = vunpack.c.l.b16 %v441_v59 }
  0x6c   : > { %v5622_v12 = vpack.c.b16 %v514_v45, %v513_v15 }
  0x6e   : > { %v3377_v49 = vshrl.u32 %v5622_v12, 16  ;;  %v3380_v53 = vshll.u32 %v5622_v12, 16 }
  0x70   : > { %v3379_v11 = vrot.slane %v3377_v49, 7  ;;  %v3485_v36 = vrot.slane %v3380_v53, 1 }
  0x72   : > { %v3382_v5 = vor.u32 %v3380_v53, %v3379_v11 }
  0x74   : > { %v3383_v59 = vsel %vm831_vm8, %v3372_v16, %v3382_v5  ;;  %v5645_v16 = vld [vmem:[%s5381_s24 + $0xf0] sm:$0xff] }
  0x75   : > { %v3452_v19 = vsel %vm5444_vm14, 4286578559, %v3383_v59  ;;  %v453_v59 = vpack.c.bf16 %v5645_v16, %v5645_v16 }
  0x76   : > { %v3558_v28 = vunpack.c.h.bf16 %v3452_v19 }
  0x77   : > { %5021 = vmatmul.msk.bf16.gmra.mxu0 %vm543_vm7, %v533_v54  ;;  %v3555_v54 = vunpack.c.l.bf16 %v3451_v41  ;;  %v5627_v41 = vsel %vm1046_vm10, %v3484_v21, %v3485_v36 }
  0x78   : > { %8639 = vst [vmem:[#allocation30_spill] sm:$0xff] %v5627_v41  ;;  %v5641_v21 = vmax.f32 %v3558_v28, %v410_v62  ;;  %v525_v62 = vunpack.c.l.b16 %v453_v59  ;;  %v5674_v59 = vld [vmem:[%s5381_s24 + $0xb8] sm:$0xff] }
  0x79   : > { %v5617_v50 = vmax.f32 %v3555_v54, %v407_v40  ;;  %v411_v40 = vld [vmem:[%s5381_s24 + $0xa0] sm:$0xff]  ;;  %v3557_v54 = vunpack.c.l.bf16 %v3452_v19  ;;  %v454_v19 = vpack.c.bf16 %v5648_v51, %v5648_v51 }
  0x7a   : > { %8641 = vst [vmem:[#allocation32_spill] sm:$0xff] %v5641_v21 }
  0x7b   : > { %8637 = vst [vmem:[#allocation28_spill] sm:$0xff] %v5617_v50  ;;  %v5639_v45 = vmax.f32 %v3557_v54, %v409_v8  ;;  %v3487_v54 = vor.u32 %v3485_v36, %v3377_v49  ;;  %v5671_v49 = vld [vmem:[%s5381_s24 + $0xb0] sm:$0xff] }
  0x7d   : > { %8640 = vst [vmem:[#allocation31_spill] sm:$0xff] %v5639_v45 }
  0x87   : > { %5022 = vmatmul.msk.bf16.gmra.mxu0 %vm543_vm7, %v534_v14  ;;  %v443_v14 = vpack.c.bf16 %v411_v40, %v411_v40 }
  0x89   : > { %v515_v53 = vunpack.c.l.b16 %v443_v14  ;;  %v526_v14 = vunpack.c.l.b16 %v454_v19 }
  0x8b   : > { %v5655_v8 = vpack.c.b16 %v516_v33, %v515_v53  ;;  %v5659_v24 = vpack.c.b16 %v526_v14, %v525_v62 }
  0x8d   : > { %v3384_v28 = vshrl.u32 %v5655_v8, 16  ;;  %5030 = vmatmul.msk.bf16.gmra.mxu3 %vm543_vm7, %v5659_v24 }
  0x8f   : > { %v5662_v23 = vrot.slane %v3384_v28, 7 }
  0x94   : > { %v605_v15 = vpop.f32.mrf.mxu0 }
  0x95   : > { %v606_v5 = vadd.f32 %v5635_v32, %v605_v15  ;;  %v3387_v15 = vshll.u32 %v5655_v8, 16 }
  0x97   : > { %5023 = vmatmul.msk.bf16.gmra.mxu0 %vm543_vm7, %v535_v63  ;;  %v685_v3 = vmax.f32 %v606_v5, 0.0  ;;  %v3488_v22 = vrot.slane %v3387_v15, 1  ;;  %v3389_v5 = vor.u32 %v3387_v15, %v5662_v23 }
  0x99   : > { %v717_v33 = vpack.c.bf16 %v685_v3, %v685_v3  ;;  %v5668_v36 = vsel %vm1046_vm10, %v3487_v54, %v3488_v22  ;;  %v3390_v62 = vsel %vm831_vm8, %v3379_v11, %v3389_v5  ;;  %v445_v3 = vpack.c.bf16 %v5671_v49, %v5671_v49 }
  0x9a   : > { %8642 = vst [vmem:[#allocation33_spill] sm:$0xff] %v5668_v36  ;;  %v446_v54 = vpack.c.bf16 %v5674_v59, %v5674_v59  ;;  %v3490_v42 = vor.u32 %v3488_v22, %v3384_v28 }
  0x9b   : > { %v783_v14 = vunpack.c.l.b16 %v717_v33  ;;  %v8646_v33 = vshrl.u32 %v5536_v38, 16 }
  0x9c   : > { %v607_v63 = vpop.f32.mrf.mxu0 }
  0x9d   : > { %v608_v18 = vadd.f32 %v5635_v32, %v607_v63  ;;  %v3453_v63 = vsel %vm5444_vm14, 4286578559, %v3390_v62  ;;  %v3502_v5 = vor.u32 %v5549_v37, %v8646_v33  ;;  %v3422_v62 = vshll.u32 %v5659_v24, 16 }
  0x9e   : > { %v3559_v4 = vunpack.c.l.bf16 %v3453_v63  ;;  %v3560_v15 = vunpack.c.h.bf16 %v3453_v63  ;;  %v517_v63 = vunpack.c.l.b16 %v445_v3 }
  0x9f   : > { %v686_v53 = vmax.f32 %v608_v18, 0.0 }
  0xa0   : > { %v5685_v45 = vmax.f32 %v3559_v4, %v411_v40 }
  0xa1   : > { %v718_v19 = vpack.c.bf16 %v686_v53, %v686_v53  ;;  %v5687_v53 = vmax.f32 %v3560_v15, %v412_v43  ;;  %v5689_v11 = vpop.f32.mrf.mxu3  ;;  %v518_v43 = vunpack.c.l.b16 %v446_v54  ;;  %v8648_v54 = vshll.u32 %v5450_v2, 16 }
  0xa2   : > { %8644 = vst [vmem:[#allocation35_spill] sm:$0xff] %v5685_v45 }
  0xa3   : > { %v784_v18 = vunpack.c.l.b16 %v718_v19  ;;  %8645 = vst [vmem:[#allocation36_spill] sm:$0xff] %v5687_v53  ;;  %v8536_v19 = vshrl.u32 %v5659_v24, 16  ;;  %v5714_v53 = vpack.c.b16 %v518_v43, %v517_v63 }
  0xa4   : > { %v610_v10 = vpop.f32.mrf.mxu0 }
  0xa5   : > { %v5683_v21 = vpack.c.b16 %v784_v18, %v783_v14  ;;  %v611_v36 = vadd.f32 %v5635_v32, %v610_v10  ;;  %v3421_v38 = vrot.slane %v8536_v19, 7  ;;  %v5703_v14 = vrot.slane %v3422_v62, 1 }
  0xa6   : > { %v3403_v19 = vor.u32 %v8648_v54, %v5510_v7  ;;  %v3394_v63 = vshll.u32 %v5714_v53, 16 }
  0xa7   : > { %8643 = vst [vmem:[#allocation34_spill] sm:$0xff] %v5683_v21  ;;  %5024 = vmatmul.msk.bf16.gmra.mxu0 %vm543_vm7, %v5622_v12  ;;  %v833_v4 = vshrl.u32 %v5683_v21, 16  ;;  %v836_v40 = vshll.u32 %v5683_v21, 16  ;;  %v3424_v15 = vor.u32 %v3422_v62, %v3421_v38  ;;  %v5709_v10 = vsel %vm1046_vm10, %v3502_v5, %v5703_v14 }
  0xa8   : > { %8647 = vst [vmem:[#allocation37_spill] sm:$0xff] %v5709_v10  ;;  %v687_v3 = vmax.f32 %v611_v36, 0.0  ;;  %v3391_v5 = vshrl.u32 %v5714_v53, 16 }
  0xa9   : > { %v5705_v37 = vrot.slane %v833_v4, 7  ;;  %v1047_v18 = vrot.slane %v836_v40, 1  ;;  %v3425_v62 = vsel %vm831_vm8, %v5547_v57, %v3424_v15  ;;  %v5728_v57 = vpop.f32.mrf.mxu3 }
  0xaa   : > { %v3458_v36 = vsel %vm5444_vm14, 4286578559, %v3425_v62  ;;  %v3393_v28 = vrot.slane %v3391_v5, 7 }
  0xab   : > { %v5712_v12 = vor.u32 %v836_v40, %v5705_v37  ;;  %v1048_v33 = vor.u32 %v1047_v18, %v833_v4  ;;  %v3569_v2 = vunpack.c.l.bf16 %v3458_v36  ;;  %v3570_v7 = vunpack.c.h.bf16 %v3458_v36 }
  0xac   : > { %v612_v45 = vpop.f32.mrf.mxu0  ;;  %v719_v4 = vpack.c.bf16 %v687_v3, %v687_v3  ;;  %v3491_v40 = vrot.slane %v3394_v63, 1  ;;  %v3396_v15 = vor.u32 %v3394_v63, %v3393_v28  ;;  %v5737_v54 = vsel %vm831_vm8, %v3393_v28, %v3403_v19 }
  0xad   : > { %v613_v38 = vadd.f32 %v5635_v32, %v612_v45  ;;  %959 = vrot.lane.b32.xlu0 %v5712_v12, %s5295_s27  ;;  %v5731_v45 = vmax.f32 %v3569_v2, %v5645_v16  ;;  %v5734_v43 = vmax.f32 %v3570_v7, %v5648_v51  ;;  %8650 = vst [vmem:[#allocation39_spill] sm:$0xff] %v5737_v54 }
  0xae   : > { %v5740_v62 = vsel %vm1046_vm10, %v3490_v42, %v3491_v40  ;;  %v3493_v3 = vor.u32 %v3491_v40, %v3391_v5  ;;  %v3397_v10 = vsel %vm831_vm8, %v5662_v23, %v3396_v15 }
  0xaf   : > { %v688_v22 = vmax.f32 %v613_v38, 0.0  ;;  %8649 = vst [vmem:[#allocation38_spill] sm:$0xff] %v5734_v43  ;;  %v785_v38 = vunpack.c.l.b16 %v719_v4  ;;  %v3454_v16 = vsel %vm5444_vm14, 4286578559, %v3397_v10 }
  0xb0   : > { %8651 = vst [vmem:[#allocation40_spill] sm:$0xff] %v5740_v62  ;;  %v3495_v51 = vsel %vm1046_vm10, %v3493_v3, %v5497_v46  ;;  %v3561_v19 = vunpack.c.l.bf16 %v3454_v16  ;;  %v3562_v5 = vunpack.c.h.bf16 %v3454_v16 }
  0xb1   : > { %v720_v18 = vpack.c.bf16 %v688_v22, %v688_v22  ;;  %v3534_v42 = vsel %vm5456_vm15, 4286578559, %v3495_v51  ;;  %v670_v15 = vpop.f32.mrf.mxu3 }
  0xb2   : > { %v3721_v2 = vunpack.c.l.bf16 %v3534_v42  ;;  %v3625_v7 = vmax.f32 %v3561_v19, %v5671_v49  ;;  %v3626_v4 = vmax.f32 %v3562_v5, %v5674_v59  ;;  %v3722_v22 = vunpack.c.h.bf16 %v3534_v42 }
  0xb3   : > { %v786_v36 = vunpack.c.l.b16 %v720_v18 }
  0xb4   : > { %v615_v50 = vpop.f32.mrf.mxu0  ;;  %v5761_v18 = vmax.f32 %v3625_v7, %v3721_v2  ;;  %v5763_v3 = vmax.f32 %v3626_v4, %v3722_v22 }
  0xb5   : > { %v5748_v63 = vpack.c.b16 %v786_v36, %v785_v38  ;;  %1147 = vrot.lane.b32.xlu0 %v5683_v21, %s5296_s28  ;;  %v616_v23 = vadd.f32 %v5635_v32, %v615_v50 }
  0xb6   : > { %8653 = vst [vmem:[#allocation42_spill] sm:$0xff] %v5761_v18 }
  0xb7   : > { %8652 = vst [vmem:[#allocation41_spill] sm:$0xff] %v5748_v63  ;;  %5025 = vmatmul.msk.bf16.gmra.mxu0 %vm543_vm7, %v5655_v8  ;;  %v840_v10 = vshrl.u32 %v5748_v63, 16  ;;  %v843_v46 = vshll.u32 %v5748_v63, 16  ;;  %v689_v50 = vmax.f32 %v616_v23, 0.0 }
  0xb8   : > { %8654 = vst [vmem:[#allocation43_spill] sm:$0xff] %v5763_v3 }
  0xb9   : > { %v842_v28 = vrot.slane %v840_v10, 7  ;;  %v1049_v40 = vrot.slane %v843_v46, 1  ;;  %v721_v59 = vpack.c.bf16 %v689_v50, %v689_v50  ;;  %v672_v23 = vpop.f32.mrf.mxu3 }
  0xba   : > { %v673_v50 = vadd.f32 %v5635_v32, %v672_v23 }
  0xbb   : > { %v845_v38 = vor.u32 %v843_v46, %v842_v28  ;;  %v5766_v8 = vsel %vm1046_vm10, %v1048_v33, %v1049_v40  ;;  %v1051_v16 = vor.u32 %v1049_v40, %v840_v10  ;;  %v787_v5 = vunpack.c.l.b16 %v721_v59 }
  0xbc   : > { %v617_v36 = vpop.f32.mrf.mxu0  ;;  %v671_v40 = vadd.f32 %v5635_v32, %v670_v15  ;;  %v668_v15 = vadd.f32 %v5635_v32, %v5728_v57 }
  0xbd   : > { %v618_v51 = vadd.f32 %v5635_v32, %v617_v36  ;;  %v5771_v49 = vsel %vm831_vm8, %v5705_v37, %v845_v38 }
  0xbe   : > { %961 = vrot.lane.b32.xlu1 %v5771_v49, %s5295_s27  ;;  %v711_v23 = vmax.f32 %v671_v40, 0.0 }
  0xbf   : > { %v690_v42 = vmax.f32 %v618_v51, 0.0 }
  0xc1   : > { %v722_v19 = vpack.c.bf16 %v690_v42, %v690_v42 }
  0xc3   : > { %v788_v2 = vunpack.c.l.b16 %v722_v19 }
  0xc4   : > { %v620_v46 = vpop.f32.mrf.mxu0 }
  0xc5   : > { %v5775_v7 = vpack.c.b16 %v788_v2, %v787_v5  ;;  %v621_v33 = vadd.f32 %v5635_v32, %v620_v46  ;;  %v675_v2 = vpop.f32.mrf.mxu3 }
  0xc6   : > { %1149 = vrot.lane.b32.xlu1 %v5748_v63, %s5296_s28 }
  0xc7   : > { %8655 = vst [vmem:[#allocation44_spill] sm:$0xff] %v5775_v7  ;;  %5026 = vmatmul.msk.bf16.gmra.mxu0 %vm543_vm7, %v5714_v53  ;;  %v848_v37 = vshrl.u32 %v5775_v7, 16  ;;  %v851_v10 = vshll.u32 %v5775_v7, 16  ;;  %v691_v38 = vmax.f32 %v621_v33, 0.0  ;;  %v666_v53 = vadd.f32 %v5635_v32, %v5689_v11 }
  0xc8   : > { %v743_v11 = vpack.c.bf16 %v711_v23, %v711_v23 }
  0xc9   : > { %v850_v4 = vrot.slane %v848_v37, 7  ;;  %v1052_v22 = vrot.slane %v851_v10, 1  ;;  %v723_v46 = vpack.c.bf16 %v691_v38, %v691_v38 }
  0xca   : > { %v809_v57 = vunpack.c.l.b16 %v743_v11 }
  0xcb   : > { %v853_v36 = vor.u32 %v851_v10, %v850_v4  ;;  %v5787_v51 = vsel %vm1046_vm10, %v1051_v16, %v1052_v22  ;;  %v1054_v42 = vor.u32 %v1052_v22, %v848_v37  ;;  %v712_v16 = vmax.f32 %v673_v50, 0.0 }
  0xcc   : > { %v622_v59 = vpop.f32.mrf.mxu0  ;;  %v709_v37 = vmax.f32 %v666_v53, 0.0  ;;  %v710_v22 = vmax.f32 %v668_v15, 0.0 }
  0xcd   : > { %v623_v19 = vadd.f32 %v5635_v32, %v622_v59  ;;  %v5793_v5 = vsel %vm831_vm8, %v842_v28, %v853_v36  ;;  %v744_v54 = vpack.c.bf16 %v712_v16, %v712_v16  ;;  %v789_v59 = vunpack.c.l.b16 %v723_v46 }
  0xce   : > { %963 = vrot.lane.b32.xlu2 %v5793_v5, %s5295_s27  ;;  %v741_v36 = vpack.c.bf16 %v709_v37, %v709_v37  ;;  %v742_v62 = vpack.c.bf16 %v710_v22, %v710_v22 }
  0xcf   : > { %v692_v33 = vmax.f32 %v623_v19, 0.0  ;;  %v810_v40 = vunpack.c.l.b16 %v744_v54  ;;  %v677_v19 = vpop.f32.mrf.mxu3 }
  0xd0   : > { %v807_v15 = vunpack.c.l.b16 %v741_v36  ;;  %v808_v16 = vunpack.c.l.b16 %v742_v62  ;;  %v678_v54 = vadd.f32 %v5635_v32, %v677_v19 }
  0xd1   : > { %v724_v10 = vpack.c.bf16 %v692_v33, %v692_v33  ;;  %v5808_v46 = vpack.c.b16 %v810_v40, %v809_v57  ;;  %v676_v33 = vadd.f32 %v5635_v32, %v675_v2 }
  0xd2   : > { %v714_v57 = vmax.f32 %v678_v54, 0.0  ;;  %v5822_v40 = vpack.c.b16 %v808_v16, %v807_v15 }
  0xd3   : > { %v790_v3 = vunpack.c.l.b16 %v724_v10  ;;  %8657 = vst [vmem:[#allocation46_spill] sm:$0xff] %v5808_v46  ;;  %v713_v62 = vmax.f32 %v676_v33, 0.0  ;;  %v8539_v2 = vshrl.u32 %v5808_v46, 16 }
  0xd4   : > { %v625_v28 = vpop.f32.mrf.mxu0  ;;  %8658 = vst [vmem:[#allocation47_spill] sm:$0xff] %v5822_v40 }
  0xd5   : > { %v5799_v18 = vpack.c.b16 %v790_v3, %v789_v59  ;;  %v626_v50 = vadd.f32 %v5635_v32, %v625_v28  ;;  %v745_v19 = vpack.c.bf16 %v713_v62, %v713_v62 }
  0xd6   : > { %1151 = vrot.lane.b32.xlu2 %v5775_v7, %s5296_s28 }
  0xd7   : > { %8656 = vst [vmem:[#allocation45_spill] sm:$0xff] %v5799_v18  ;;  %1153 = vrot.lane.b32.xlu1 %v5799_v18, %s5296_s28  ;;  %v856_v38 = vshrl.u32 %v5799_v18, 16  ;;  %v859_v53 = vshll.u32 %v5799_v18, 16  ;;  %v693_v37 = vmax.f32 %v626_v50, 0.0  ;;  %v811_v55 = vunpack.c.l.b16 %v745_v19 }
  0xd9   : > { %v858_v23 = vrot.slane %v856_v38, 7  ;;  %v1055_v3 = vrot.slane %v859_v53, 1  ;;  %v725_v50 = vpack.c.bf16 %v693_v37, %v693_v37 }
  0xdb   : > { %v861_v10 = vor.u32 %v859_v53, %v858_v23  ;;  %v5813_v22 = vsel %vm1046_vm10, %v1054_v42, %v1055_v3  ;;  %v1057_v11 = vor.u32 %v1055_v3, %v856_v38  ;;  %v8540_v38 = vshrl.u32 %v5822_v40, 16 }
  0xdc   : > { %v627_v59 = vpop.f32.mrf.mxu0  ;;  %v746_v3 = vpack.c.bf16 %v714_v57, %v714_v57 }
  0xdd   : > { %v628_v28 = vadd.f32 %v5635_v32, %v627_v59  ;;  %v5817_v36 = vsel %vm831_vm8, %v850_v4, %v861_v10  ;;  %v938_v4 = vrot.slane %v8539_v2, 7  ;;  %v8541_v10 = vshll.u32 %v5808_v46, 16 }
  0xde   : > { %965 = vrot.lane.b32.xlu0 %v5817_v36, %s5295_s27  ;;  %v791_v59 = vunpack.c.l.b16 %v725_v50  ;;  %v812_v15 = vunpack.c.l.b16 %v746_v3  ;;  %v5834_v16 = vrot.slane %v8540_v38, 7 }
  0xdf   : > { %v694_v53 = vmax.f32 %v628_v28, 0.0  ;;  %v941_v37 = vor.u32 %v8541_v10, %v938_v4 }
  0xe1   : > { %v726_v42 = vpack.c.bf16 %v694_v53, %v694_v53  ;;  %v5841_v53 = vpack.c.b16 %v812_v15, %v811_v55 }
  0xe3   : > { %v792_v41 = vunpack.c.l.b16 %v726_v42  ;;  %8660 = vst [vmem:[#allocation49_spill] sm:$0xff] %v5841_v53  ;;  %v5845_v42 = vsel %vm831_vm8, %v5834_v16, %v941_v37  ;;  %v8542_v37 = vshrl.u32 %v5841_v53, 16 }
  0xe4   : > { %v630_v33 = vpop.f32.mrf.mxu0  ;;  %8661 = vst [vmem:[#allocation50_spill] sm:$0xff] %v5845_v42 }
  0xe5   : > { %v5828_v54 = vpack.c.b16 %v792_v41, %v791_v59  ;;  %v631_v28 = vadd.f32 %v5635_v32, %v630_v33 }
  0xe6   : > { %1171 = vrot.lane.b32.xlu0 %v5822_v40, %s5296_s28 }
  0xe7   : > { %8659 = vst [vmem:[#allocation48_spill] sm:$0xff] %v5828_v54  ;;  %v864_v62 = vshrl.u32 %v5828_v54, 16  ;;  %v867_v57 = vshll.u32 %v5828_v54, 16  ;;  %v695_v19 = vmax.f32 %v631_v28, 0.0 }
  0xe9   : > { %v866_v41 = vrot.slane %v864_v62, 7  ;;  %v1058_v50 = vrot.slane %v867_v57, 1  ;;  %v727_v55 = vpack.c.bf16 %v695_v19, %v695_v19  ;;  %v5243_v19 = vld [vmem:[%s8524_s5] sm:$0x30] }
  0xeb   : > { %v869_v3 = vor.u32 %v867_v57, %v866_v41  ;;  %v5848_v59 = vsel %vm1046_vm10, %v1057_v11, %v1058_v50  ;;  %v5850_v2 = vor.u32 %v1058_v50, %v864_v62  ;;  %v793_v28 = vunpack.c.l.b16 %v727_v55  ;;  %v5059_v50 = vld [vmem:[%s8524_s5] sm:$0xf] }
  0xec   : > { %v632_v33 = vpop.f32.mrf.mxu0  ;;  %v5863_v57 = vrot.slane %v8542_v37, 7 }
  0xed   : > { %v633_v38 = vadd.f32 %v5635_v32, %v632_v33  ;;  %v5854_v10 = vsel %vm831_vm8, %v858_v23, %v869_v3  ;;  %v8543_v23 = vshll.u32 %v5841_v53, 16  ;;  %v5060_v3 = vor.u32 %v5243_v19, %v5059_v50 }
  0xee   : > { %967 = vrot.lane.b32.xlu1 %v5854_v10, %s5295_s27  ;;  %985 = vrot.lane.b32.xlu0 %v5845_v42, %s5295_s27  ;;  %v8663_v50 = vmov 0  }
  0xef   : > { %v696_v15 = vmax.f32 %v633_v38, 0.0  ;;  %v1405_v55 = vsel %vm1303_vm1, %v5060_v3, 0 }
  0xf0   : > { %1414 = vmatpush.bf16.msra.mxu2 %v1405_v55 }
  0xf1   : > { %v728_v11 = vpack.c.bf16 %v696_v15, %v696_v15 }
  0xf3   : > { %v794_v62 = vunpack.c.l.b16 %v728_v11  ;;  %v949_v11 = vor.u32 %v8543_v23, %v5863_v57  ;;  %1415 = vmatmul.bf16.vlgmr.msra.gmra.mxu2 %v8663_v50 }
  0xf4   : > { %v635_v38 = vpop.f32.mrf.mxu0 }
  0xf5   : > { %v5872_v33 = vpack.c.b16 %v794_v62, %v793_v28  ;;  %v636_v15 = vadd.f32 %v5635_v32, %v635_v38  ;;  %v5887_v3 = vsel %vm831_vm8, %v938_v4, %v949_v11  ;;  %v3523_v4 = vsel %vm5456_vm15, 4286578559, %v5438_v60 }
  0xf6   : > { %1173 = vrot.lane.b32.xlu1 %v5808_v46, %s5296_s28  ;;  %8664 = vst [vmem:[#allocation52_spill] sm:$0xff] %v5887_v3  ;;  %v3442_v60 = vsel %vm5908_vm3, 4286578559, %v3320_v17  ;;  %v3699_v31 = vunpack.c.l.bf16 %v3523_v4  ;;  %v3700_v17 = vunpack.c.h.bf16 %v3523_v4 }
  0xf7   : > { %8662 = vst [vmem:[#allocation51_spill] sm:$0xff] %v5872_v33  ;;  %1157 = vrot.lane.b32.xlu0 %v5872_v33, %s5296_s28  ;;  %v872_v37 = vshrl.u32 %v5872_v33, 16  ;;  %v875_v62 = vshll.u32 %v5872_v33, 16  ;;  %v697_v19 = vmax.f32 %v636_v15, 0.0 }
  0xf9   : > { %v874_v28 = vrot.slane %v872_v37, 7  ;;  %v729_v23 = vpack.c.bf16 %v697_v19, %v697_v19 }
  0xfb   : > { %v877_v38 = vor.u32 %v875_v62, %v874_v28  ;;  %v795_v11 = vunpack.c.l.b16 %v729_v23  ;;  %v3443_v23 = vsel %vm5444_vm14, 4286578559, %v3442_v60 }
  0xfc   : > { %v637_v47 = vpop.f32.mrf.mxu0 }
  0xfd   : > { %v638_v39 = vadd.f32 %v5635_v32, %v637_v47  ;;  %v5891_v35 = vsel %vm831_vm8, %v866_v41, %v877_v38  ;;  %v5039_v41 = vld [vmem:[%s8524_s5 + $0x8] sm:$0xf] }
  0xfe   : > { %987 = vrot.lane.b32.xlu1 %v5887_v3, %s5295_s27 }
  0xff   : > { %v698_v52 = vmax.f32 %v638_v39, 0.0  ;;  %v5244_v39 = vld [vmem:[%s8524_s5 + $0x8] sm:$0x30] }
 0x100   : > { %v5040_v48 = vor.u32 %v5244_v39, %v5039_v41  ;;  %v3539_v41 = vunpack.c.l.bf16 %v3443_v23  ;;  %v3540_v39 = vunpack.c.h.bf16 %v3443_v23 }
 0x101   : > { %v730_v15 = vpack.c.bf16 %v698_v52, %v698_v52 }
 0x102   : > { %v1305_v38 = vsel %vm1303_vm1, %v5040_v48, 0  ;;  %v3603_v48 = vmax.f32 %v3539_v41, %v5277_v13 }
 0x103   : > { %v796_v47 = vunpack.c.l.b16 %v730_v15  ;;  %v5919_v15 = vrot.slane %v875_v62, 1  ;;  %1314 = vmatpush.bf16.msra.mxu1 %v1305_v38  ;;  %5253 = vmatpush.bf16.msrb.mxu3 %v1305_v38  ;;  %v5278_v62 = vld [vmem:[%s5381_s24 + $0x8] sm:$0xff] }
 0x104   : > { %v640_v19 = vpop.f32.mrf.mxu0  ;;  %v3604_v58 = vmax.f32 %v3540_v39, %v5278_v62  ;;  %v5929_v1 = vmax.f32 %v3603_v48, %v3699_v31  ;;  %v8674_v48 = vshrl.u32 %v5822_v40, 16 }
 0x105   : > { %v5912_v52 = vpack.c.b16 %v796_v47, %v795_v11  ;;  %v641_v20 = vadd.f32 %v5635_v32, %v640_v19  ;;  %v1063_v19 = vor.u32 %v5919_v15, %v872_v37 }
 0x106   : > { %8670 = vst [vmem:[#allocation55_spill] sm:$0xff] %v5929_v1  ;;  %v5931_v27 = vmax.f32 %v3604_v58, %v3700_v17  ;;  %v8544_v17 = vshll.u32 %v5822_v40, 16 }
 0x107   : > { %8669 = vst [vmem:[#allocation54_spill] sm:$0xff] %v5912_v52  ;;  %1159 = vrot.lane.b32.xlu1 %v5912_v52, %s5296_s28  ;;  %v880_v11 = vshrl.u32 %v5912_v52, 16  ;;  %v883_v47 = vshll.u32 %v5912_v52, 16  ;;  %5254 = vmatpush.bf16.msra.mxu3 %v1405_v55  ;;  %v699_v44 = vmax.f32 %v641_v20, 0.0 }
 0x108   : > { %8671 = vst [vmem:[#allocation56_spill] sm:$0xff] %v5931_v27 }
 0x109   : > { %v882_v60 = vrot.slane %v880_v11, 7  ;;  %v1064_v56 = vrot.slane %v883_v47, 1  ;;  %v731_v37 = vpack.c.bf16 %v699_v44, %v699_v44 }
 0x10b   : > { %v885_v61 = vor.u32 %v883_v47, %v882_v60  ;;  %v5934_v4 = vsel %vm1046_vm10, %v1063_v19, %v1064_v56  ;;  %v1066_v23 = vor.u32 %v1064_v56, %v880_v11  ;;  %v797_v31 = vunpack.c.l.b16 %v731_v37 }
 0x10c   : > { %v642_v29 = vpop.f32.mrf.mxu0 }
 0x10d   : > { %v643_v38 = vadd.f32 %v5635_v32, %v642_v29  ;;  %v5938_v13 = vsel %vm831_vm8, %v874_v28, %v885_v61  ;;  %v5949_v61 = vrot.slane %v8544_v17, 1  ;;  %v8673_v28 = vshll.u32 %v5808_v46, 16 }
 0x10e   : > { %971 = vrot.lane.b32.xlu0 %v5938_v13, %s5295_s27 }
 0x10f   : > { %v700_v20 = vmax.f32 %v643_v38, 0.0  ;;  %v5953_v44 = vrot.slane %v8673_v28, 1  ;;  %v1084_v62 = vor.u32 %v5949_v61, %v8674_v48 }
 0x110   : > { %v680_v48 = vpop.f32.mrf.mxu3 }
 0x111   : > { %v732_v55 = vpack.c.bf16 %v700_v20, %v700_v20  ;;  %v681_v26 = vadd.f32 %v5635_v32, %v680_v48 }
 0x113   : > { %v798_v47 = vunpack.c.l.b16 %v732_v55  ;;  %v5968_v55 = vsel %vm1046_vm10, %v1084_v62, %v5953_v44  ;;  %v715_v34 = vmax.f32 %v681_v26, 0.0 }
 0x114   : > { %v645_v41 = vpop.f32.mrf.mxu0 }
 0x115   : > { %v5942_v58 = vpack.c.b16 %v798_v47, %v797_v31 }
 0x117   : > { %8672 = vst [vmem:[#allocation57_spill] sm:$0xff] %v5942_v58  ;;  %v888_v56 = vshrl.u32 %v5942_v58, 16  ;;  %v891_v29 = vshll.u32 %v5942_v58, 16 }
 0x118   : > { %v682_v48 = vpop.f32.mrf.mxu3 }
 0x119   : > { %v5955_v11 = vrot.slane %v888_v56, 7  ;;  %v1067_v39 = vrot.slane %v891_v29, 1  ;;  %v683_v26 = vadd.f32 %v5635_v32, %v682_v48 }
 0x11b   : > { %v893_v19 = vor.u32 %v891_v29, %v5955_v11  ;;  %v5962_v38 = vsel %vm1046_vm10, %v1066_v23, %v1067_v39  ;;  %v5964_v37 = vor.u32 %v1067_v39, %v888_v56  ;;  %v646_v29 = vadd.f32 %v5635_v32, %v645_v41 }
 0x11c   : > { %v647_v20 = vpop.f32.mrf.mxu0  ;;  %v716_v27 = vmax.f32 %v683_v26, 0.0 }
 0x11d   : > { %v648_v31 = vadd.f32 %v5635_v32, %v647_v20  ;;  %v5972_v47 = vsel %vm831_vm8, %v882_v60, %v893_v19  ;;  %v701_v56 = vmax.f32 %v646_v29, 0.0  ;;  %v5987_v29 = vsel %vm5456_vm15, 0, %v5766_v8 }
 0x11e   : > { %8675 = vst [vmem:[#allocation58_spill] sm:$0xff] %v5972_v47  ;;  %973 = vrot.lane.b32.xlu1 %v5972_v47, %s5295_s27 }
 0x11f   : > { %v960_v28 = vpop.permute.xlu0 %959  ;;  %v702_v23 = vmax.f32 %v648_v31, 0.0  ;;  %v733_v60 = vpack.c.bf16 %v701_v56, %v701_v56 }
 0x120   : > { %v1009_v39 = vsel %vm5908_vm3, 0, %v960_v28 }
 0x121   : > { %v734_v62 = vpack.c.bf16 %v702_v23, %v702_v23  ;;  %v1028_v19 = vsel %vm5444_vm14, 0, %v1009_v39  ;;  %v799_v56 = vunpack.c.l.b16 %v733_v60  ;;  %v747_v39 = vpack.c.bf16 %v715_v34, %v715_v34 }
 0x123   : > { %v800_v28 = vunpack.c.l.b16 %v734_v62  ;;  %v813_v9 = vunpack.c.l.b16 %v747_v39 }
 0x124   : > { %v650_v17 = vpop.f32.mrf.mxu0 }
 0x125   : > { %v651_v20 = vadd.f32 %v5635_v32, %v650_v17 }
 0x127   : > { %v1148_v41 = vpop.permute.xlu0 %1147  ;;  %v703_v17 = vmax.f32 %v651_v20, 0.0 }
 0x128   : > { %v1181_v31 = vsel %vm543_vm7, %v1028_v19, %v1148_v41  ;;  %v5994_v41 = vpack.c.b16 %v800_v28, %v799_v56 }
 0x129   : > { %v1229_v23 = vsel %vm1227_vm4, %v1181_v31, %v5987_v29  ;;  %v735_v62 = vpack.c.bf16 %v703_v17, %v703_v17  ;;  %v748_v31 = vpack.c.bf16 %v716_v27, %v716_v27 }
 0x12a   : > { %5041 = vmatmul.msk.bf16.vlgmr.msra.gmra.mxu1 %vm1270_vm5, %v1229_v23  ;;  %5061 = vmatmul.msk.bf16.gmra.mxu2 %vm1270_vm5, %v1229_v23  ;;  %8676 = vst [vmem:[#allocation59_spill] sm:$0xff] %v5994_v41  ;;  %v8551_v23 = vshll.u32 %v5994_v41, 16 }
 0x12b   : > { %v814_v3 = vunpack.c.l.b16 %v748_v31  ;;  %v801_v60 = vunpack.c.l.b16 %v735_v62 }
 0x12c   : > { %v652_v19 = vpop.f32.mrf.mxu0  ;;  %v6006_v28 = vrot.slane %v8551_v23, 1 }
 0x12d   : > { %v653_v8 = vadd.f32 %v5635_v32, %v652_v19  ;;  %v5998_v34 = vpack.c.b16 %v814_v3, %v813_v9  ;;  %v6016_v3 = vsel %vm5456_vm15, 0, %v5787_v51 }
 0x12f   : > { %v704_v1 = vmax.f32 %v653_v8, 0.0  ;;  %8677 = vst [vmem:[#allocation60_spill] sm:$0xff] %v5998_v34  ;;  %1177 = vrot.lane.b32.xlu0 %v5998_v34, %s5296_s28  ;;  %v964_v8 = vpop.permute.xlu2 %963 }
 0x130   : > { %v962_v25 = vpop.permute.xlu1 %961  ;;  %v1030_v30 = vsel %vm5444_vm14, 0, %v964_v8 }
 0x131   : > { %v736_v50 = vpack.c.bf16 %v704_v1, %v704_v1  ;;  %v8552_v1 = vshrl.u32 %v5994_v41, 16  ;;  %v1029_v9 = vsel %vm5444_vm14, 0, %v962_v25 }
 0x133   : > { %v802_v20 = vunpack.c.l.b16 %v736_v50  ;;  %v1072_v26 = vor.u32 %v6006_v28, %v8552_v1 }
 0x134   : > { %v655_v48 = vpop.f32.mrf.mxu0 }
 0x135   : > { %v6000_v42 = vpack.c.b16 %v802_v20, %v801_v60  ;;  %v656_v27 = vadd.f32 %v5635_v32, %v655_v48 }
 0x137   : > { %8678 = vst [vmem:[#allocation61_spill] sm:$0xff] %v6000_v42  ;;  %v8553_v56 = vshll.u32 %v6000_v42, 16  ;;  %v904_v39 = vshrl.u32 %v6000_v42, 16  ;;  %v705_v62 = vmax.f32 %v656_v27, 0.0  ;;  %v1152_v1 = vpop.permute.xlu2 %1151 }
 0x138   : > { %v1150_v50 = vpop.permute.xlu1 %1149 }
 0x139   : > { %v1184_v17 = vsel %vm543_vm7, %v1029_v9, %v1150_v50  ;;  %v1073_v19 = vrot.slane %v8553_v56, 1  ;;  %v737_v48 = vpack.c.bf16 %v705_v62, %v705_v62  ;;  %v6047_v62 = vsel %vm5456_vm15, 0, %v5813_v22 }
 0x13a   : > { %v6027_v25 = vsel %vm1227_vm4, %v1184_v17, %v6016_v3 }
 0x13b   : > { %8679 = vst [vmem:[#allocation62_spill] sm:$0xff] %v6027_v25  ;;  %5042 = vmatmul.msk.bf16.gmra.mxu1 %vm1270_vm5, %v6027_v25  ;;  %5062 = vmatmul.msk.bf16.gmra.mxu2 %vm1270_vm5, %v6027_v25  ;;  %v6034_v51 = vsel %vm1046_vm10, %v1072_v26, %v1073_v19  ;;  %v1075_v31 = vor.u32 %v1073_v19, %v904_v39  ;;  %v803_v23 = vunpack.c.l.b16 %v737_v48 }
 0x13c   : > { %v657_v60 = vpop.f32.mrf.mxu0  ;;  %v1187_v25 = vsel %vm543_vm7, %v1030_v30, %v1152_v1 }
 0x13d   : > { %v658_v20 = vadd.f32 %v5635_v32, %v657_v60 }
 0x13f   : > { %v706_v9 = vmax.f32 %v658_v20, 0.0  ;;  %v6054_v20 = vsel %vm1227_vm4, %v1187_v25, %v6047_v62  ;;  %v8560_v25 = vshll.u32 %v5998_v34, 16 }
 0x140   : > { %8681 = vst [vmem:[#allocation64_spill] sm:$0xff] %v6054_v20 }
 0x141   : > { %v738_v50 = vpack.c.bf16 %v706_v9, %v706_v9 }
 0x143   : > { %v804_v17 = vunpack.c.l.b16 %v738_v50 }
 0x144   : > { %v660_v27 = vpop.f32.mrf.mxu0 }
 0x145   : > { %v6037_v56 = vpack.c.b16 %v804_v17, %v803_v23  ;;  %v661_v26 = vadd.f32 %v5635_v32, %v660_v27 }
 0x147   : > { %8680 = vst [vmem:[#allocation63_spill] sm:$0xff] %v6037_v56  ;;  %v8557_v19 = vshll.u32 %v6037_v56, 16  ;;  %v912_v60 = vshrl.u32 %v6037_v56, 16  ;;  %v707_v8 = vmax.f32 %v661_v26, 0.0 }
 0x149   : > { %v1076_v23 = vrot.slane %v8557_v19, 1  ;;  %v739_v9 = vpack.c.bf16 %v707_v8, %v707_v8 }
 0x14b   : > { %5043 = vmatmul.msk.bf16.gmra.mxu1 %vm1270_vm5, %v6054_v20  ;;  %5063 = vmatmul.msk.bf16.gmra.mxu2 %vm1270_vm5, %v6054_v20  ;;  %v6061_v30 = vsel %vm1046_vm10, %v1075_v31, %v1076_v23  ;;  %v1078_v22 = vor.u32 %v1076_v23, %v912_v60  ;;  %v805_v26 = vunpack.c.l.b16 %v739_v9  ;;  %v1154_v20 = vpop.permute.xlu1 %1153  ;;  %v906_v31 = vrot.slane %v904_v39, 7 }
 0x14c   : > { %v662_v1 = vpop.f32.mrf.mxu0  ;;  %v952_v23 = vshrl.u32 %v5998_v34, 16  ;;  %v1134_v39 = vsel %vm5456_vm15, 0, %v5848_v59 }
 0x14d   : > { %v663_v48 = vadd.f32 %v5635_v32, %v662_v1  ;;  %v6072_v32 = vrot.slane %v8560_v25, 1  ;;  %v4101_v25 = vld [vmem:[%s8522_s3] sm:$0x3] }
 0x14f   : > { %v708_v50 = vmax.f32 %v663_v48, 0.0 }
 0x150   : > { %v966_v27 = vpop.permute.xlu0 %965 }
 0x151   : > { %v740_v17 = vpack.c.bf16 %v708_v50, %v708_v50  ;;  %v1031_v47 = vsel %vm5444_vm14, 0, %v966_v27  ;;  %v8684_v50 = vshll.u32 %v5822_v40, 16  ;;  %v5142_v40 = vld [vmem:[%s8526_s7 + $0x10] sm:$0xf] }
 0x152   : > { %v1190_v8 = vsel %vm543_vm7, %v1031_v47, %v1154_v20  ;;  %v8686_v47 = vshll.u32 %v6000_v42, 16 }
 0x153   : > { %v806_v19 = vunpack.c.l.b16 %v740_v17  ;;  %v933_v17 = vor.u32 %v8684_v50, %v5834_v16  ;;  %v914_v16 = vrot.slane %v912_v60, 7 }
 0x154   : > { %v909_v20 = vor.u32 %v8686_v47, %v906_v31  ;;  %v8687_v47 = vshrl.u32 %v5994_v41, 16 }
 0x155   : > { %v6067_v43 = vpack.c.b16 %v806_v19, %v805_v26  ;;  %v6080_v19 = vor.u32 %v6072_v32, %v952_v23  ;;  %v6089_v26 = vsel %vm1227_vm4, %v1190_v8, %v1134_v39 }
 0x156   : > { %8685 = vst [vmem:[#allocation67_spill] sm:$0xff] %v6089_v26 }
 0x157   : > { %8682 = vst [vmem:[#allocation65_spill] sm:$0xff] %v6067_v43  ;;  %1169 = vrot.lane.b32.xlu1 %v6067_v43, %s5296_s28  ;;  %v920_v1 = vshrl.u32 %v6067_v43, 16  ;;  %v923_v48 = vshll.u32 %v6067_v43, 16 }
 0x158   : > { %8683 = vst [vmem:[#allocation66_spill] sm:$0xff] %v6080_v19  ;;  %v898_v19 = vrot.slane %v8687_v47, 7 }
 0x159   : > { %v922_v9 = vrot.slane %v920_v1, 7  ;;  %v1079_v27 = vrot.slane %v923_v48, 1 }
 0x15b   : > { %5044 = vmatmul.msk.bf16.gmra.mxu1 %vm1270_vm5, %v6089_v26  ;;  %5064 = vmatmul.msk.bf16.gmra.mxu2 %vm1270_vm5, %v6089_v26  ;;  %v6101_v59 = vsel %vm831_vm8, %v922_v9, %v933_v17  ;;  %v925_v50 = vor.u32 %v923_v48, %v922_v9  ;;  %v6104_v8 = vsel %vm1046_vm10, %v1078_v22, %v1079_v27  ;;  %v5248_v17 = vld [vmem:[%s8526_s7 + $0x10] sm:$0x30]  ;;  %v4155_v48 = vsel %vm592_vm0, %v4101_v25, 0  ;;  %v5247_v25 = vld [vmem:[%s8526_s7 + $0x8] sm:$0x30] }
 0x15c   : > { %983 = vrot.lane.b32.xlu2 %v6101_v59, %s5295_s27  ;;  %v1081_v26 = vor.u32 %v1079_v27, %v920_v1  ;;  %v5143_v22 = vor.u32 %v5248_v17, %v5142_v40  ;;  %v6123_v9 = vsel %vm831_vm8, %v898_v19, %v909_v20  ;;  %v5101_v40 = vld [vmem:[%s8526_s7 + $0x8] sm:$0xf]  ;;  %vm1110_vm0 = vcmask 1047552  }
 0x15d   : > { %v6117_v60 = vsel %vm831_vm8, %v914_v16, %v925_v50  ;;  %v5102_v27 = vor.u32 %v5247_v25, %v5101_v40  ;;  %v954_v40 = vrot.slane %v952_v23, 7  ;;  %vm6334_vm6 = vmand %vm1110_vm0, %vm1046_vm10 }
 0x15e   : > { %981 = vrot.lane.b32.xlu0 %v6117_v60, %s5295_s27  ;;  %v6127_v47 = vsel %vm1046_vm10, %v1081_v26, %v5949_v61  ;;  %v2161_v1 = vsel %vm1303_vm1, %v5143_v22, 0  ;;  %v5121_v61 = vld [vmem:[%s8526_s7] sm:$0xf]  ;;  %v5246_v26 = vld [vmem:[%s8526_s7] sm:$0x30]  ;;  %v8688_v22 = vshll.u32 %v6037_v56, 16 }
 0x15f   : > { %977 = vrot.lane.b32.xlu1 %v6123_v9, %s5295_s27  ;;  %2170 = vmatpush.bf16.msrb.mxu2 %v2161_v1  ;;  %v5122_v20 = vor.u32 %v5246_v26, %v5121_v61  ;;  %v1964_v50 = vsel %vm1303_vm1, %v5102_v27, 0 }
 0x160   : > { %1973 = vmatpush.bf16.msrb.mxu0 %v1964_v50 }
 0x161   : > { %v2061_v17 = vsel %vm1303_vm1, %v5122_v20, 0 }
 0x162   : > { %2070 = vmatpush.bf16.msrb.mxu1 %v2061_v17 }
 0x163   : > { %4164 = vmatpush.bf16.msra.mxu2 %v4155_v48  ;;  %v917_v48 = vor.u32 %v8688_v22, %v914_v16 }
 0x164   : > { %1155 = vrot.lane.b32.xlu2 %v5828_v54, %s5296_s28 }
 0x165   : > { %v6157_v1 = vsel %vm831_vm8, %v906_v31, %v917_v48  ;;  %v8689_v31 = vshll.u32 %v5998_v34, 16 }
 0x166   : > { %1163 = vrot.lane.b32.xlu0 %v5994_v41, %s5296_s28 }
 0x167   : > { %1167 = vrot.lane.b32.xlu1 %v6037_v56, %s5296_s28  ;;  %v957_v16 = vor.u32 %v8689_v31, %v954_v40 }
 0x169   : > { %v6173_v25 = vsel %vm831_vm8, %v5863_v57, %v957_v16 }
 0x16c   : > { %969 = vrot.lane.b32.xlu2 %v5891_v35, %s5295_s27 }
 0x16e   : > { %979 = vrot.lane.b32.xlu0 %v6157_v1, %s5295_s27 }
 0x16f   : > { %1763 = vrot.lane.b32.xlu1 %v5748_v63, %s5295_s27 }
 0x174   : > { %1175 = vrot.lane.b32.xlu2 %v5841_v53, %s5296_s28 }
 0x176   : > { %1698 = vrot.lane.b32.xlu0 %v5771_v49, %s5297_s20  ;;  %v8690_v49 = vshll.u32 %v5994_v41, 16 }
 0x177   : > { %1809 = vrot.lane.b32.xlu1 %v5987_v29, %s5296_s28 }
 0x178   : > { %v901_v57 = vor.u32 %v8690_v49, %v898_v19 }
 0x17a   : > { %v6190_v29 = vsel %vm831_vm8, %v5955_v11, %v901_v57  ;;  %v6220_v11 = vsel %vm5456_vm15, 0, %v5962_v38 }
 0x17c   : > { %989 = vrot.lane.b32.xlu2 %v6173_v25, %s5295_s27 }
 0x17e   : > { %1811 = vrot.lane.b32.xlu0 %v6016_v3, %s5296_s28  ;;  %v1062_v3 = vsel %vm1046_vm10, %v5850_v2, %v5919_v15  ;;  %v6209_v2 = vsel %vm5456_vm15, 0, %v5934_v4  ;;  %v1416_v15 = vpop.f32.mrf.mxu2  ;;  %v1071_v4 = vsel %vm1046_vm10, %v5964_v37, %v6006_v28  ;;  %v6248_v37 = vsel %vm5456_vm15, 0, %v6034_v51  ;;  %v1172_v51 = vpop.permute.xlu0 %1171 }
 0x17f   : > { %1813 = vrot.lane.b32.xlu1 %v6047_v62, %s5296_s28  ;;  %v1135_v62 = vsel %vm5456_vm15, 0, %v1062_v3  ;;  %v6235_v23 = vsel %vm5456_vm15, 0, %v1071_v4  ;;  %v8691_v3 = vshrl.u32 %v5808_v46, 16 }
 0x184   : > { %1161 = vrot.lane.b32.xlu2 %v5942_v58, %s5296_s28 }
 0x186   : > { %1765 = vrot.lane.b32.xlu0 %v5775_v7, %s5295_s27 }
 0x187   : > { %1815 = vrot.lane.b32.xlu1 %v1134_v39, %s5296_s28  ;;  %v968_v39 = vpop.permute.xlu1 %967 }
 0x188   : > { %v1032_v31 = vsel %vm5444_vm14, 0, %v968_v39 }
 0x18c   : > { %975 = vrot.lane.b32.xlu2 %v6190_v29, %s5295_s27 }
 0x18e   : > { %1767 = vrot.lane.b32.xlu0 %v5799_v18, %s5295_s27 }
 0x18f   : > { %1817 = vrot.lane.b32.xlu1 %v1135_v62, %s5296_s28  ;;  %v1174_v27 = vpop.permute.xlu1 %1173 }
 0x194   : > { %1165 = vrot.lane.b32.xlu2 %v6000_v42, %s5296_s28 }
 0x196   : > { %1769 = vrot.lane.b32.xlu0 %v5828_v54, %s5295_s27  ;;  %v5203_v54 = vld [vmem:[%s8528_s9 + $0x20] sm:$0xf] }
 0x197   : > { %1819 = vrot.lane.b32.xlu1 %v6209_v2, %s5296_s28  ;;  %v988_v40 = vpop.permute.xlu1 %987 }
 0x19c   : > { %1696 = vrot.lane.b32.xlu2 %v5712_v12, %s5297_s20  ;;  %v6229_v12 = vpop.f32.mrf.mxu2 }
 0x19e   : > { %1771 = vrot.lane.b32.xlu0 %v5872_v33, %s5295_s27 }
 0x19f   : > { %1821 = vrot.lane.b32.xlu1 %v6220_v11, %s5296_s28 }
 0x1a4   : > { %1761 = vrot.lane.b32.xlu2 %v5683_v21, %s5295_s27 }
 0x1a6   : > { %1773 = vrot.lane.b32.xlu0 %v5912_v52, %s5295_s27 }
 0x1a7   : > { %1823 = vrot.lane.b32.xlu1 %v6235_v23, %s5296_s28  ;;  %v1316_v38 = vpop.f32.mrf.mxu1 }
 0x1a8   : > { %v6239_v19 = vadd.f32 %v1416_v15, %v1316_v38  ;;  %v8692_v15 = vshll.u32 %v5841_v53, 16  ;;  %v986_v38 = vpop.permute.xlu0 %985 }
 0x1a9   : > { %v1041_v39 = vsel %vm5444_vm14, 0, %v986_v38 }
 0x1aa   : > { %v1088_v4 = vrot.slane %v8692_v15, 1 }
 0x1ac   : > { %1700 = vrot.lane.b32.xlu2 %v5793_v5, %s5297_s20  ;;  %v6261_v5 = vsel %vm5456_vm15, 0, %v6061_v30 }
 0x1ad   : > { %v1421_v61 = vpop.f32.mrf.mxu2 }
 0x1ae   : > { %1775 = vrot.lane.b32.xlu0 %v5942_v58, %s5295_s27 }
 0x1af   : > { %1825 = vrot.lane.b32.xlu1 %v6248_v37, %s5296_s28  ;;  %v6252_v28 = vpop.f32.mrf.mxu1 }
 0x1b4   : > { %1702 = vrot.lane.b32.xlu2 %v5817_v36, %s5297_s20  ;;  %v1143_v36 = vsel %vm5456_vm15, 0, %v5968_v55  ;;  %v6289_v55 = vsel %vm5456_vm15, 0, %v6104_v8  ;;  %v1087_v8 = vor.u32 %v5953_v44, %v8691_v3  ;;  %v6319_v44 = vsel %vm5456_vm15, 0, %v6127_v47  ;;  %v1158_v3 = vpop.permute.xlu0 %1157 }
 0x1b5   : > { %v6276_v30 = vpop.f32.mrf.mxu2  ;;  %v8694_v47 = vmov 0 }
 0x1b6   : > { %v984_v26 = vpop.permute.xlu2 %983  ;;  %1777 = vrot.lane.b32.xlu0 %v5994_v41, %s5295_s27  ;;  %v8695_v47 = vsel %vm6334_vm6, 4294967295, %v8694_v47 }
 0x1b7   : > { %v1040_v20 = vsel %vm5444_vm14, 0, %v984_v26  ;;  %1827 = vrot.lane.b32.xlu1 %v6261_v5, %s5296_s28  ;;  %v1220_v26 = vsel %vm543_vm7, %v1041_v39, %v1174_v27  ;;  %v8693_v27 = vshrl.u32 %v5659_v24, 16  ;;  %8696 = vst [vmem:[#allocation68_spill] sm:$0xff] %v8695_v47 }
 0x1b8   : > { %v1217_v50 = vsel %vm543_vm7, %v1040_v20, %v1172_v51  ;;  %v1321_v17 = vpop.f32.mrf.mxu1  ;;  %v1160_v20 = vpop.permute.xlu1 %1159 }
 0x1b9   : > { %v6271_v22 = vadd.f32 %v1421_v61, %v1321_v17  ;;  %v6274_v48 = vsel %vm1227_vm4, %v1217_v50, %v1143_v36  ;;  %v3505_v17 = vor.u32 %v5703_v14, %v8693_v27 }
 0x1ba   : > { %5053 = vmatmul.msk.bf16.vlgmr.msrb.gmra.mxu3 %vm1270_vm5, %v6274_v48 }
 0x1bb   : > { %v3522_v24 = vsel %vm6334_vm6, %v3505_v17, 4286578559 }
 0x1bc   : > { %1704 = vrot.lane.b32.xlu2 %v5854_v10, %s5297_s20  ;;  %v3538_v14 = vsel %vm5456_vm15, 4286578559, %v3522_v24  ;;  %v8701_v24 = vld [vmem:[#allocation58_spill] sm:$0xff] }
 0x1bd   : > { %v3730_v15 = vunpack.c.h.bf16 %v3538_v14 }
 0x1be   : > { %v1156_v16 = vpop.permute.xlu2 %1155  ;;  %1779 = vrot.lane.b32.xlu0 %v6000_v42, %s5295_s27  ;;  %v1426_v61 = vpop.f32.mrf.mxu2 }
 0x1bf   : > { %v1193_v49 = vsel %vm543_vm7, %v1032_v31, %v1156_v16  ;;  %1829 = vrot.lane.b32.xlu1 %v6289_v55, %s5296_s28 }
 0x1c0   : > { %v6294_v57 = vpop.f32.mrf.mxu1  ;;  %v6297_v10 = vsel %vm1227_vm4, %v1193_v49, %v1135_v62  ;;  %v1089_v62 = vsel %vm1046_vm10, %v1087_v8, %v1088_v4  ;;  %v3729_v8 = vunpack.c.l.bf16 %v3538_v14 }
 0x1c1   : > { %5045 = vmatmul.msk.bf16.gmra.mxu1 %vm1270_vm5, %v6297_v10  ;;  %5065 = vmatmul.msk.bf16.gmra.mxu2 %vm1270_vm5, %v6297_v10 }
 0x1c4   : > { %1706 = vrot.lane.b32.xlu2 %v5891_v35, %s5297_s20  ;;  %v1144_v35 = vsel %vm5456_vm15, 0, %v1089_v62  ;;  %v6354_v62 = vmax.f32 %v5731_v45, %v3729_v8  ;;  %v8700_v45 = vshrl.u32 %v5841_v53, 16  ;;  %v8702_v8 = vld [vmem:[#allocation47_spill] sm:$0xff] }
 0x1c5   : > { %v6331_v16 = vsel %vm1227_vm4, %v1220_v26, %v1144_v35  ;;  %v8698_v26 = vld [vmem:[#allocation38_spill] sm:$0xff] }
 0x1c6   : > { %v970_v51 = vpop.permute.xlu2 %969  ;;  %1781 = vrot.lane.b32.xlu0 %v6037_v56, %s5295_s27  ;;  %v6349_v39 = vpop.f32.mrf.mxu2  ;;  %8697 = vst [vmem:[#allocation69_spill] sm:$0xff] %v6354_v62  ;;  %v1090_v17 = vor.u32 %v1088_v4, %v8700_v45 }
 0x1c7   : > { %1831 = vrot.lane.b32.xlu1 %v6319_v44, %s5296_s28  ;;  %v1033_v49 = vsel %vm5444_vm14, 0, %v970_v51  ;;  %v6357_v51 = vmax.f32 %v8698_v26, %v3730_v15 }
 0x1c8   : > { %v1326_v50 = vpop.f32.mrf.mxu1  ;;  %v1196_v38 = vsel %vm543_vm7, %v1033_v49, %v1158_v3  ;;  %v972_v49 = vpop.permute.xlu0 %971 }
 0x1c9   : > { %v6328_v31 = vadd.f32 %v1426_v61, %v1326_v50  ;;  %8699 = vst [vmem:[#allocation38_spill] sm:$0xff] %v6357_v51  ;;  %v974_v50 = vpop.permute.xlu1 %973  ;;  %v6364_v27 = vsel %vm1227_vm4, %v1196_v38, %v6209_v2  ;;  %v1092_v2 = vsel %vm1046_vm10, %v1090_v17, %v6072_v32  ;;  %v1034_v32 = vsel %vm5444_vm14, 0, %v972_v49 }
 0x1ca   : > { %5054 = vmatmul.msk.bf16.gmra.mxu3 %vm1270_vm5, %v6331_v16  ;;  %v1145_v26 = vsel %vm5456_vm15, 0, %v1092_v2 }
 0x1cc   : > { %1708 = vrot.lane.b32.xlu2 %v5938_v13, %s5297_s20 }
 0x1ce   : > { %v1176_v61 = vpop.permute.xlu2 %1175  ;;  %1783 = vrot.lane.b32.xlu0 %v6067_v43, %s5295_s27  ;;  %v1431_v4 = vpop.f32.mrf.mxu2 }
 0x1cf   : > { %1833 = vrot.lane.b32.xlu1 %v1143_v36, %s5296_s28  ;;  %v1042_v36 = vsel %vm5444_vm14, 0, %v988_v40 }
 0x1d0   : > { %v6360_v13 = vpop.f32.mrf.mxu1  ;;  %v1223_v14 = vsel %vm543_vm7, %v1042_v36, %v1176_v61  ;;  %v1178_v61 = vpop.permute.xlu0 %1177 }
 0x1d1   : > { %5046 = vmatmul.msk.bf16.gmra.mxu1 %vm1270_vm5, %v6364_v27  ;;  %5066 = vmatmul.msk.bf16.gmra.mxu2 %vm1270_vm5, %v6364_v27  ;;  %v1170_v15 = vpop.permute.xlu1 %1169  ;;  %v6387_v40 = vsel %vm1227_vm4, %v1223_v14, %v1145_v26 }
 0x1d4   : > { %1710 = vrot.lane.b32.xlu2 %v8701_v24, %s5297_s20 }
 0x1d6   : > { %v990_v3 = vpop.permute.xlu2 %989  ;;  %1785 = vrot.lane.b32.xlu0 %v8702_v8, %s5295_s27 }
 0x1d7   : > { %1835 = vrot.lane.b32.xlu1 %v1144_v35, %s5296_s28  ;;  %v1199_v35 = vsel %vm543_vm7, %v1034_v32, %v1160_v20  ;;  %v8703_v20 = vld [vmem:[#allocation66_spill] sm:$0xff] }
 0x1d8   : > { %v1331_v38 = vpop.f32.mrf.mxu1  ;;  %v6401_v24 = vsel %vm1227_vm4, %v1199_v35, %v6220_v11  ;;  %v1112_v36 = vsel %vm6334_vm6, %v8703_v20, 0  ;;  %v982_v2 = vpop.permute.xlu0 %981 }
 0x1d9   : > { %v6384_v45 = vadd.f32 %v1431_v4, %v1331_v38  ;;  %v978_v49 = vpop.permute.xlu1 %977  ;;  %v1146_v4 = vsel %vm5456_vm15, 0, %v1112_v36 }
 0x1da   : > { %5055 = vmatmul.msk.bf16.gmra.mxu3 %vm1270_vm5, %v6387_v40 }
 0x1dc   : > { %1712 = vrot.lane.b32.xlu2 %v6190_v29, %s5297_s20  ;;  %v1043_v29 = vsel %vm5444_vm14, 0, %v990_v3 }
 0x1dd   : > { %v1226_v11 = vsel %vm543_vm7, %v1043_v29, %v1178_v61 }
 0x1de   : > { %v1162_v17 = vpop.permute.xlu2 %1161  ;;  %1787 = vrot.lane.b32.xlu0 %v5808_v46, %s5295_s27  ;;  %v6421_v3 = vsel %vm1227_vm4, %v1226_v11, %v1146_v4 }
 0x1df   : > { %1837 = vrot.lane.b32.xlu1 %v1145_v26, %s5296_s28 }
 0x1e0   : > { %v1164_v61 = vpop.permute.xlu0 %1163 }
 0x1e1   : > { %5047 = vmatmul.msk.bf16.gmra.mxu1 %vm1270_vm5, %v6401_v24  ;;  %5067 = vmatmul.msk.bf16.gmra.mxu2 %vm1270_vm5, %v6401_v24  ;;  %v1168_v38 = vpop.permute.xlu1 %1167 }
 0x1e4   : > { %1714 = vrot.lane.b32.xlu2 %v6123_v9, %s5297_s20  ;;  %v1035_v9 = vsel %vm5444_vm14, 0, %v974_v50 }
 0x1e5   : > { %v1202_v26 = vsel %vm543_vm7, %v1035_v9, %v1162_v17 }
 0x1e6   : > { %v976_v14 = vpop.permute.xlu2 %975  ;;  %1789 = vrot.lane.b32.xlu0 %v5841_v53, %s5295_s27  ;;  %v6434_v35 = vsel %vm1227_vm4, %v1202_v26, %v6235_v23 }
 0x1e7   : > { %1839 = vrot.lane.b32.xlu1 %v1146_v4, %s5296_s28  ;;  %v1036_v36 = vsel %vm5444_vm14, 0, %v976_v14  ;;  %s8308_s28 = scalar_lea.vmem %s8530_s11, %s5242_s19 }
 0x1e8   : > { %v980_v20 = vpop.permute.xlu0 %979 }
 0x1e9   : > { %v1764_v50 = vpop.permute.xlu1 %1763 }
 0x1ea   : > { %5056 = vmatmul.msk.bf16.gmra.mxu3 %vm1270_vm5, %v6421_v3 }
 0x1ec   : > { %1716 = vrot.lane.b32.xlu2 %v6157_v1, %s5297_s20  ;;  %v1039_v1 = vsel %vm5444_vm14, 0, %v982_v2 }
 0x1ed   : > { %v1214_v17 = vsel %vm543_vm7, %v1039_v1, %v1170_v15  ;;  %v5080_v1 = vld [vmem:[%s8524_s5 + $0x10] sm:$0xf] }
 0x1ee   : > { %v1166_v32 = vpop.permute.xlu2 %1165  ;;  %1791 = vrot.lane.b32.xlu0 %v5998_v34, %s5295_s27  ;;  %v6447_v23 = vsel %vm1227_vm4, %v1214_v17, %v6319_v44  ;;  %s5298_s27 = smov 8  }
 0x1f1   : > { %5048 = vmatmul.msk.bf16.gmra.mxu1 %vm1270_vm5, %v6434_v35  ;;  %5068 = vmatmul.msk.bf16.gmra.mxu2 %vm1270_vm5, %v6434_v35  ;;  %v1810_v4 = vpop.permute.xlu1 %1809 }
 0x1f4   : > { %1718 = vrot.lane.b32.xlu2 %v6117_v60, %s5297_s20  ;;  %v1205_v60 = vsel %vm543_vm7, %v1036_v36, %v1164_v61  ;;  %v8705_v61 = vld [vmem:[#allocation50_spill] sm:$0xff]  ;;  %v1037_v36 = vsel %vm5444_vm14, 0, %v978_v49 }
 0x1f5   : > { %v6466_v26 = vsel %vm1227_vm4, %v1205_v60, %v6248_v37  ;;  %v5245_v37 = vld [vmem:[%s8524_s5 + $0x10] sm:$0x30] }
 0x1f6   : > { %v1697_v29 = vpop.permute.xlu2 %1696  ;;  %v5081_v17 = vor.u32 %v5245_v37, %v5080_v1 }
 0x1f7   : > { %v1744_v2 = vsel %vm5908_vm3, 0, %v1697_v29 }
 0x1f8   : > { %v1745_v15 = vsel %vm5444_vm14, 0, %v1744_v2  ;;  %v1505_v29 = vsel %vm1303_vm1, %v5081_v17, 0  ;;  %v8706_v2 = vld [vmem:[#allocation52_spill] sm:$0xff] }
 0x1f9   : > { %1514 = vmatpush.bf16.msrb.mxu3 %v1505_v29  ;;  %v1814_v37 = vpop.permute.xlu1 %1813 }
 0x1fa   : > { %5072 = vmatmul.msk.bf16.vlgmr.msra.gmra.mxu3 %vm1270_vm5, %v6447_v23 }
 0x1fc   : > { %1720 = vrot.lane.b32.xlu2 %v6101_v59, %s5297_s20  ;;  %v1699_v59 = vpop.permute.xlu0 %1698 }
 0x1fd   : > { %v1746_v60 = vsel %vm5444_vm14, 0, %v1699_v59 }
 0x1fe   : > { %v1762_v44 = vpop.permute.xlu2 %1761 }
 0x1ff   : > { %v1843_v9 = vsel %vm543_vm7, %v1745_v15, %v1762_v44  ;;  %v1208_v15 = vsel %vm543_vm7, %v1037_v36, %v1166_v32 }
 0x200   : > { %v6462_v14 = vsel %vm1227_vm4, %v1843_v9, %v1810_v4  ;;  %v1846_v4 = vsel %vm543_vm7, %v1746_v60, %v1764_v50  ;;  %v6495_v9 = vsel %vm1227_vm4, %v1208_v15, %v6261_v5  ;;  %v1038_v5 = vsel %vm5444_vm14, 0, %v980_v20 }
 0x201   : > { %5049 = vmatmul.msk.bf16.gmra.mxu1 %vm1270_vm5, %v6466_v26  ;;  %5069 = vmatmul.msk.bf16.gmra.mxu2 %vm1270_vm5, %v6466_v26  ;;  %v1211_v50 = vsel %vm543_vm7, %v1038_v5, %v1168_v38  ;;  %v6529_v38 = vpop.f32.mrf.mxu2 }
 0x202   : > { %5103 = vmatmul.msk.bf16.vlgmr.msrb.gmra.mxu0 %vm1270_vm5, %v6462_v14  ;;  %v6518_v17 = vsel %vm1227_vm4, %v1211_v50, %v6289_v55 }
 0x204   : > { %1722 = vrot.lane.b32.xlu2 %v8705_v61, %s5297_s20  ;;  %v1812_v44 = vpop.permute.xlu0 %1811 }
 0x205   : > { %v6498_v61 = vsel %vm1227_vm4, %v1846_v4, %v1812_v44  ;;  %v6547_v44 = vpop.f32.mrf.mxu1 }
 0x206   : > { %v1701_v49 = vpop.permute.xlu2 %1700 }
 0x207   : > { %v1747_v32 = vsel %vm5444_vm14, 0, %v1701_v49  ;;  %v8707_v49 = vld [vmem:[#allocation62_spill] sm:$0xff] }
 0x209   : > { %v6543_v15 = vpop.f32.mrf.mxu2 }
 0x20a   : > { %5073 = vmatmul.msk.bf16.gmra.mxu3 %vm1270_vm5, %v6274_v48 }
 0x20c   : > { %1724 = vrot.lane.b32.xlu2 %v8706_v2, %s5297_s20  ;;  %v1766_v59 = vpop.permute.xlu0 %1765  ;;  %v1816_v2 = vpop.permute.xlu1 %1815 }
 0x20d   : > { %v1849_v1 = vsel %vm543_vm7, %v1747_v32, %v1766_v59 }
 0x20e   : > { %v1703_v20 = vpop.permute.xlu2 %1702 }
 0x20f   : > { %v1748_v55 = vsel %vm5444_vm14, 0, %v1703_v20 }
 0x211   : > { %5050 = vmatmul.msk.bf16.gmra.mxu1 %vm1270_vm5, %v6495_v9  ;;  %5070 = vmatmul.msk.bf16.gmra.mxu2 %vm1270_vm5, %v6495_v9  ;;  %v1438_v32 = vpop.f32.mrf.mxu2 }
 0x212   : > { %5104 = vmatmul.msk.bf16.gmra.mxu0 %vm1270_vm5, %v6498_v61 }
 0x214   : > { %1726 = vrot.lane.b32.xlu2 %v6173_v25, %s5297_s20  ;;  %v6525_v25 = vsel %vm1227_vm4, %v1849_v1, %v1814_v37  ;;  %v1768_v29 = vpop.permute.xlu0 %1767  ;;  %v1818_v20 = vpop.permute.xlu1 %1817 }
 0x215   : > { %v1852_v36 = vsel %vm543_vm7, %v1748_v55, %v1768_v29  ;;  %v8708_v29 = vmov 0  }
 0x216   : > { %v6539_v60 = vsel %vm1227_vm4, %v1852_v36, %v1816_v2  ;;  %v1705_v4 = vpop.permute.xlu2 %1704 }
 0x217   : > { %v1749_v5 = vsel %vm5444_vm14, 0, %v1705_v4 }
 0x21a   : > { %5074 = vmatmul.msk.bf16.gmra.mxu3 %vm1270_vm5, %v6331_v16 }
 0x21c   : > { %v1770_v50 = vpop.permute.xlu0 %1769 }
 0x21d   : > { %v1855_v1 = vsel %vm543_vm7, %v1749_v5, %v1770_v50  ;;  %v5161_v50 = vld [vmem:[%s8528_s9 + $0x14] sm:$0xf] }
 0x21e   : > { %v6559_v55 = vsel %vm1227_vm4, %v1855_v1, %v1818_v20  ;;  %v1707_v5 = vpop.permute.xlu2 %1706  ;;  %v2877_v1 = vunpack.c.l.b16 %v5161_v50  ;;  %v8709_v20 = vld [vmem:[#allocation64_spill] sm:$0xff] }
 0x21f   : > { %v1750_v46 = vsel %vm5444_vm14, 0, %v1707_v5  ;;  %v1820_v5 = vpop.permute.xlu1 %1819 }
 0x220   : > { %v2879_v53 = vpack.c.b16 %v2877_v1, %v2877_v1 }
 0x221   : > { %5051 = vmatmul.msk.bf16.gmra.mxu1 %vm1270_vm5, %v6518_v17  ;;  %5071 = vmatmul.msk.bf16.gmra.mxu2 %vm1270_vm5, %v6518_v17 }
 0x222   : > { %5105 = vmatmul.msk.bf16.gmra.mxu0 %vm1270_vm5, %v6525_v25 }
 0x224   : > { %v1772_v43 = vpop.permute.xlu0 %1771 }
 0x225   : > { %v1858_v50 = vsel %vm543_vm7, %v1750_v46, %v1772_v43  ;;  %v3119_v43 = vunpack.c.l.b16 %v5203_v54 }
 0x226   : > { %v6590_v41 = vsel %vm1227_vm4, %v1858_v50, %v1820_v5 }
 0x22a   : > { %5075 = vmatmul.msk.bf16.gmra.mxu3 %vm1270_vm5, %v6387_v40 }
 0x231   : > { %5052 = vmatmul.msk.bf16.gmra.mxu1 %vm1270_vm5, %v6447_v23  ;;  %5144 = vmatmul.msk.bf16.vlgmr.msrb.gmra.mxu2 %vm1270_vm5, %v6498_v61 }
 0x232   : > { %5106 = vmatmul.msk.bf16.gmra.mxu0 %vm1270_vm5, %v6539_v60 }
 0x23a   : > { %5082 = vmatmul.msk.bf16.vlgmr.msrb.gmra.mxu3 %vm1270_vm5, %v8707_v49 }
 0x23d   : > { %v6553_v59 = vpop.f32.mrf.mxu3 }
 0x23e   : > { %v6556_v37 = vpop.f32.mrf.mxu1 }
 0x241   : > { %2071 = vmatmul.bf16.vlgmr.msrb.gmra.mxu1 %v8708_v29  ;;  %5145 = vmatmul.msk.bf16.gmra.mxu2 %vm1270_vm5, %v6525_v25 }
 0x242   : > { %5107 = vmatmul.msk.bf16.gmra.mxu0 %vm1270_vm5, %v6559_v55 }
 0x244   : > { %v1441_v36 = vpop.f32.mrf.mxu2 }
 0x245   : > { %v6566_v2 = vpop.f32.mrf.mxu3 }
 0x246   : > { %v1338_v4 = vpop.f32.mrf.mxu1 }
 0x247   : > { %v6568_v49 = vadd.f32 %v1438_v32, %v1338_v4  ;;  %v2916_v32 = vsel %vm2914_vm9, %v2879_v53, 0  ;;  %v2867_v4 = vld [vmem:[%s8528_s9 + $0x8] sm:$0xf]  ;;  %v3121_v53 = vpack.c.b16 %v3119_v43, %v3119_v43 }
 0x248   : > { %2924 = vmatpush.bf16.msra.mxu3 %v2916_v32 }
 0x249   : > { %v3124_v32 = vsel %vm2914_vm9, %v3121_v53, 0  ;;  %v1822_v53 = vpop.permute.xlu1 %1821 }
 0x24a   : > { %5083 = vmatmul.msk.bf16.gmra.mxu3 %vm1270_vm5, %v8709_v20  ;;  %v3012_v20 = vunpack.c.l.b16 %v2867_v4  ;;  %3132 = vmatpush.bf16.msra.mxu1 %v3124_v32 }
 0x24c   : > { %v1443_v34 = vpop.f32.mrf.mxu2  ;;  %v3014_v1 = vpack.c.b16 %v3012_v20, %v3012_v20  ;;  %v8710_v20 = vld [vmem:[#allocation67_spill] sm:$0xff] }
 0x24d   : > { %v6577_v8 = vpop.f32.mrf.mxu3 }
 0x24e   : > { %v1341_v56 = vpop.f32.mrf.mxu1  ;;  %v3019_v46 = vsel %vm2914_vm9, %v3014_v1, 0  ;;  %v1774_v1 = vpop.permute.xlu0 %1773 }
 0x24f   : > { %v6584_v58 = vadd.f32 %v1441_v36, %v1341_v56  ;;  %3027 = vmatpush.bf16.msra.mxu0 %v3019_v46 }
 0x251   : > { %5123 = vmatmul.msk.bf16.gmra.mxu1 %vm1270_vm5, %v6462_v14  ;;  %5146 = vmatmul.msk.bf16.gmra.mxu2 %vm1270_vm5, %v6539_v60  ;;  %v1709_v14 = vpop.permute.xlu2 %1708  ;;  %v1824_v7 = vpop.permute.xlu1 %1823 }
 0x252   : > { %5108 = vmatmul.msk.bf16.gmra.mxu0 %vm1270_vm5, %v6590_v41  ;;  %v1751_v54 = vsel %vm5444_vm14, 0, %v1709_v14 }
 0x253   : > { %v1861_v43 = vsel %vm543_vm7, %v1751_v54, %v1774_v1 }
 0x254   : > { %v1446_v56 = vpop.f32.mrf.mxu2 }
 0x255   : > { %v6599_v36 = vpop.f32.mrf.mxu3 }
 0x256   : > { %v1343_v4 = vpop.f32.mrf.mxu1  ;;  %v1776_v54 = vpop.permute.xlu0 %1775 }
 0x257   : > { %v6602_v50 = vadd.f32 %v1443_v34, %v1343_v4  ;;  %v6614_v34 = vsel %vm1227_vm4, %v1861_v43, %v1822_v53 }
 0x25a   : > { %5084 = vmatmul.msk.bf16.gmra.mxu3 %vm1270_vm5, %v8710_v20 }
 0x25c   : > { %v1448_v5 = vpop.f32.mrf.mxu2 }
 0x25d   : > { %v6608_v46 = vpop.f32.mrf.mxu3 }
 0x25e   : > { %v1346_v42 = vpop.f32.mrf.mxu1 }
 0x25f   : > { %v6611_v33 = vadd.f32 %v1446_v56, %v1346_v42  ;;  %v1711_v42 = vpop.permute.xlu2 %1710 }
 0x260   : > { %v1752_v56 = vsel %vm5444_vm14, 0, %v1711_v42 }
 0x261   : > { %5124 = vmatmul.msk.bf16.gmra.mxu1 %vm1270_vm5, %v6498_v61  ;;  %5147 = vmatmul.msk.bf16.gmra.mxu2 %vm1270_vm5, %v6559_v55  ;;  %v1864_v43 = vsel %vm543_vm7, %v1752_v56, %v1776_v54  ;;  %v1778_v54 = vpop.permute.xlu0 %1777 }
 0x262   : > { %5109 = vmatmul.msk.bf16.gmra.mxu0 %vm1270_vm5, %v6614_v34 }
 0x264   : > { %v1451_v32 = vpop.f32.mrf.mxu2 }
 0x265   : > { %v6622_v4 = vpop.f32.mrf.mxu3 }
 0x266   : > { %v1348_v14 = vpop.f32.mrf.mxu1 }
 0x267   : > { %v6624_v20 = vadd.f32 %v1448_v5, %v1348_v14  ;;  %v6636_v5 = vsel %vm1227_vm4, %v1864_v43, %v1824_v7 }
 0x26a   : > { %5085 = vmatmul.msk.bf16.gmra.mxu3 %vm1270_vm5, %v6297_v10 }
 0x26c   : > { %v1453_v61 = vpop.f32.mrf.mxu2 }
 0x26d   : > { %v6630_v1 = vpop.f32.mrf.mxu3 }
 0x26e   : > { %v1351_v53 = vpop.f32.mrf.mxu1 }
 0x26f   : > { %v6633_v52 = vadd.f32 %v1451_v32, %v1351_v53  ;;  %v1713_v32 = vpop.permute.xlu2 %1712 }
 0x270   : > { %v1753_v7 = vsel %vm5444_vm14, 0, %v1713_v32 }
 0x271   : > { %5125 = vmatmul.msk.bf16.gmra.mxu1 %vm1270_vm5, %v6525_v25  ;;  %5148 = vmatmul.msk.bf16.gmra.mxu2 %vm1270_vm5, %v6590_v41  ;;  %v1867_v53 = vsel %vm543_vm7, %v1753_v7, %v1778_v54 }
 0x272   : > { %5110 = vmatmul.msk.bf16.gmra.mxu0 %vm1270_vm5, %v6636_v5 }
 0x274   : > { %v1456_v10 = vpop.f32.mrf.mxu2 }
 0x275   : > { %v6644_v14 = vpop.f32.mrf.mxu3 }
 0x276   : > { %v1353_v42 = vpop.f32.mrf.mxu1 }
 0x277   : > { %v6646_v56 = vadd.f32 %v1453_v61, %v1353_v42  ;;  %v1826_v61 = vpop.permute.xlu1 %1825  ;;  %v1715_v7 = vpop.permute.xlu2 %1714 }
 0x278   : > { %v6661_v51 = vsel %vm1227_vm4, %v1867_v53, %v1826_v61  ;;  %v1780_v53 = vpop.permute.xlu0 %1779 }
 0x27a   : > { %5086 = vmatmul.msk.bf16.gmra.mxu3 %vm1270_vm5, %v6364_v27 }
 0x27c   : > { %v1458_v25 = vpop.f32.mrf.mxu2 }
 0x27d   : > { %v1476_v43 = vpop.f32.mrf.mxu3 }
 0x27e   : > { %v6654_v18 = vadd.f32 %v1476_v43, %v6553_v59  ;;  %v1356_v63 = vpop.f32.mrf.mxu1 }
 0x27f   : > { %v6656_v21 = vadd.f32 %v1456_v10, %v1356_v63  ;;  %v6658_v42 = vpop.f32.mrf.mxu0 }
 0x280   : > { %8711 = vst [vmem:[#allocation58_spill] sm:$0xff] %v6654_v18 }
 0x281   : > { %5126 = vmatmul.msk.bf16.gmra.mxu1 %vm1270_vm5, %v6539_v60  ;;  %5149 = vmatmul.msk.bf16.gmra.mxu2 %vm1270_vm5, %v6614_v34  ;;  %v1754_v60 = vsel %vm5444_vm14, 0, %v1715_v7 }
 0x282   : > { %5111 = vmatmul.msk.bf16.gmra.mxu0 %vm1270_vm5, %v6661_v51  ;;  %v1870_v62 = vsel %vm543_vm7, %v1754_v60, %v1780_v53 }
 0x284   : > { %v1461_v27 = vpop.f32.mrf.mxu2 }
 0x285   : > { %v1478_v59 = vpop.f32.mrf.mxu3 }
 0x286   : > { %v6670_v63 = vadd.f32 %v1478_v59, %v6566_v2  ;;  %v1358_v10 = vpop.f32.mrf.mxu1 }
 0x287   : > { %v6672_v32 = vadd.f32 %v1458_v25, %v1358_v10  ;;  %v6674_v54 = vpop.f32.mrf.mxu0  ;;  %v1828_v10 = vpop.permute.xlu1 %1827 }
 0x288   : > { %8712 = vst [vmem:[#allocation66_spill] sm:$0xff] %v6670_v63  ;;  %v6687_v47 = vsel %vm1227_vm4, %v1870_v62, %v1828_v10  ;;  %v1717_v62 = vpop.permute.xlu2 %1716 }
 0x28a   : > { %5087 = vmatmul.msk.bf16.gmra.mxu3 %vm1270_vm5, %v6401_v24 }
 0x28c   : > { %v1463_v43 = vpop.f32.mrf.mxu2 }
 0x28d   : > { %v1481_v61 = vpop.f32.mrf.mxu3 }
 0x28e   : > { %v6682_v2 = vadd.f32 %v1481_v61, %v6577_v8  ;;  %v1361_v59 = vpop.f32.mrf.mxu1 }
 0x28f   : > { %v6684_v25 = vadd.f32 %v1461_v27, %v1361_v59  ;;  %v6695_v24 = vpop.f32.mrf.mxu0  ;;  %v1782_v59 = vpop.permute.xlu0 %1781 }
 0x290   : > { %8713 = vst [vmem:[#allocation50_spill] sm:$0xff] %v6682_v2 }
 0x291   : > { %5127 = vmatmul.msk.bf16.gmra.mxu1 %vm1270_vm5, %v6559_v55  ;;  %5150 = vmatmul.msk.bf16.gmra.mxu2 %vm1270_vm5, %v6636_v5  ;;  %v1755_v55 = vsel %vm5444_vm14, 0, %v1717_v62 }
 0x292   : > { %5112 = vmatmul.msk.bf16.gmra.mxu0 %vm1270_vm5, %v6687_v47  ;;  %v1873_v2 = vsel %vm543_vm7, %v1755_v55, %v1782_v59  ;;  %v1719_v59 = vpop.permute.xlu2 %1718 }
 0x294   : > { %v1466_v8 = vpop.f32.mrf.mxu2 }
 0x295   : > { %v1483_v7 = vpop.f32.mrf.mxu3 }
 0x296   : > { %v6698_v27 = vadd.f32 %v1483_v7, %v6599_v36  ;;  %v1363_v60 = vpop.f32.mrf.mxu1 }
 0x297   : > { %v6700_v53 = vadd.f32 %v1463_v43, %v1363_v60  ;;  %v6707_v63 = vpop.f32.mrf.mxu0  ;;  %v1830_v60 = vpop.permute.xlu1 %1829 }
 0x298   : > { %8714 = vst [vmem:[#allocation52_spill] sm:$0xff] %v6698_v27  ;;  %v6715_v27 = vsel %vm1227_vm4, %v1873_v2, %v1830_v60 }
 0x299   : > { %8715 = vst [vmem:[#allocation62_spill] sm:$0xff] %v6700_v53 }
 0x29a   : > { %5088 = vmatmul.msk.bf16.gmra.mxu3 %vm1270_vm5, %v6434_v35 }
 0x29c   : > { %v1468_v61 = vpop.f32.mrf.mxu2 }
 0x29d   : > { %v1486_v10 = vpop.f32.mrf.mxu3 }
 0x29e   : > { %v6710_v36 = vadd.f32 %v1486_v10, %v6608_v46  ;;  %v1366_v7 = vpop.f32.mrf.mxu1 }
 0x29f   : > { %v6712_v43 = vadd.f32 %v1466_v8, %v1366_v7  ;;  %v6728_v2 = vpop.f32.mrf.mxu0  ;;  %v1784_v7 = vpop.permute.xlu0 %1783 }
 0x2a0   : > { %8716 = vst [vmem:[#allocation64_spill] sm:$0xff] %v6710_v36 }
 0x2a1   : > { %8717 = vst [vmem:[#allocation67_spill] sm:$0xff] %v6712_v43  ;;  %5128 = vmatmul.msk.bf16.gmra.mxu1 %vm1270_vm5, %v6590_v41  ;;  %5151 = vmatmul.msk.bf16.gmra.mxu2 %vm1270_vm5, %v6661_v51  ;;  %v1756_v41 = vsel %vm5444_vm14, 0, %v1719_v59 }
 0x2a2   : > { %5113 = vmatmul.msk.bf16.gmra.mxu0 %vm1270_vm5, %v6715_v27  ;;  %v1876_v36 = vsel %vm543_vm7, %v1756_v41, %v1784_v7 }
 0x2a4   : > { %v1471_v35 = vpop.f32.mrf.mxu2 }
 0x2a5   : > { %v1488_v62 = vpop.f32.mrf.mxu3 }
 0x2a6   : > { %v6724_v46 = vadd.f32 %v1488_v62, %v6622_v4  ;;  %v1368_v8 = vpop.f32.mrf.mxu1 }
 0x2a7   : > { %v6726_v55 = vadd.f32 %v1468_v61, %v1368_v8  ;;  %v1832_v8 = vpop.permute.xlu1 %1831 }
 0x2a8   : > { %8718 = vst [vmem:[#allocation70_spill] sm:$0xff] %v6724_v46  ;;  %v6741_v46 = vsel %vm1227_vm4, %v1876_v36, %v1832_v8  ;;  %v1721_v36 = vpop.permute.xlu2 %1720  ;;  %v1786_v8 = vpop.permute.xlu0 %1785 }
 0x2a9   : > { %8719 = vst [vmem:[#allocation71_spill] sm:$0xff] %v6726_v55 }
 0x2aa   : > { %5089 = vmatmul.msk.bf16.gmra.mxu3 %vm1270_vm5, %v6466_v26  ;;  %v6747_v26 = vpop.f32.mrf.mxu0 }
 0x2ac   : > { %v1473_v10 = vpop.f32.mrf.mxu2 }
 0x2ad   : > { %v1491_v60 = vpop.f32.mrf.mxu3 }
 0x2ae   : > { %v6736_v4 = vadd.f32 %v1491_v60, %v6630_v1  ;;  %v1371_v62 = vpop.f32.mrf.mxu1 }
 0x2af   : > { %v6738_v61 = vadd.f32 %v1471_v35, %v1371_v62 }
 0x2b0   : > { %8720 = vst [vmem:[#allocation72_spill] sm:$0xff] %v6736_v4 }
 0x2b1   : > { %8721 = vst [vmem:[#allocation73_spill] sm:$0xff] %v6738_v61  ;;  %5129 = vmatmul.msk.bf16.gmra.mxu1 %vm1270_vm5, %v6614_v34  ;;  %5152 = vmatmul.msk.bf16.gmra.mxu2 %vm1270_vm5, %v6687_v47  ;;  %v1757_v34 = vsel %vm5444_vm14, 0, %v1721_v36  ;;  %v6773_v36 = vld [vmem:[%s8527_s8] ss:$0 sm:$0xff] }
 0x2b2   : > { %5114 = vmatmul.msk.bf16.gmra.mxu0 %vm1270_vm5, %v6741_v46  ;;  %v6760_v60 = vpop.f32.mrf.mxu0  ;;  %v1879_v18 = vsel %vm543_vm7, %v1757_v34, %v1786_v8 }
 0x2b4   : > { %v2172_v1 = vpop.f32.mrf.mxu2 }
 0x2b5   : > { %v1493_v59 = vpop.f32.mrf.mxu3 }
 0x2b6   : > { %v6752_v35 = vadd.f32 %v1493_v59, %v6644_v14  ;;  %v1373_v41 = vpop.f32.mrf.mxu1 }
 0x2b7   : > { %v6754_v7 = vadd.f32 %v1473_v10, %v1373_v41  ;;  %v6767_v10 = vld [vmem:[%s8525_s6] ss:$0 sm:$0xff]  ;;  %v1834_v41 = vpop.permute.xlu1 %1833 }
 0x2b8   : > { %8722 = vst [vmem:[#allocation74_spill] sm:$0xff] %v6752_v35 }
 0x2b9   : > { %8723 = vst [vmem:[#allocation75_spill] sm:$0xff] %v6754_v7  ;;  %v6776_v7 = vsel %vm1227_vm4, %v1879_v18, %v1834_v41  ;;  %v1723_v41 = vpop.permute.xlu2 %1722 }
 0x2ba   : > { %5090 = vmatmul.msk.bf16.gmra.mxu3 %vm1270_vm5, %v6495_v9  ;;  %v6788_v18 = vpop.f32.mrf.mxu0 }
 0x2bc   : > { %v2174_v62 = vpop.f32.mrf.mxu2 }
 0x2bd   : > { %v1516_v4 = vpop.f32.mrf.mxu3 }
 0x2be   : > { %v1596_v14 = vadd.f32 %v1516_v4, %v6239_v19  ;;  %v2072_v59 = vpop.f32.mrf.mxu1 }
 0x2bf   : > { %v2073_v9 = vadd.f32 %v2072_v59, %v6658_v42  ;;  %v1419_v42 = vadd.f32 %v6229_v12, %v6252_v28  ;;  %v1758_v12 = vsel %vm5444_vm14, 0, %v1723_v41 }
 0x2c0   : > { %v1632_v19 = vadd.f32 %v6767_v10, %v1596_v14 }
 0x2c1   : > { %v2252_v35 = vadd.f32 %v2172_v1, %v2073_v9  ;;  %5130 = vmatmul.msk.bf16.gmra.mxu1 %vm1270_vm5, %v6636_v5  ;;  %5153 = vmatmul.msk.bf16.gmra.mxu2 %vm1270_vm5, %v6715_v27 }
 0x2c2   : > { %5115 = vmatmul.msk.bf16.gmra.mxu0 %vm1270_vm5, %v6776_v7  ;;  %v1664_v8 = vmax.f32 %v1632_v19, 0.0 }
 0x2c3   : > { %v2288_v1 = vadd.f32 %v6773_v36, %v2252_v35 }
 0x2c4   : > { %v2177_v4 = vpop.f32.mrf.mxu2  ;;  %v4278_v43 = vpack.c.bf16 %v1664_v8, %v1664_v8 }
 0x2c5   : > { %v1518_v34 = vpop.f32.mrf.mxu3  ;;  %v2320_v61 = vmax.f32 %v2288_v1, 0.0 }
 0x2c6   : > { %v1597_v59 = vadd.f32 %v1518_v34, %v1419_v42  ;;  %v2074_v5 = vpop.f32.mrf.mxu1  ;;  %v1788_v42 = vpop.permute.xlu0 %1787  ;;  %v4406_v1 = vunpack.c.l.b16 %v4278_v43 }
 0x2c7   : > { %v2075_v9 = vadd.f32 %v2074_v5, %v6674_v54  ;;  %v2352_v34 = vpack.c.bf16 %v2320_v61, %v2320_v61 }
 0x2c8   : > { %v1633_v14 = vadd.f32 %v6767_v10, %v1597_v59  ;;  %v1882_v59 = vsel %vm543_vm7, %v1758_v12, %v1788_v42 }
 0x2c9   : > { %v2253_v55 = vadd.f32 %v2174_v62, %v2075_v9 }
 0x2ca   : > { %v1665_v53 = vmax.f32 %v1633_v14, 0.0  ;;  %5091 = vmatmul.msk.bf16.gmra.mxu3 %vm1270_vm5, %v6518_v17  ;;  %v5250_v17 = vld [vmem:[%s8528_s9 + $0xc] sm:$0xff]  ;;  %v6803_v14 = vpop.f32.mrf.mxu0 }
 0x2cb   : > { %v2289_v28 = vadd.f32 %v6773_v36, %v2253_v55  ;;  %2925 = vmatpush.bf16.msra.mxu3 %v5250_v17  ;;  %v1725_v17 = vpop.permute.xlu2 %1724 }
 0x2cc   : > { %v4279_v35 = vpack.c.bf16 %v1665_v53, %v1665_v53  ;;  %v2179_v19 = vpop.f32.mrf.mxu2  ;;  %v1836_v53 = vpop.permute.xlu1 %1835 }
 0x2cd   : > { %v2321_v54 = vmax.f32 %v2289_v28, 0.0  ;;  %v1521_v5 = vpop.f32.mrf.mxu3  ;;  %v6808_v43 = vsel %vm1227_vm4, %v1882_v59, %v1836_v53 }
 0x2ce   : > { %v4407_v62 = vunpack.c.l.b16 %v4279_v35  ;;  %v1598_v8 = vadd.f32 %v1521_v5, %v6271_v22  ;;  %v2077_v9 = vpop.f32.mrf.mxu1  ;;  %v2416_v22 = vunpack.c.l.b16 %v2352_v34 }
 0x2cf   : > { %v2078_v41 = vadd.f32 %v2077_v9, %v6695_v24  ;;  %v2353_v55 = vpack.c.bf16 %v2321_v54, %v2321_v54 }
 0x2d0   : > { %v6805_v61 = vpack.c.b16 %v4407_v62, %v4406_v1  ;;  %v1634_v24 = vadd.f32 %v6767_v10, %v1598_v8  ;;  %v5249_v62 = vld [vmem:[%s8528_s9] sm:$0xff] }
 0x2d1   : > { %v2254_v28 = vadd.f32 %v2177_v4, %v2078_v41  ;;  %5131 = vmatmul.msk.bf16.gmra.mxu1 %vm1270_vm5, %v6661_v51  ;;  %5154 = vmatmul.msk.bf16.gmra.mxu2 %vm1270_vm5, %v6741_v46  ;;  %v2417_v12 = vunpack.c.l.b16 %v2353_v55  ;;  %v1424_v4 = vadd.f32 %v6276_v30, %v6294_v57  ;;  %v5251_v57 = vld [vmem:[%s8528_s9 + $0x18] sm:$0xff] }
 0x2d2   : > { %8724 = vst [vmem:[#allocation76_spill] sm:$0xff] %v6805_v61  ;;  %5116 = vmatmul.msk.bf16.gmra.mxu0 %vm1270_vm5, %v6808_v43  ;;  %v1666_v34 = vmax.f32 %v1634_v24, 0.0  ;;  %3133 = vmatpush.bf16.msra.mxu1 %v5251_v57  ;;  %v1759_v24 = vsel %vm5444_vm14, 0, %v1725_v17 }
 0x2d3   : > { %v6817_v35 = vpack.c.b16 %v2417_v12, %v2416_v22  ;;  %v2290_v54 = vadd.f32 %v6773_v36, %v2254_v28  ;;  %3028 = vmatpush.bf16.msra.mxu0 %v5249_v62  ;;  %v6839_v22 = vpop.f32.mrf.mxu0 }
 0x2d4   : > { %v2182_v42 = vpop.f32.mrf.mxu2  ;;  %v4280_v12 = vpack.c.bf16 %v1666_v34, %v1666_v34  ;;  %v1838_v11 = vpop.permute.xlu1 %1837 }
 0x2d5   : > { %v1523_v5 = vpop.f32.mrf.mxu3  ;;  %2704 = vrot.lane.b32.xlu2 %v6817_v35, %s5298_s27  ;;  %v2465_v51 = vshrl.u32 %v6817_v35, 16  ;;  %v2468_v8 = vshll.u32 %v6817_v35, 16  ;;  %v2322_v55 = vmax.f32 %v2290_v54, 0.0  ;;  %v1790_v54 = vpop.permute.xlu0 %1789 }
 0x2d6   : > { %v1599_v59 = vadd.f32 %v1523_v5, %v1424_v4  ;;  %v2079_v1 = vpop.f32.mrf.mxu1  ;;  %v1885_v62 = vsel %vm543_vm7, %v1759_v24, %v1790_v54 }
 0x2d7   : > { %v2080_v30 = vadd.f32 %v2079_v1, %v6707_v63  ;;  %v6833_v9 = vrot.slane %v2465_v51, 7  ;;  %v2624_v24 = vrot.slane %v2468_v8, 1 }
 0x2d8   : > { %v1635_v41 = vadd.f32 %v6767_v10, %v1599_v59 }
 0x2d9   : > { %v2255_v53 = vadd.f32 %v2179_v19, %v2080_v30  ;;  %v6837_v28 = vor.u32 %v2468_v8, %v6833_v9  ;;  %v2354_v19 = vpack.c.bf16 %v2322_v55, %v2322_v55  ;;  %v4408_v30 = vunpack.c.l.b16 %v4280_v12 }
 0x2da   : > { %v1667_v63 = vmax.f32 %v1635_v41, 0.0  ;;  %5092 = vmatmul.msk.bf16.gmra.mxu3 %vm1270_vm5, %v6447_v23 }
 0x2db   : > { %v2291_v35 = vadd.f32 %v6773_v36, %v2255_v53  ;;  %v2418_v55 = vunpack.c.l.b16 %v2354_v19 }
 0x2dc   : > { %v4281_v4 = vpack.c.bf16 %v1667_v63, %v1667_v63  ;;  %v2184_v5 = vpop.f32.mrf.mxu2  ;;  %v6852_v63 = vsel %vm1227_vm4, %v1885_v62, %v1838_v11  ;;  %v1429_v11 = vadd.f32 %v6349_v39, %v6360_v13  ;;  %v2625_v13 = vor.u32 %v2624_v24, %v2465_v51 }
 0x2dd   : > { %v2323_v59 = vmax.f32 %v2291_v35, 0.0  ;;  %v1526_v1 = vpop.f32.mrf.mxu3 }
 0x2de   : > { %v4409_v57 = vunpack.c.l.b16 %v4281_v4  ;;  %v1600_v34 = vadd.f32 %v1526_v1, %v6328_v31  ;;  %v2082_v41 = vpop.f32.mrf.mxu1 }
 0x2df   : > { %v2083_v23 = vadd.f32 %v2082_v41, %v6728_v2  ;;  %v2355_v61 = vpack.c.bf16 %v2323_v59, %v2323_v59 }
 0x2e0   : > { %v6849_v17 = vpack.c.b16 %v4409_v57, %v4408_v30  ;;  %v1636_v31 = vadd.f32 %v6767_v10, %v1600_v34  ;;  %v1727_v30 = vpop.permute.xlu2 %1726 }
 0x2e1   : > { %v2256_v53 = vadd.f32 %v2182_v42, %v2083_v23  ;;  %5132 = vmatmul.msk.bf16.gmra.mxu1 %vm1270_vm5, %v6687_v47  ;;  %5155 = vmatmul.msk.bf16.gmra.mxu2 %vm1270_vm5, %v6776_v7  ;;  %v2419_v12 = vunpack.c.l.b16 %v2355_v61  ;;  %v6865_v42 = vpop.f32.mrf.mxu0 }
 0x2e2   : > { %5117 = vmatmul.msk.bf16.gmra.mxu0 %vm1270_vm5, %v6852_v63  ;;  %v1668_v19 = vmax.f32 %v1636_v31, 0.0 }
 0x2e3   : > { %v6861_v2 = vpack.c.b16 %v2419_v12, %v2418_v55  ;;  %v2292_v47 = vadd.f32 %v6773_v36, %v2256_v53 }
 0x2e4   : > { %v2187_v35 = vpop.f32.mrf.mxu2  ;;  %v4282_v53 = vpack.c.bf16 %v1668_v19, %v1668_v19 }
 0x2e5   : > { %v1528_v4 = vpop.f32.mrf.mxu3  ;;  %2706 = vrot.lane.b32.xlu1 %v6861_v2, %s5298_s27  ;;  %v2472_v61 = vshrl.u32 %v6861_v2, 16  ;;  %v2475_v54 = vshll.u32 %v6861_v2, 16  ;;  %v2324_v34 = vmax.f32 %v2292_v47, 0.0 }
 0x2e6   : > { %v1601_v59 = vadd.f32 %v1528_v4, %v1429_v11  ;;  %v2084_v1 = vpop.f32.mrf.mxu1 }
 0x2e7   : > { %v6872_v8 = vrot.slane %v2472_v61, 7  ;;  %v2085_v39 = vadd.f32 %v2084_v1, %v6747_v26  ;;  %v2626_v62 = vrot.slane %v2475_v54, 1  ;;  %v1760_v26 = vsel %vm5444_vm14, 0, %v1727_v30 }
 0x2e8   : > { %v1637_v57 = vadd.f32 %v6767_v10, %v1601_v59  ;;  %v2356_v11 = vpack.c.bf16 %v2324_v34, %v2324_v34  ;;  %v4410_v59 = vunpack.c.l.b16 %v4282_v53 }
 0x2e9   : > { %v2257_v41 = vadd.f32 %v2184_v5, %v2085_v39  ;;  %v2627_v23 = vsel %vm1046_vm10, %v2625_v13, %v2626_v62  ;;  %v2477_v31 = vor.u32 %v2475_v54, %v6872_v8  ;;  %v6891_v19 = vpop.f32.mrf.mxu0 }
 0x2ea   : > { %v1669_v55 = vmax.f32 %v1637_v57, 0.0  ;;  %5093 = vmatmul.msk.bf16.gmra.mxu3 %vm1270_vm5, %v6274_v48  ;;  %v2688_v12 = vsel %vm5456_vm15, 0, %v2627_v23  ;;  %v1792_v48 = vpop.permute.xlu0 %1791  ;;  %v2420_v53 = vunpack.c.l.b16 %v2356_v11 }
 0x2eb   : > { %v2293_v51 = vadd.f32 %v6773_v36, %v2257_v41  ;;  %2752 = vrot.lane.b32.xlu0 %v2688_v12, %s5299_s25  ;;  %v6888_v24 = vsel %vm831_vm8, %v6833_v9, %v2477_v31  ;;  %v1888_v54 = vsel %vm543_vm7, %v1760_v26, %v1792_v48  ;;  %v1840_v41 = vpop.permute.xlu1 %1839 }
 0x2ec   : > { %v4283_v5 = vpack.c.bf16 %v1669_v55, %v1669_v55  ;;  %v2189_v2 = vpop.f32.mrf.mxu2  ;;  %v6898_v34 = vsel %vm1227_vm4, %v1888_v54, %v1840_v41  ;;  %v1437_v41 = vadd.f32 %v6543_v15, %v6556_v37  ;;  %v8726_v37 = vld [vmem:[#allocation5_spill] sm:$0xff] }
 0x2ed   : > { %v2325_v47 = vmax.f32 %v2293_v51, 0.0  ;;  %v1531_v4 = vpop.f32.mrf.mxu3 }
 0x2ee   : > { %v4411_v1 = vunpack.c.l.b16 %v4283_v5  ;;  %v1602_v39 = vadd.f32 %v1531_v4, %v6384_v45  ;;  %v2087_v13 = vpop.f32.mrf.mxu1  ;;  %v2628_v4 = vor.u32 %v2626_v62, %v2472_v61 }
 0x2ef   : > { %v2088_v30 = vadd.f32 %v2087_v13, %v6760_v60  ;;  %v2357_v57 = vpack.c.bf16 %v2325_v47, %v2325_v47 }
 0x2f0   : > { %v6895_v23 = vpack.c.b16 %v4411_v1, %v4410_v59  ;;  %v1638_v45 = vadd.f32 %v6767_v10, %v1602_v39 }
 0x2f1   : > { %v2258_v9 = vadd.f32 %v2187_v35, %v2088_v30  ;;  %5133 = vmatmul.msk.bf16.gmra.mxu1 %vm1270_vm5, %v6715_v27  ;;  %5156 = vmatmul.msk.bf16.gmra.mxu2 %vm1270_vm5, %v6808_v43  ;;  %v2421_v55 = vunpack.c.l.b16 %v2357_v57  ;;  %v1434_v35 = vadd.f32 %v6529_v38, %v6547_v44  ;;  %v6919_v38 = vpop.f32.mrf.mxu0 }
 0x2f2   : > { %5118 = vmatmul.msk.bf16.gmra.mxu0 %vm1270_vm5, %v6898_v34  ;;  %v1670_v5 = vmax.f32 %v1638_v45, 0.0 }
 0x2f3   : > { %v6907_v60 = vpack.c.b16 %v2421_v55, %v2420_v53  ;;  %v2294_v31 = vadd.f32 %v6773_v36, %v2258_v9 }
 0x2f4   : > { %v2192_v12 = vpop.f32.mrf.mxu2  ;;  %v4284_v30 = vpack.c.bf16 %v1670_v5, %v1670_v5 }
 0x2f5   : > { %v1533_v26 = vpop.f32.mrf.mxu3  ;;  %2708 = vrot.lane.b32.xlu0 %v6907_v60, %s5298_s27  ;;  %v2480_v27 = vshrl.u32 %v6907_v60, 16  ;;  %v2483_v51 = vshll.u32 %v6907_v60, 16  ;;  %v2326_v1 = vmax.f32 %v2294_v31, 0.0 }
 0x2f6   : > { %v1603_v48 = vadd.f32 %v1533_v26, %v1434_v35  ;;  %v2089_v11 = vpop.f32.mrf.mxu1  ;;  %v4412_v60 = vunpack.c.l.b16 %v4284_v30 }
 0x2f7   : > { %v2090_v47 = vadd.f32 %v2089_v11, %v6788_v18  ;;  %v2629_v54 = vrot.slane %v2483_v51, 1  ;;  %v6917_v59 = vrot.slane %v2480_v27, 7  ;;  %v2358_v55 = vpack.c.bf16 %v2326_v1, %v2326_v1 }
 0x2f8   : > { %v1639_v44 = vadd.f32 %v6767_v10, %v1603_v48  ;;  %v8725_v48 = vld [vmem:[#allocation2_spill] sm:$0xff] }
 0x2f9   : > { %v2259_v39 = vadd.f32 %v2189_v2, %v2090_v47  ;;  %v2630_v13 = vsel %vm1046_vm10, %v2628_v4, %v2629_v54  ;;  %v2485_v61 = vor.u32 %v2483_v51, %v6917_v59  ;;  %v3765_v11 = vpack.c.bf16 %v8725_v48, %v8725_v48  ;;  %v6947_v1 = vpop.f32.mrf.mxu0 }
 0x2fa   : > { %v1671_v57 = vmax.f32 %v1639_v44, 0.0  ;;  %5094 = vmatmul.msk.bf16.gmra.mxu3 %vm1270_vm5, %v6331_v16  ;;  %v2689_v18 = vsel %vm5456_vm15, 0, %v2630_v13  ;;  %v3766_v47 = vpack.c.bf16 %v8726_v37, %v8726_v37  ;;  %v2422_v4 = vunpack.c.l.b16 %v2358_v55 }
 0x2fb   : > { %v2295_v62 = vadd.f32 %v6773_v36, %v2259_v39  ;;  %2754 = vrot.lane.b32.xlu2 %v2689_v18, %s5299_s25  ;;  %v6934_v53 = vsel %vm831_vm8, %v6872_v8, %v2485_v61  ;;  %v3827_v13 = vunpack.c.l.b16 %v3765_v11 }
 0x2fc   : > { %v4285_v2 = vpack.c.bf16 %v1671_v57, %v1671_v57  ;;  %v2194_v9 = vpop.f32.mrf.mxu2  ;;  %v3828_v57 = vunpack.c.l.b16 %v3766_v47 }
 0x2fd   : > { %v2327_v16 = vmax.f32 %v2295_v62, 0.0  ;;  %v1536_v45 = vpop.f32.mrf.mxu3  ;;  %v5300_v62 = vmov 4286578559  }
 0x2fe   : > { %v4413_v35 = vunpack.c.l.b16 %v4285_v2  ;;  %v1604_v31 = vadd.f32 %v1536_v45, %v1437_v41  ;;  %v2092_v26 = vpop.f32.mrf.mxu1  ;;  %v6958_v41 = vunpack.c.l.bf16 %v5300_v62  ;;  %v6960_v2 = vunpack.c.h.bf16 %v5300_v62 }
 0x2ff   : > { %v2093_v51 = vadd.f32 %v2092_v26, %v6803_v14  ;;  %v2359_v5 = vpack.c.bf16 %v2327_v16, %v2327_v16 }
 0x300   : > { %v6939_v15 = vpack.c.b16 %v4413_v35, %v4412_v60  ;;  %v1640_v14 = vadd.f32 %v6767_v10, %v1604_v31  ;;  %8727 = vst [vmem:[#allocation2_spill] sm:$0xff] %v6958_v41  ;;  %v2631_v31 = vor.u32 %v2629_v54, %v2480_v27  ;;  %v8730_v27 = vld [vmem:[#allocation56_spill] sm:$0xff] }
 0x301   : > { %v2260_v8 = vadd.f32 %v2192_v12, %v2093_v51  ;;  %5134 = vmatmul.msk.bf16.gmra.mxu1 %vm1270_vm5, %v6741_v46  ;;  %5157 = vmatmul.msk.bf16.gmra.mxu2 %vm1270_vm5, %v6852_v63  ;;  %v2423_v44 = vunpack.c.l.b16 %v2359_v5  ;;  %8728 = vst [vmem:[#allocation5_spill] sm:$0xff] %v6960_v2  ;;  %v3950_v54 = vmax.f32 %v6960_v2, %v8730_v27  ;;  %v6986_v62 = vpop.f32.mrf.mxu0 }
 0x302   : > { %3029 = vmatmul.bf16.vlgmr.msra.gmra.mxu0 %v8708_v29  ;;  %v1672_v55 = vmax.f32 %v1640_v14, 0.0  ;;  %v8729_v14 = vld [vmem:[#allocation55_spill] sm:$0xff] }
 0x303   : > { %v6951_v39 = vpack.c.b16 %v2423_v44, %v2422_v4  ;;  %v2296_v12 = vadd.f32 %v6773_v36, %v2260_v8 }
 0x304   : > { %v2197_v30 = vpop.f32.mrf.mxu2  ;;  %v4286_v8 = vpack.c.bf16 %v1672_v55, %v1672_v55 }
 0x305   : > { %v1538_v18 = vpop.f32.mrf.mxu3  ;;  %2710 = vrot.lane.b32.xlu2 %v6951_v39, %s5298_s27  ;;  %v8582_v46 = vshrl.u32 %v6951_v39, 16  ;;  %v2491_v61 = vshll.u32 %v6951_v39, 16  ;;  %v2328_v5 = vmax.f32 %v2296_v12, 0.0  ;;  %v6981_v12 = vpack.c.b16 %v3828_v57, %v3827_v13 }
 0x306   : > { %v1605_v16 = vadd.f32 %v1538_v18, %v6568_v49  ;;  %v2094_v45 = vpop.f32.mrf.mxu1  ;;  %v8731_v18 = vld [vmem:[#allocation6_spill] sm:$0xff]  ;;  %v4414_v57 = vunpack.c.l.b16 %v4286_v8 }
 0x307   : > { %v6965_v60 = vrot.slane %v8582_v46, 7  ;;  %v2095_v35 = vadd.f32 %v2094_v45, %v6839_v22  ;;  %v2632_v26 = vrot.slane %v2491_v61, 1  ;;  %v3949_v22 = vmax.f32 %v6958_v41, %v8729_v14 }
 0x308   : > { %v1641_v51 = vadd.f32 %v6767_v10, %v1605_v16  ;;  %v2360_v45 = vpack.c.bf16 %v2328_v5, %v2328_v5  ;;  %v8583_v13 = vunpack.c.h.bf16 %v6981_v12 }
 0x309   : > { %v2261_v11 = vadd.f32 %v2194_v9, %v2095_v35  ;;  %v2633_v47 = vsel %vm1046_vm10, %v2631_v31, %v2632_v26  ;;  %v2493_v44 = vor.u32 %v2491_v61, %v6965_v60 }
 0x30a   : > { %v1673_v4 = vmax.f32 %v1641_v51, 0.0  ;;  %5095 = vmatmul.msk.bf16.gmra.mxu3 %vm1270_vm5, %v6387_v40  ;;  %v2690_v49 = vsel %vm5456_vm15, 0, %v2633_v47  ;;  %v3525_v40 = vsel %vm5456_vm15, 4286578559, %v8731_v18  ;;  %v8584_v51 = vunpack.c.l.bf16 %v6981_v12 }
 0x30b   : > { %v2297_v9 = vadd.f32 %v6773_v36, %v2261_v11  ;;  %2756 = vrot.lane.b32.xlu1 %v2690_v49, %s5299_s25  ;;  %v6990_v16 = vsel %vm831_vm8, %v6917_v59, %v2493_v44  ;;  %v7002_v59 = vmax.f32 %v3950_v54, %v8583_v13  ;;  %v3703_v5 = vunpack.c.l.bf16 %v3525_v40 }
 0x30c   : > { %v4287_v55 = vpack.c.bf16 %v1673_v4, %v1673_v4  ;;  %v2199_v61 = vpop.f32.mrf.mxu2  ;;  %v6998_v46 = vmax.f32 %v3949_v22, %v8584_v51 }
 0x30d   : > { %v2329_v35 = vmax.f32 %v2297_v9, 0.0  ;;  %v1541_v31 = vpop.f32.mrf.mxu3 }
 0x30e   : > { %v4415_v11 = vunpack.c.l.b16 %v4287_v55  ;;  %v1606_v47 = vadd.f32 %v1541_v31, %v6584_v58  ;;  %v2097_v49 = vpop.f32.mrf.mxu1  ;;  %v2424_v58 = vunpack.c.l.b16 %v2360_v45  ;;  %v3704_v55 = vunpack.c.h.bf16 %v3525_v40  ;;  %v8732_v45 = vld [vmem:[#allocation3_spill] sm:$0xff] }
 0x30f   : > { %v2098_v18 = vadd.f32 %v2097_v49, %v6865_v42  ;;  %v2361_v4 = vpack.c.bf16 %v2329_v35, %v2329_v35  ;;  %v3763_v31 = vpack.c.bf16 %v8729_v14, %v8729_v14  ;;  %v3764_v40 = vpack.c.bf16 %v8730_v27, %v8730_v27  ;;  %v7027_v49 = vpop.f32.mrf.mxu0 }
 0x310   : > { %v1642_v44 = vadd.f32 %v6767_v10, %v1606_v47  ;;  %v7005_v9 = vpack.c.b16 %v4415_v11, %v4414_v57  ;;  %v7023_v47 = vmax.f32 %v8732_v45, %v3703_v5 }
 0x311   : > { %v2262_v8 = vadd.f32 %v2197_v30, %v2098_v18  ;;  %5135 = vmatmul.msk.bf16.gmra.mxu1 %vm1270_vm5, %v6776_v7  ;;  %5158 = vmatmul.msk.bf16.gmra.mxu2 %vm1270_vm5, %v6898_v34  ;;  %v2425_v42 = vunpack.c.l.b16 %v2361_v4  ;;  %v8733_v4 = vshrl.u32 %v6951_v39, 16 }
 0x312   : > { %v1674_v54 = vmax.f32 %v1642_v44, 0.0 }
 0x313   : > { %v7013_v35 = vpack.c.b16 %v2425_v42, %v2424_v58  ;;  %v2298_v30 = vadd.f32 %v6773_v36, %v2262_v8  ;;  %v2634_v44 = vor.u32 %v2632_v26, %v8733_v4  ;;  %v8734_v8 = vld [vmem:[#allocation4_spill] sm:$0xff]  ;;  %v3825_v26 = vunpack.c.l.b16 %v3763_v31 }
 0x314   : > { %v2202_v57 = vpop.f32.mrf.mxu2  ;;  %v7033_v58 = vmax.f32 %v8734_v8, %v3704_v55  ;;  %v4288_v42 = vpack.c.bf16 %v1674_v54, %v1674_v54 }
 0x315   : > { %v1543_v11 = vpop.f32.mrf.mxu3  ;;  %2712 = vrot.lane.b32.xlu1 %v7013_v35, %s5298_s27  ;;  %v8585_v7 = vshrl.u32 %v7013_v35, 16  ;;  %v2499_v34 = vshll.u32 %v7013_v35, 16 }
 0x316   : > { %v1607_v14 = vadd.f32 %v1543_v11, %v6602_v50  ;;  %v2099_v18 = vpop.f32.mrf.mxu1  ;;  %v3767_v50 = vpack.c.bf16 %v7023_v47, %v7023_v47  ;;  %v3768_v39 = vpack.c.bf16 %v7033_v58, %v7033_v58  ;;  %v2330_v11 = vmax.f32 %v2298_v30, 0.0  ;;  %v8735_v30 = vld [vmem:[#allocation12_spill] sm:$0xff] }
 0x317   : > { %v7037_v22 = vrot.slane %v8585_v7, 7  ;;  %v2100_v5 = vadd.f32 %v2099_v18, %v6891_v19  ;;  %v2635_v45 = vrot.slane %v2499_v34, 1  ;;  %v3826_v18 = vunpack.c.l.b16 %v3764_v40 }
 0x318   : > { %v1643_v27 = vadd.f32 %v6767_v10, %v1607_v14  ;;  %v3829_v14 = vunpack.c.l.b16 %v3767_v50  ;;  %v3830_v13 = vunpack.c.l.b16 %v3768_v39  ;;  %v2362_v51 = vpack.c.bf16 %v2330_v11, %v2330_v11 }
 0x319   : > { %v2263_v55 = vadd.f32 %v2199_v61, %v2100_v5  ;;  %v2636_v54 = vsel %vm1046_vm10, %v2634_v44, %v2635_v45  ;;  %v2501_v31 = vor.u32 %v2499_v34, %v7037_v22  ;;  %v3526_v61 = vsel %vm5456_vm15, 4286578559, %v8735_v30 }
 0x31a   : > { %v1675_v4 = vmax.f32 %v1643_v27, 0.0  ;;  %5096 = vmatmul.msk.bf16.gmra.mxu3 %vm1270_vm5, %v6421_v3  ;;  %v2691_v19 = vsel %vm5456_vm15, 0, %v2636_v54  ;;  %v4416_v44 = vunpack.c.l.b16 %v4288_v42  ;;  %v3855_v3 = vpack.c.b16 %v3826_v18, %v3825_v26 }
 0x31b   : > { %v2299_v8 = vadd.f32 %v6773_v36, %v2263_v55  ;;  %2758 = vrot.lane.b32.xlu0 %v2691_v19, %s5299_s25  ;;  %v7056_v40 = vpack.c.b16 %v3830_v13, %v3829_v14  ;;  %v7060_v50 = vsel %vm831_vm8, %v6965_v60, %v2501_v31  ;;  %v3705_v18 = vunpack.c.l.bf16 %v3526_v61  ;;  %v7066_v13 = vpop.f32.mrf.mxu0 }
 0x31c   : > { %v4289_v5 = vpack.c.bf16 %v1675_v4, %v1675_v4  ;;  %v2204_v27 = vpop.f32.mrf.mxu2  ;;  %v3887_v19 = vunpack.c.l.bf16 %v3855_v3  ;;  %v3888_v2 = vunpack.c.h.bf16 %v3855_v3  ;;  %v3706_v31 = vunpack.c.h.bf16 %v3526_v61  ;;  %v8736_v3 = vld [vmem:[#allocation7_spill] sm:$0xff] }
 0x31d   : > { %v2331_v7 = vmax.f32 %v2299_v8, 0.0  ;;  %v1546_v54 = vpop.f32.mrf.mxu3  ;;  %v3891_v26 = vunpack.c.l.bf16 %v7056_v40  ;;  %v8587_v11 = vunpack.c.h.bf16 %v7056_v40 }
 0x31e   : > { %v4417_v39 = vunpack.c.l.b16 %v4289_v5  ;;  %v1608_v34 = vadd.f32 %v1546_v54, %v6611_v33  ;;  %v2102_v55 = vpop.f32.mrf.mxu1  ;;  %v3951_v14 = vmax.f32 %v3887_v19, %v8725_v48  ;;  %v3952_v60 = vmax.f32 %v3888_v2, %v8726_v37 }
 0x31f   : > { %v2103_v42 = vadd.f32 %v2102_v55, %v6919_v38  ;;  %v2363_v4 = vpack.c.bf16 %v2331_v7, %v2331_v7  ;;  %v2426_v33 = vunpack.c.l.b16 %v2362_v51  ;;  %v7094_v54 = vmax.f32 %v8736_v3, %v3705_v18 }
 0x320   : > { %v7073_v7 = vpack.c.b16 %v4417_v39, %v4416_v44  ;;  %v7077_v30 = vmax.f32 %v3951_v14, %v3891_v26  ;;  %v7081_v48 = vmax.f32 %v3952_v60, %v8587_v11  ;;  %v1644_v37 = vadd.f32 %v6767_v10, %v1608_v34 }
 0x321   : > { %v2264_v8 = vadd.f32 %v2202_v57, %v2103_v42  ;;  %5136 = vmatmul.msk.bf16.gmra.mxu1 %vm1270_vm5, %v6808_v43  ;;  %2246 = vmatmul.bf16.gmra.mxu2 %v8708_v29  ;;  %v2427_v38 = vunpack.c.l.b16 %v2363_v4  ;;  %v8737_v55 = vshrl.u32 %v7013_v35, 16  ;;  %v8738_v42 = vld [vmem:[#allocation8_spill] sm:$0xff] }
 0x322   : > { %v7100_v4 = vmax.f32 %v8738_v42, %v3706_v31  ;;  %v1676_v14 = vmax.f32 %v1644_v37, 0.0 }
 0x323   : > { %v7084_v2 = vpack.c.b16 %v2427_v38, %v2426_v33  ;;  %v2300_v43 = vadd.f32 %v6773_v36, %v2264_v8  ;;  %v2637_v19 = vor.u32 %v2635_v45, %v8737_v55  ;;  %v3769_v33 = vpack.c.bf16 %v7094_v54, %v7094_v54  ;;  %v8739_v55 = vld [vmem:[#allocation18_spill] sm:$0xff] }
 0x324   : > { %v2207_v57 = vpop.f32.mrf.mxu2 }
 0x325   : > { %v1548_v44 = vpop.f32.mrf.mxu3  ;;  %2714 = vrot.lane.b32.xlu0 %v7084_v2, %s5298_s27  ;;  %v2504_v61 = vshrl.u32 %v7084_v2, 16  ;;  %v2507_v5 = vshll.u32 %v7084_v2, 16  ;;  %v2332_v38 = vmax.f32 %v2300_v43, 0.0 }
 0x326   : > { %v1609_v39 = vadd.f32 %v1548_v44, %v6624_v20  ;;  %v2104_v34 = vpop.f32.mrf.mxu1  ;;  %v3770_v20 = vpack.c.bf16 %v7100_v4, %v7100_v4  ;;  %v3831_v44 = vunpack.c.l.b16 %v3769_v33 }
 0x327   : > { %v2105_v60 = vadd.f32 %v2104_v34, %v6947_v1  ;;  %v7103_v8 = vrot.slane %v2507_v5, 1  ;;  %v7112_v35 = vrot.slane %v2504_v61, 7  ;;  %v7116_v1 = vpop.f32.mrf.mxu0  ;;  %v2364_v42 = vpack.c.bf16 %v2332_v38, %v2332_v38 }
 0x328   : > { %v1645_v18 = vadd.f32 %v6767_v10, %v1609_v39  ;;  %v3832_v3 = vunpack.c.l.b16 %v3770_v20  ;;  %v4290_v39 = vpack.c.bf16 %v1676_v14, %v1676_v14  ;;  %v8740_v14 = vunpack.c.l.bf16 %v6981_v12 }
 0x329   : > { %v2265_v45 = vadd.f32 %v2204_v27, %v2105_v60  ;;  %v2639_v31 = vsel %vm1046_vm10, %v2637_v19, %v7103_v8  ;;  %v2509_v27 = vor.u32 %v2507_v5, %v7112_v35  ;;  %v3527_v19 = vsel %vm5456_vm15, 4286578559, %v8739_v55 }
 0x32a   : > { %v1677_v37 = vmax.f32 %v1645_v18, 0.0  ;;  %1590 = vmatmul.bf16.gmra.mxu3 %v8708_v29  ;;  %v2692_v43 = vsel %vm5456_vm15, 0, %v2639_v31  ;;  %v7127_v51 = vpack.c.b16 %v3832_v3, %v3831_v44  ;;  %v3953_v33 = vmax.f32 %v8740_v14, %v7023_v47 }
 0x32b   : > { %v2301_v34 = vadd.f32 %v6773_v36, %v2265_v45  ;;  %2760 = vrot.lane.b32.xlu2 %v2692_v43, %s5299_s25  ;;  %v8741_v20 = vunpack.c.h.bf16 %v6981_v12  ;;  %v7137_v5 = vsel %vm831_vm8, %v7037_v22, %v2509_v27  ;;  %v3707_v14 = vunpack.c.l.bf16 %v3527_v19 }
 0x32c   : > { %v4291_v60 = vpack.c.bf16 %v1677_v37, %v1677_v37  ;;  %v2209_v18 = vpop.f32.mrf.mxu2  ;;  %v3893_v44 = vunpack.c.l.bf16 %v7127_v51  ;;  %v3894_v3 = vunpack.c.h.bf16 %v7127_v51  ;;  %v3708_v27 = vunpack.c.h.bf16 %v3527_v19  ;;  %v7294_v51 = vld [vmem:[%s8525_s6] ss:$0 sm:$0xff] }
 0x32d   : > { %v2333_v11 = vmax.f32 %v2301_v34, 0.0  ;;  %v1551_v31 = vpop.f32.mrf.mxu3  ;;  %v3954_v45 = vmax.f32 %v8741_v20, %v7033_v58  ;;  %v4418_v34 = vunpack.c.l.b16 %v4290_v39 }
 0x32e   : > { %v4419_v43 = vunpack.c.l.b16 %v4291_v60  ;;  %v1610_v38 = vadd.f32 %v1551_v31, %v6633_v52  ;;  %v2107_v37 = vpop.f32.mrf.mxu1  ;;  %v7145_v12 = vmax.f32 %v3953_v33, %v3893_v44  ;;  %v8742_v52 = vpack.c.bf16 %v7002_v59, %v6998_v46 }
 0x32f   : > { %v2108_v55 = vadd.f32 %v2107_v37, %v6986_v62  ;;  %v2365_v47 = vpack.c.bf16 %v2333_v11, %v2333_v11  ;;  %v7149_v22 = vmax.f32 %v3954_v45, %v3894_v3  ;;  %v2428_v62 = vunpack.c.l.b16 %v2364_v42  ;;  %v8743_v42 = vld [vmem:[#allocation13_spill] sm:$0xff] }
 0x330   : > { %v7157_v39 = vpack.c.b16 %v4419_v43, %v4418_v34  ;;  %v1646_v60 = vadd.f32 %v6767_v10, %v1610_v38  ;;  %v7172_v45 = vmax.f32 %v8743_v42, %v3707_v14  ;;  %v8744_v34 = vld [vmem:[#allocation14_spill] sm:$0xff] }
 0x331   : > { %v2266_v58 = vadd.f32 %v2207_v57, %v2108_v55  ;;  %5137 = vmatmul.msk.bf16.gmra.mxu1 %vm1270_vm5, %v6852_v63  ;;  %5223 = vmatmul.msk.bf16.vlgmr.msra.gmra.mxu2 %vm543_vm7, %v8742_v52  ;;  %v2429_v11 = vunpack.c.l.b16 %v2365_v47  ;;  %v7164_v57 = vpop.f32.mrf.mxu0  ;;  %v7176_v55 = vmax.f32 %v8744_v34, %v3708_v27  ;;  %v2640_v52 = vor.u32 %v7103_v8, %v2504_v61 }
 0x332   : > { %v1678_v43 = vmax.f32 %v1646_v60, 0.0 }
 0x333   : > { %v7162_v33 = vpack.c.b16 %v2429_v11, %v2428_v62  ;;  %v2302_v63 = vadd.f32 %v6773_v36, %v2266_v58  ;;  %v3772_v27 = vpack.c.bf16 %v7176_v55, %v7176_v55 }
 0x334   : > { %v2212_v20 = vpop.f32.mrf.mxu2  ;;  %v4292_v42 = vpack.c.bf16 %v1678_v43, %v1678_v43 }
 0x335   : > { %v1553_v46 = vpop.f32.mrf.mxu3  ;;  %2716 = vrot.lane.b32.xlu2 %v7162_v33, %s5298_s27  ;;  %v2512_v59 = vshrl.u32 %v7162_v33, 16  ;;  %v2515_v19 = vshll.u32 %v7162_v33, 16  ;;  %v2334_v14 = vmax.f32 %v2302_v63, 0.0  ;;  %v3834_v8 = vunpack.c.l.b16 %v3772_v27 }
 0x336   : > { %v1611_v38 = vadd.f32 %v1553_v46, %v6646_v56  ;;  %v2109_v37 = vpop.f32.mrf.mxu1  ;;  %v3771_v56 = vpack.c.bf16 %v7172_v45, %v7172_v45  ;;  %v8746_v27 = vunpack.c.h.bf16 %v7056_v40 }
 0x337   : > { %v7180_v47 = vrot.slane %v2512_v59, 7  ;;  %v2110_v58 = vadd.f32 %v2109_v37, %v7027_v49  ;;  %v2641_v62 = vrot.slane %v2515_v19, 1 }
 0x338   : > { %v1647_v11 = vadd.f32 %v6767_v10, %v1611_v38  ;;  %v3833_v2 = vunpack.c.l.b16 %v3771_v56  ;;  %v8745_v38 = vld [vmem:[#allocation21_spill] sm:$0xff]  ;;  %v3955_v56 = vmax.f32 %v3891_v26, %v7094_v54 }
 0x339   : > { %v2267_v60 = vadd.f32 %v2209_v18, %v2110_v58  ;;  %v2642_v46 = vsel %vm1046_vm10, %v2640_v52, %v2641_v62  ;;  %v2517_v63 = vor.u32 %v2515_v19, %v7180_v47  ;;  %v3528_v37 = vsel %vm5456_vm15, 4286578559, %v8745_v38  ;;  %v7208_v19 = vpop.f32.mrf.mxu0 }
 0x33a   : > { %v1679_v34 = vmax.f32 %v1647_v11, 0.0  ;;  %v2693_v49 = vsel %vm5456_vm15, 0, %v2642_v46  ;;  %v2366_v18 = vpack.c.bf16 %v2334_v14, %v2334_v14  ;;  %v7200_v31 = vpack.c.b16 %v3834_v8, %v3833_v2 }
 0x33b   : > { %v2303_v61 = vadd.f32 %v6773_v36, %v2267_v60  ;;  %2762 = vrot.lane.b32.xlu1 %v2693_v49, %s5299_s25  ;;  %v3956_v60 = vmax.f32 %v8746_v27, %v7100_v4  ;;  %v4420_v46 = vunpack.c.l.b16 %v4292_v42  ;;  %v3709_v40 = vunpack.c.l.bf16 %v3528_v37 }
 0x33c   : > { %v4293_v58 = vpack.c.bf16 %v1679_v34, %v1679_v34  ;;  %v2214_v52 = vpop.f32.mrf.mxu2  ;;  %v3895_v26 = vunpack.c.l.bf16 %v7200_v31  ;;  %v3896_v54 = vunpack.c.h.bf16 %v7200_v31  ;;  %v2430_v38 = vunpack.c.l.b16 %v2366_v18 }
 0x33d   : > { %v2335_v43 = vmax.f32 %v2303_v61, 0.0  ;;  %v1556_v11 = vpop.f32.mrf.mxu3  ;;  %v7213_v61 = vsel %vm831_vm8, %v7112_v35, %v2517_v63 }
 0x33e   : > { %v4421_v49 = vunpack.c.l.b16 %v4293_v58  ;;  %v1612_v14 = vadd.f32 %v1556_v11, %v6656_v21  ;;  %v2112_v34 = vpop.f32.mrf.mxu1  ;;  %v8747_v21 = vpack.c.bf16 %v7081_v48, %v7077_v30  ;;  %v7231_v63 = vmax.f32 %v3956_v60, %v3896_v54  ;;  %v8748_v60 = vld [vmem:[#allocation19_spill] sm:$0xff] }
 0x33f   : > { %v2113_v2 = vadd.f32 %v2112_v34, %v7066_v13  ;;  %v2367_v8 = vpack.c.bf16 %v2335_v43, %v2335_v43  ;;  %v7227_v13 = vmax.f32 %v3955_v56, %v3895_v26  ;;  %v3710_v43 = vunpack.c.h.bf16 %v3528_v37 }
 0x340   : > { %v1648_v4 = vadd.f32 %v6767_v10, %v1612_v14  ;;  %v7219_v42 = vpack.c.b16 %v4421_v49, %v4420_v46  ;;  %v7243_v49 = vmax.f32 %v8748_v60, %v3709_v40  ;;  %v2643_v34 = vor.u32 %v2641_v62, %v2512_v59 }
 0x341   : > { %v2268_v58 = vadd.f32 %v2212_v20, %v2113_v2  ;;  %5224 = vmatmul.msk.bf16.gmra.mxu2 %vm543_vm7, %v8747_v21  ;;  %v2431_v35 = vunpack.c.l.b16 %v2367_v8  ;;  %v8749_v2 = vld [vmem:[#allocation20_spill] sm:$0xff]  ;;  %v7258_v40 = vpop.f32.mrf.mxu0 }
 0x342   : > { %v1680_v11 = vmax.f32 %v1648_v4, 0.0  ;;  %v7249_v8 = vmax.f32 %v8749_v2, %v3710_v43  ;;  %v3773_v33 = vpack.c.bf16 %v7243_v49, %v7243_v49 }
 0x343   : > { %v7233_v18 = vpack.c.b16 %v2431_v35, %v2430_v38  ;;  %v2304_v30 = vadd.f32 %v6773_v36, %v2268_v58 }
 0x344   : > { %v2217_v48 = vpop.f32.mrf.mxu2  ;;  %v4294_v4 = vpack.c.bf16 %v1680_v11, %v1680_v11  ;;  %v3774_v59 = vpack.c.bf16 %v7249_v8, %v7249_v8 }
 0x345   : > { %v1558_v27 = vpop.f32.mrf.mxu3  ;;  %2718 = vrot.lane.b32.xlu1 %v7233_v18, %s5298_s27  ;;  %v2520_v56 = vshrl.u32 %v7233_v18, 16  ;;  %v2523_v46 = vshll.u32 %v7233_v18, 16  ;;  %v2336_v35 = vmax.f32 %v2304_v30, 0.0 }
 0x346   : > { %v1613_v37 = vadd.f32 %v1558_v27, %v6672_v32  ;;  %v2114_v14 = vpop.f32.mrf.mxu1  ;;  %v3835_v27 = vunpack.c.l.b16 %v3773_v33  ;;  %v3836_v60 = vunpack.c.l.b16 %v3774_v59  ;;  %v3957_v33 = vmax.f32 %v3893_v44, %v7172_v45  ;;  %v2705_v44 = vpop.permute.xlu2 %2704 }
 0x347   : > { %v7253_v38 = vrot.slane %v2520_v56, 7  ;;  %v2115_v58 = vadd.f32 %v2114_v14, %v7116_v1  ;;  %v7256_v21 = vrot.slane %v2523_v46, 1  ;;  %v8750_v14 = vld [vmem:[#allocation24_spill] sm:$0xff]  ;;  %v2368_v2 = vpack.c.bf16 %v2336_v35, %v2336_v35 }
 0x348   : > { %v1649_v32 = vadd.f32 %v6767_v10, %v1613_v37  ;;  %v3529_v10 = vsel %vm5456_vm15, 4286578559, %v8750_v14 }
 0x349   : > { %v2269_v62 = vadd.f32 %v2214_v52, %v2115_v58  ;;  %v2645_v43 = vsel %vm1046_vm10, %v2643_v34, %v7256_v21  ;;  %v2525_v37 = vor.u32 %v2523_v46, %v7253_v38  ;;  %v4422_v52 = vunpack.c.l.b16 %v4294_v4 }
 0x34a   : > { %v1681_v11 = vmax.f32 %v1649_v32, 0.0  ;;  %v2694_v1 = vsel %vm5456_vm15, 0, %v2645_v43  ;;  %v7275_v32 = vpack.c.b16 %v3836_v60, %v3835_v27  ;;  %v2432_v60 = vunpack.c.l.b16 %v2368_v2 }
 0x34b   : > { %v2305_v30 = vadd.f32 %v6773_v36, %v2269_v62  ;;  %2764 = vrot.lane.b32.xlu0 %v2694_v1, %s5299_s25  ;;  %v3958_v36 = vmax.f32 %v3894_v3, %v7176_v55  ;;  %v7285_v59 = vsel %vm831_vm8, %v7180_v47, %v2525_v37  ;;  %v7311_v37 = vpop.f32.mrf.mxu0  ;;  %v2609_v2 = vsel %vm5444_vm14, 0, %v6888_v24 }
 0x34c   : > { %v4295_v58 = vpack.c.bf16 %v1681_v11, %v1681_v11  ;;  %v2219_v34 = vpop.f32.mrf.mxu2  ;;  %v8589_v62 = vunpack.c.l.bf16 %v7275_v32  ;;  %v8588_v11 = vunpack.c.h.bf16 %v7275_v32  ;;  %v2646_v24 = vor.u32 %v7256_v21, %v2520_v56 }
 0x34d   : > { %v2337_v20 = vmax.f32 %v2305_v30, 0.0  ;;  %v1561_v43 = vpop.f32.mrf.mxu3  ;;  %v3712_v30 = vunpack.c.h.bf16 %v3529_v10 }
 0x34e   : > { %v4423_v46 = vunpack.c.l.b16 %v4295_v58  ;;  %v1614_v4 = vadd.f32 %v1561_v43, %v6684_v25  ;;  %v2117_v35 = vpop.f32.mrf.mxu1  ;;  %v7299_v45 = vmax.f32 %v3957_v33, %v8589_v62  ;;  %v7303_v25 = vmax.f32 %v3958_v36, %v8588_v11 }
 0x34f   : > { %v2118_v1 = vadd.f32 %v2117_v35, %v7164_v57  ;;  %v2369_v27 = vpack.c.bf16 %v2337_v20, %v2337_v20  ;;  %v3711_v57 = vunpack.c.l.bf16 %v3529_v10  ;;  %v8751_v20 = vpack.c.bf16 %v7149_v22, %v7145_v12  ;;  %v8753_v35 = vld [vmem:[#allocation22_spill] sm:$0xff] }
 0x350   : > { %v1650_v3 = vadd.f32 %v7294_v51, %v1614_v4  ;;  %v7305_v55 = vpack.c.b16 %v4423_v46, %v4422_v52  ;;  %v7318_v52 = vld [vmem:[%s8527_s8] ss:$0 sm:$0xff]  ;;  %v2607_v22 = vsel %vm5908_vm3, 0, %v6837_v28 }
 0x351   : > { %v2270_v47 = vadd.f32 %v2217_v48, %v2118_v1  ;;  %5225 = vmatmul.msk.bf16.gmra.mxu2 %vm543_vm7, %v8751_v20  ;;  %v2433_v14 = vunpack.c.l.b16 %v2369_v27  ;;  %v7334_v1 = vmax.f32 %v8753_v35, %v3711_v57  ;;  %v8754_v28 = vld [vmem:[#allocation62_spill] sm:$0xff]  ;;  %v8755_v20 = vld [vmem:[#allocation23_spill] sm:$0xff] }
 0x352   : > { %v1682_v58 = vmax.f32 %v1650_v3, 0.0 }
 0x353   : > { %v2306_v48 = vadd.f32 %v7318_v52, %v2270_v47  ;;  %v7321_v33 = vpack.c.b16 %v2433_v14, %v2432_v60  ;;  %v7341_v60 = vmax.f32 %v8755_v20, %v3712_v30  ;;  %v3775_v57 = vpack.c.bf16 %v7334_v1, %v7334_v1  ;;  %v7370_v20 = vpop.f32.mrf.mxu0 }
 0x354   : > { %v2222_v10 = vpop.f32.mrf.mxu2  ;;  %v4296_v27 = vpack.c.bf16 %v1682_v58, %v1682_v58 }
 0x355   : > { %v1563_v36 = vpop.f32.mrf.mxu3  ;;  %2720 = vrot.lane.b32.xlu0 %v7321_v33, %s5298_s27  ;;  %v8590_v46 = vshrl.u32 %v7321_v33, 16  ;;  %v2531_v4 = vshll.u32 %v7321_v33, 16  ;;  %v2338_v14 = vmax.f32 %v2306_v48, 0.0  ;;  %v3776_v18 = vpack.c.bf16 %v7341_v60, %v7341_v60 }
 0x356   : > { %v1615_v3 = vadd.f32 %v1563_v36, %v8754_v28  ;;  %v2119_v47 = vpop.f32.mrf.mxu1  ;;  %v2755_v36 = vpop.permute.xlu2 %2754  ;;  %v2608_v28 = vsel %vm5444_vm14, 0, %v2607_v22  ;;  %v3959_v22 = vmax.f32 %v3895_v26, %v7243_v49  ;;  %v8757_v49 = vld [vmem:[#allocation27_spill] sm:$0xff] }
 0x357   : > { %v2120_v12 = vadd.f32 %v2119_v47, %v7208_v19  ;;  %v2707_v43 = vpop.permute.xlu1 %2706  ;;  %v7344_v11 = vrot.slane %v2531_v4, 1  ;;  %v7354_v56 = vrot.slane %v8590_v46, 7 }
 0x358   : > { %v1651_v58 = vadd.f32 %v7294_v51, %v1615_v3  ;;  %v2789_v35 = vsel %vm1227_vm4, %v2609_v2, %v2707_v43  ;;  %v3837_v2 = vunpack.c.l.b16 %v3775_v57 }
 0x359   : > { %v2271_v21 = vadd.f32 %v2219_v34, %v2120_v12  ;;  %v7357_v19 = vsel %vm2832_vm11, %v2789_v35, %v2755_v36  ;;  %v2648_v30 = vsel %vm1046_vm10, %v2646_v24, %v7344_v11  ;;  %v3838_v34 = vunpack.c.l.b16 %v3776_v18 }
 0x35a   : > { %v1683_v48 = vmax.f32 %v1651_v58, 0.0  ;;  %5208 = vmatmul.msk.bf16.vlgmr.msra.gmra.mxu1 %vm2881_vm12, %v7357_v19  ;;  %v2695_v43 = vsel %vm5456_vm15, 0, %v2648_v30  ;;  %v2533_v47 = vor.u32 %v2531_v4, %v7354_v56  ;;  %v2786_v24 = vsel %vm1227_vm4, %v2608_v28, %v2705_v44 }
 0x35b   : > { %v2307_v3 = vadd.f32 %v7318_v52, %v2271_v21  ;;  %2766 = vrot.lane.b32.xlu2 %v2695_v43, %s5299_s25  ;;  %v4424_v12 = vunpack.c.l.b16 %v4296_v27  ;;  %v2370_v58 = vpack.c.bf16 %v2338_v14, %v2338_v14  ;;  %v7373_v46 = vpack.c.b16 %v3838_v34, %v3837_v2  ;;  %v8756_v21 = vld [vmem:[#allocation67_spill] sm:$0xff] }
 0x35c   : > { %v4297_v36 = vpack.c.bf16 %v1683_v48, %v1683_v48  ;;  %v2224_v35 = vpop.f32.mrf.mxu2  ;;  %v3960_v4 = vmax.f32 %v3896_v54, %v7249_v8  ;;  %v7385_v48 = vsel %vm831_vm8, %v7253_v38, %v2533_v47  ;;  %v3530_v8 = vsel %vm5456_vm15, 4286578559, %v8757_v49 }
 0x35d   : > { %v2339_v30 = vmax.f32 %v2307_v3, 0.0  ;;  %v1566_v57 = vpop.f32.mrf.mxu3  ;;  %v2753_v62 = vpop.permute.xlu0 %2752  ;;  %v8595_v31 = vunpack.c.l.bf16 %v7373_v46  ;;  %v8591_v54 = vunpack.c.h.bf16 %v7373_v46 }
 0x35e   : > { %v4425_v18 = vunpack.c.l.b16 %v4297_v36  ;;  %v1616_v44 = vadd.f32 %v1566_v57, %v8756_v21  ;;  %v2834_v27 = vsel %vm2832_vm11, %v2786_v24, %v2753_v62  ;;  %v2122_v14 = vpop.f32.mrf.mxu1  ;;  %v2434_v62 = vunpack.c.l.b16 %v2370_v58 }
 0x35f   : > { %v2123_v43 = vadd.f32 %v2122_v14, %v7258_v40  ;;  %5166 = vmatmul.msk.bf16.vlgmr.msra.gmra.mxu3 %vm2881_vm12, %v2834_v27  ;;  %5186 = vmatmul.msk.bf16.gmra.mxu0 %vm2881_vm12, %v2834_v27  ;;  %v2371_v26 = vpack.c.bf16 %v2339_v30, %v2339_v30  ;;  %v8758_v40 = vpack.c.bf16 %v7231_v63, %v7227_v13  ;;  %v3714_v13 = vunpack.c.h.bf16 %v3530_v8 }
 0x360   : > { %v7395_v2 = vpack.c.b16 %v4425_v18, %v4424_v12  ;;  %v7403_v3 = vmax.f32 %v3959_v22, %v8595_v31  ;;  %v7407_v34 = vmax.f32 %v3960_v4, %v8591_v54  ;;  %v1652_v47 = vadd.f32 %v7294_v51, %v1616_v44  ;;  %v7419_v22 = vpop.f32.mrf.mxu0  ;;  %v8759_v4 = vld [vmem:[#allocation71_spill] sm:$0xff] }
 0x361   : > { %v2272_v38 = vadd.f32 %v2222_v10, %v2123_v43  ;;  %5226 = vmatmul.msk.bf16.gmra.mxu2 %vm543_vm7, %v8758_v40  ;;  %v2435_v28 = vunpack.c.l.b16 %v2371_v26  ;;  %v3713_v12 = vunpack.c.l.bf16 %v3530_v8  ;;  %v8760_v44 = vshrl.u32 %v7321_v33, 16  ;;  %v8762_v40 = vld [vmem:[#allocation26_spill] sm:$0xff]  ;;  %v8763_v10 = vld [vmem:[#allocation73_spill] sm:$0xff] }
 0x362   : > { %v1684_v14 = vmax.f32 %v1652_v47, 0.0 }
 0x363   : > { %v7410_v24 = vpack.c.b16 %v2435_v28, %v2434_v62  ;;  %v2308_v58 = vadd.f32 %v7318_v52, %v2272_v38  ;;  %v2649_v27 = vor.u32 %v7344_v11, %v8760_v44  ;;  %v8761_v62 = vld [vmem:[#allocation25_spill] sm:$0xff]  ;;  %v7435_v28 = vmax.f32 %v8762_v40, %v3714_v13 }
 0x364   : > { %v2227_v63 = vpop.f32.mrf.mxu2  ;;  %v7432_v38 = vmax.f32 %v8761_v62, %v3713_v12 }
 0x365   : > { %v1568_v36 = vpop.f32.mrf.mxu3  ;;  %2722 = vrot.lane.b32.xlu2 %v7410_v24, %s5298_s27  ;;  %v2536_v30 = vshrl.u32 %v7410_v24, 16  ;;  %v2539_v57 = vshll.u32 %v7410_v24, 16 }
 0x366   : > { %v1617_v18 = vadd.f32 %v1568_v36, %v8759_v4  ;;  %v2124_v21 = vpop.f32.mrf.mxu1  ;;  %v2340_v36 = vmax.f32 %v2308_v58, 0.0 }
 0x367   : > { %v7427_v43 = vrot.slane %v2536_v30, 7  ;;  %v2125_v26 = vadd.f32 %v2124_v21, %v7311_v37  ;;  %v2650_v49 = vrot.slane %v2539_v57, 1  ;;  %v3777_v37 = vpack.c.bf16 %v7432_v38, %v7432_v38 }
 0x368   : > { %v1653_v8 = vadd.f32 %v7294_v51, %v1617_v18  ;;  %v3778_v18 = vpack.c.bf16 %v7435_v28, %v7435_v28  ;;  %v4298_v21 = vpack.c.bf16 %v1684_v14, %v1684_v14 }
 0x369   : > { %v2273_v33 = vadd.f32 %v2224_v35, %v2125_v26  ;;  %v2651_v11 = vsel %vm1046_vm10, %v2649_v27, %v2650_v49  ;;  %v2541_v13 = vor.u32 %v2539_v57, %v7427_v43  ;;  %v3839_v44 = vunpack.c.l.b16 %v3777_v37  ;;  %v8765_v37 = vld [vmem:[#allocation30_spill] sm:$0xff] }
 0x36a   : > { %v1685_v47 = vmax.f32 %v1653_v8, 0.0  ;;  %v2696_v4 = vsel %vm5456_vm15, 0, %v2651_v11  ;;  %v3840_v27 = vunpack.c.l.b16 %v3778_v18  ;;  %v2372_v26 = vpack.c.bf16 %v2340_v36, %v2340_v36  ;;  %v2035_v18 = vpop.f32.mrf.mxu0 }
 0x36b   : > { %v2309_v12 = vadd.f32 %v7318_v52, %v2273_v33  ;;  %2768 = vrot.lane.b32.xlu1 %v2696_v4, %s5299_s25  ;;  %v7449_v40 = vsel %vm831_vm8, %v7354_v56, %v2541_v13  ;;  %v4426_v4 = vunpack.c.l.b16 %v4298_v21  ;;  %v8764_v56 = vunpack.c.l.bf16 %v7275_v32 }
 0x36c   : > { %v4299_v35 = vpack.c.bf16 %v1685_v47, %v1685_v47  ;;  %v2229_v58 = vpop.f32.mrf.mxu2  ;;  %v7452_v33 = vpack.c.b16 %v3840_v27, %v3839_v44 }
 0x36d   : > { %v2341_v8 = vmax.f32 %v2309_v12, 0.0  ;;  %v1571_v62 = vpop.f32.mrf.mxu3  ;;  %v3961_v47 = vmax.f32 %v8764_v56, %v7334_v1  ;;  %v2436_v1 = vunpack.c.l.b16 %v2372_v26 }
 0x36e   : > { %v4427_v11 = vunpack.c.l.b16 %v4299_v35  ;;  %v1618_v14 = vadd.f32 %v1571_v62, %v8763_v10  ;;  %v2127_v54 = vpop.f32.mrf.mxu1  ;;  %v3531_v10 = vsel %vm5456_vm15, 4286578559, %v8765_v37  ;;  %v8593_v21 = vunpack.c.l.bf16 %v7452_v33 }
 0x36f   : > { %v2128_v57 = vadd.f32 %v2127_v54, %v7370_v20  ;;  %5167 = vmatmul.msk.bf16.gmra.mxu3 %vm2881_vm12, %v7357_v19  ;;  %5187 = vmatmul.msk.bf16.gmra.mxu0 %vm2881_vm12, %v7357_v19  ;;  %v2373_v36 = vpack.c.bf16 %v2341_v8, %v2341_v8  ;;  %v8592_v20 = vunpack.c.h.bf16 %v7452_v33  ;;  %v8766_v54 = vunpack.c.h.bf16 %v7275_v32 }
 0x370   : > { %v8767_v19 = vpack.c.bf16 %v7303_v25, %v7299_v45  ;;  %v7474_v44 = vpack.c.b16 %v4427_v11, %v4426_v4  ;;  %v7478_v27 = vmax.f32 %v3961_v47, %v8593_v21  ;;  %v1654_v32 = vadd.f32 %v7294_v51, %v1618_v14 }
 0x371   : > { %v3962_v12 = vmax.f32 %v8766_v54, %v7341_v60  ;;  %v2274_v13 = vadd.f32 %v2227_v63, %v2128_v57  ;;  %v2437_v35 = vunpack.c.l.b16 %v2373_v36  ;;  %v3715_v63 = vunpack.c.l.bf16 %v3531_v10  ;;  %v8768_v36 = vld [vmem:[#allocation75_spill] sm:$0xff] }
 0x372   : > { %5227 = vmatmul.msk.bf16.gmra.mxu2 %vm543_vm7, %v8767_v19  ;;  %v3716_v45 = vunpack.c.h.bf16 %v3531_v10  ;;  %v2652_v47 = vor.u32 %v2650_v49, %v2536_v30  ;;  %v1686_v37 = vmax.f32 %v1654_v32, 0.0  ;;  %v8769_v19 = vld [vmem:[#allocation28_spill] sm:$0xff]  ;;  %v2037_v49 = vpop.f32.mrf.mxu0  ;;  %v2709_v32 = vpop.permute.xlu0 %2708 }
 0x373   : > { %v7482_v8 = vmax.f32 %v3962_v12, %v8592_v20  ;;  %v7485_v60 = vpack.c.b16 %v2437_v35, %v2436_v1  ;;  %v2310_v62 = vadd.f32 %v7318_v52, %v2274_v13  ;;  %v7506_v1 = vmax.f32 %v8769_v19, %v3715_v63  ;;  %v8770_v35 = vld [vmem:[#allocation29_spill] sm:$0xff] }
 0x374   : > { %v2232_v25 = vpop.f32.mrf.mxu2 }
 0x375   : > { %v1573_v11 = vpop.f32.mrf.mxu3  ;;  %2724 = vrot.lane.b32.xlu1 %v7485_v60, %s5298_s27  ;;  %v8594_v4 = vshrl.u32 %v7485_v60, 16  ;;  %v2547_v57 = vshll.u32 %v7485_v60, 16 }
 0x376   : > { %v1619_v14 = vadd.f32 %v1573_v11, %v8768_v36  ;;  %v2129_v56 = vpop.f32.mrf.mxu1  ;;  %v7509_v11 = vmax.f32 %v8770_v35, %v3716_v45  ;;  %v2342_v36 = vmax.f32 %v2310_v62, 0.0  ;;  %v2610_v62 = vsel %vm5444_vm14, 0, %v6934_v53 }
 0x377   : > { %v7499_v10 = vrot.slane %v8594_v4, 7  ;;  %v2130_v54 = vadd.f32 %v2129_v56, %v7419_v22  ;;  %v7502_v12 = vrot.slane %v2547_v57, 1  ;;  %v4300_v56 = vpack.c.bf16 %v1686_v37, %v1686_v37 }
 0x378   : > { %v1655_v13 = vadd.f32 %v7294_v51, %v1619_v14  ;;  %v3779_v14 = vpack.c.bf16 %v7506_v1, %v7506_v1  ;;  %v3780_v63 = vpack.c.bf16 %v7509_v11, %v7509_v11  ;;  %v2792_v35 = vsel %vm1227_vm4, %v2610_v62, %v2709_v32 }
 0x379   : > { %v2275_v24 = vadd.f32 %v2229_v58, %v2130_v54  ;;  %v2654_v30 = vsel %vm1046_vm10, %v2652_v47, %v7502_v12  ;;  %v2549_v58 = vor.u32 %v2547_v57, %v7499_v10  ;;  %v8771_v57 = vld [vmem:[#allocation58_spill] sm:$0xff]  ;;  %v8772_v32 = vunpack.c.l.bf16 %v7373_v46 }
 0x37a   : > { %v1687_v26 = vmax.f32 %v1655_v13, 0.0  ;;  %v2697_v22 = vsel %vm5456_vm15, 0, %v2654_v30  ;;  %v3841_v13 = vunpack.c.l.b16 %v3779_v14  ;;  %v3842_v19 = vunpack.c.l.b16 %v3780_v63 }
 0x37b   : > { %v2311_v45 = vadd.f32 %v7318_v52, %v2275_v24  ;;  %2770 = vrot.lane.b32.xlu0 %v2697_v22, %s5299_s25  ;;  %v2374_v30 = vpack.c.bf16 %v2342_v36, %v2342_v36  ;;  %v7528_v24 = vsel %vm831_vm8, %v7427_v43, %v2549_v58  ;;  %v4428_v14 = vunpack.c.l.b16 %v4300_v56 }
 0x37c   : > { %v4301_v47 = vpack.c.bf16 %v1687_v26, %v1687_v26  ;;  %v2234_v54 = vpop.f32.mrf.mxu2  ;;  %v7532_v26 = vpack.c.b16 %v3842_v19, %v3841_v13  ;;  %v3963_v43 = vmax.f32 %v8772_v32, %v7432_v38  ;;  %v8777_v32 = vshrl.u32 %v7485_v60, 16 }
 0x37d   : > { %v2343_v20 = vmax.f32 %v2311_v45, 0.0  ;;  %v1576_v21 = vpop.f32.mrf.mxu3  ;;  %v2757_v37 = vpop.permute.xlu1 %2756  ;;  %v8773_v45 = vld [vmem:[#allocation33_spill] sm:$0xff]  ;;  %v2438_v38 = vunpack.c.l.b16 %v2374_v30 }
 0x37e   : > { %v4429_v22 = vunpack.c.l.b16 %v4301_v47  ;;  %v1620_v4 = vadd.f32 %v1576_v21, %v8771_v57  ;;  %v2838_v31 = vsel %vm2832_vm11, %v2792_v35, %v2757_v37  ;;  %v2132_v53 = vpop.f32.mrf.mxu1  ;;  %v3532_v21 = vsel %vm5456_vm15, 4286578559, %v8773_v45 }
 0x37f   : > { %v2133_v63 = vadd.f32 %v2132_v53, %v2035_v18  ;;  %5168 = vmatmul.msk.bf16.gmra.mxu3 %vm2881_vm12, %v2838_v31  ;;  %5188 = vmatmul.msk.bf16.gmra.mxu0 %vm2881_vm12, %v2838_v31  ;;  %v2375_v36 = vpack.c.bf16 %v2343_v20, %v2343_v20  ;;  %v8597_v58 = vunpack.c.l.bf16 %v7532_v26  ;;  %v8596_v56 = vunpack.c.h.bf16 %v7532_v26 }
 0x380   : > { %5209 = vmatmul.msk.bf16.gmra.mxu1 %vm2881_vm12, %v2838_v31  ;;  %v8774_v18 = vunpack.c.h.bf16 %v7373_v46  ;;  %v8775_v20 = vpack.c.bf16 %v7407_v34, %v7403_v3  ;;  %v7552_v19 = vpack.c.b16 %v4429_v22, %v4428_v14  ;;  %v3717_v46 = vunpack.c.l.bf16 %v3532_v21  ;;  %v2040_v34 = vpop.f32.mrf.mxu0 }
 0x381   : > { %v2276_v47 = vadd.f32 %v2232_v25, %v2133_v63  ;;  %v2439_v13 = vunpack.c.l.b16 %v2375_v36  ;;  %v7556_v31 = vmax.f32 %v3963_v43, %v8597_v58  ;;  %v3718_v3 = vunpack.c.h.bf16 %v3532_v21  ;;  %v8776_v63 = vld [vmem:[#allocation66_spill] sm:$0xff] }
 0x382   : > { %v3964_v62 = vmax.f32 %v8774_v18, %v7435_v28  ;;  %5228 = vmatmul.msk.bf16.gmra.mxu2 %vm543_vm7, %v8775_v20  ;;  %v1656_v28 = vadd.f32 %v7294_v51, %v1620_v4  ;;  %v2655_v43 = vor.u32 %v7502_v12, %v8777_v32 }
 0x383   : > { %v7563_v25 = vpack.c.b16 %v2439_v13, %v2438_v38  ;;  %v2312_v30 = vadd.f32 %v7318_v52, %v2276_v47  ;;  %v8779_v13 = vld [vmem:[#allocation32_spill] sm:$0xff] }
 0x384   : > { %v7560_v35 = vmax.f32 %v3964_v62, %v8596_v56  ;;  %v2237_v37 = vpop.f32.mrf.mxu2  ;;  %v1688_v45 = vmax.f32 %v1656_v28, 0.0  ;;  %v8778_v62 = vld [vmem:[#allocation31_spill] sm:$0xff]  ;;  %v7583_v22 = vmax.f32 %v8779_v13, %v3718_v3  ;;  %v2611_v3 = vsel %vm5444_vm14, 0, %v6990_v16 }
 0x385   : > { %v1578_v57 = vpop.f32.mrf.mxu3  ;;  %2726 = vrot.lane.b32.xlu0 %v7563_v25, %s5298_s27  ;;  %v8598_v53 = vshrl.u32 %v7563_v25, 16  ;;  %v2555_v14 = vshll.u32 %v7563_v25, 16  ;;  %v7579_v47 = vmax.f32 %v8778_v62, %v3717_v46  ;;  %v2344_v20 = vmax.f32 %v2312_v30, 0.0 }
 0x386   : > { %v1621_v4 = vadd.f32 %v1578_v57, %v8776_v63  ;;  %v2134_v36 = vpop.f32.mrf.mxu1 }
 0x387   : > { %v2135_v21 = vadd.f32 %v2134_v36, %v2037_v49  ;;  %v7576_v18 = vrot.slane %v2555_v14, 1  ;;  %v7587_v57 = vrot.slane %v8598_v53, 7  ;;  %v2711_v49 = vpop.permute.xlu2 %2710  ;;  %v3781_v30 = vpack.c.bf16 %v7579_v47, %v7579_v47  ;;  %v8781_v53 = vld [vmem:[#allocation50_spill] sm:$0xff] }
 0x388   : > { %v1657_v38 = vadd.f32 %v7294_v51, %v1621_v4  ;;  %v4302_v36 = vpack.c.bf16 %v1688_v45, %v1688_v45  ;;  %v2376_v32 = vpack.c.bf16 %v2344_v20, %v2344_v20  ;;  %v8782_v20 = vld [vmem:[#allocation40_spill] sm:$0xff] }
 0x389   : > { %v2277_v60 = vadd.f32 %v2234_v54, %v2135_v21  ;;  %v2657_v12 = vsel %vm1046_vm10, %v2655_v43, %v7576_v18  ;;  %v3782_v54 = vpack.c.bf16 %v7583_v22, %v7583_v22  ;;  %v2557_v4 = vor.u32 %v2555_v14, %v7587_v57 }
 0x38a   : > { %v1689_v28 = vmax.f32 %v1657_v38, 0.0  ;;  %v2698_v46 = vsel %vm5456_vm15, 0, %v2657_v12  ;;  %v3843_v62 = vunpack.c.l.b16 %v3781_v30  ;;  %v2795_v38 = vsel %vm1227_vm4, %v2611_v3, %v2711_v49 }
 0x38b   : > { %v2313_v63 = vadd.f32 %v7318_v52, %v2277_v60  ;;  %2772 = vrot.lane.b32.xlu2 %v2698_v46, %s5299_s25  ;;  %v3844_v16 = vunpack.c.l.b16 %v3782_v54  ;;  %v7606_v60 = vsel %vm831_vm8, %v7499_v10, %v2557_v4  ;;  %v2042_v46 = vpop.f32.mrf.mxu0  ;;  %v4430_v10 = vunpack.c.l.b16 %v4302_v36 }
 0x38c   : > { %v4303_v43 = vpack.c.bf16 %v1689_v28, %v1689_v28  ;;  %v2239_v21 = vpop.f32.mrf.mxu2  ;;  %8780 = vst [vmem:[#allocation55_spill] sm:$0xff] %v7606_v60  ;;  %v3533_v28 = vsel %vm5456_vm15, 4286578559, %v8782_v20  ;;  %v8784_v54 = vunpack.c.h.bf16 %v7452_v33 }
 0x38d   : > { %v2345_v13 = vmax.f32 %v2313_v63, 0.0  ;;  %v1581_v12 = vpop.f32.mrf.mxu3  ;;  %v2759_v56 = vpop.permute.xlu0 %2758  ;;  %v7615_v3 = vpack.c.b16 %v3844_v16, %v3843_v62  ;;  %v2440_v63 = vunpack.c.l.b16 %v2376_v32 }
 0x38e   : > { %v4431_v58 = vunpack.c.l.b16 %v4303_v43  ;;  %v1622_v29 = vadd.f32 %v1581_v12, %v8781_v53  ;;  %v2840_v14 = vsel %vm2832_vm11, %v2795_v38, %v2759_v56  ;;  %v2137_v45 = vpop.f32.mrf.mxu1  ;;  %v8783_v56 = vunpack.c.l.bf16 %v7452_v33 }
 0x38f   : > { %v2138_v49 = vadd.f32 %v2137_v45, %v2040_v34  ;;  %5169 = vmatmul.msk.bf16.gmra.mxu3 %vm2881_vm12, %v2840_v14  ;;  %5189 = vmatmul.msk.bf16.gmra.mxu0 %vm2881_vm12, %v2840_v14  ;;  %v2377_v30 = vpack.c.bf16 %v2345_v13, %v2345_v13  ;;  %v3966_v4 = vmax.f32 %v8784_v54, %v7509_v11  ;;  %v8601_v36 = vunpack.c.l.bf16 %v7615_v3  ;;  %v8787_v45 = vld [vmem:[#allocation52_spill] sm:$0xff] }
 0x390   : > { %5210 = vmatmul.msk.bf16.gmra.mxu1 %vm2881_vm12, %v2840_v14  ;;  %v3965_v53 = vmax.f32 %v8783_v56, %v7506_v1  ;;  %v8785_v43 = vpack.c.bf16 %v7482_v8, %v7478_v27  ;;  %v8600_v38 = vunpack.c.h.bf16 %v7615_v3  ;;  %v7630_v32 = vpack.c.b16 %v4431_v58, %v4430_v10 }
 0x391   : > { %v2278_v34 = vadd.f32 %v2237_v37, %v2138_v49  ;;  %v2441_v62 = vunpack.c.l.b16 %v2377_v30  ;;  %v1658_v13 = vadd.f32 %v7294_v51, %v1622_v29  ;;  %v3719_v8 = vunpack.c.l.bf16 %v3533_v28 }
 0x392   : > { %5229 = vmatmul.msk.bf16.gmra.mxu2 %vm543_vm7, %v8785_v43  ;;  %8786 = vst [vmem:[#allocation56_spill] sm:$0xff] %v7630_v32  ;;  %v7637_v33 = vmax.f32 %v3965_v53, %v8601_v36  ;;  %v7641_v27 = vmax.f32 %v3966_v4, %v8600_v38  ;;  %v3720_v11 = vunpack.c.h.bf16 %v3533_v28  ;;  %v8788_v30 = vshrl.u32 %v7563_v25, 16  ;;  %v2713_v4 = vpop.permute.xlu1 %2712  ;;  %v8789_v43 = vld [vmem:[#allocation35_spill] sm:$0xff] }
 0x393   : > { %v7633_v1 = vpack.c.b16 %v2441_v62, %v2440_v63  ;;  %v2314_v12 = vadd.f32 %v7318_v52, %v2278_v34  ;;  %v1690_v10 = vmax.f32 %v1658_v13, 0.0  ;;  %v2045_v54 = vpop.f32.mrf.mxu0  ;;  %v7662_v62 = vmax.f32 %v8789_v43, %v3719_v8 }
 0x394   : > { %v2242_v37 = vpop.f32.mrf.mxu2  ;;  %v2658_v28 = vor.u32 %v7576_v18, %v8788_v30  ;;  %v2612_v25 = vsel %vm5444_vm14, 0, %v7060_v50 }
 0x395   : > { %v1583_v16 = vpop.f32.mrf.mxu3  ;;  %2728 = vrot.lane.b32.xlu2 %v7633_v1, %s5298_s27  ;;  %v8602_v29 = vshrl.u32 %v7633_v1, 16  ;;  %v2563_v58 = vshll.u32 %v7633_v1, 16  ;;  %v2346_v18 = vmax.f32 %v2314_v12, 0.0  ;;  %v3783_v8 = vpack.c.bf16 %v7662_v62, %v7662_v62 }
 0x396   : > { %v1623_v20 = vadd.f32 %v1583_v16, %v8787_v45  ;;  %v2139_v49 = vpop.f32.mrf.mxu1  ;;  %v8790_v16 = vld [vmem:[#allocation36_spill] sm:$0xff]  ;;  %v4304_v43 = vpack.c.bf16 %v1690_v10, %v1690_v10 }
 0x397   : > { %v7656_v63 = vrot.slane %v8602_v29, 7  ;;  %v2140_v56 = vadd.f32 %v2139_v49, %v2042_v46  ;;  %v7658_v53 = vrot.slane %v2563_v58, 1  ;;  %v7665_v45 = vmax.f32 %v8790_v16, %v3720_v11  ;;  %v2761_v16 = vpop.permute.xlu2 %2760  ;;  %v8792_v10 = vld [vmem:[#allocation64_spill] sm:$0xff] }
 0x398   : > { %v1659_v34 = vadd.f32 %v7294_v51, %v1623_v20  ;;  %v2798_v20 = vsel %vm1227_vm4, %v2612_v25, %v2713_v4 }
 0x399   : > { %v2279_v13 = vadd.f32 %v2239_v21, %v2140_v56  ;;  %v2660_v46 = vsel %vm1046_vm10, %v2658_v28, %v7658_v53  ;;  %v3784_v11 = vpack.c.bf16 %v7665_v45, %v7665_v45  ;;  %v2565_v21 = vor.u32 %v2563_v58, %v7656_v63 }
 0x39a   : > { %v1691_v49 = vmax.f32 %v1659_v34, 0.0  ;;  %v2699_v30 = vsel %vm5456_vm15, 0, %v2660_v46  ;;  %v3845_v56 = vunpack.c.l.b16 %v3783_v8  ;;  %v2378_v46 = vpack.c.bf16 %v2346_v18, %v2346_v18 }
 0x39b   : > { %v2315_v50 = vadd.f32 %v7318_v52, %v2279_v13  ;;  %2774 = vrot.lane.b32.xlu1 %v2699_v30, %s5299_s25  ;;  %v3846_v34 = vunpack.c.l.b16 %v3784_v11  ;;  %v7684_v36 = vsel %vm831_vm8, %v7587_v57, %v2565_v21  ;;  %v2842_v30 = vsel %vm2832_vm11, %v2798_v20, %v2761_v16 }
 0x39c   : > { %v4305_v12 = vpack.c.bf16 %v1691_v49, %v1691_v49  ;;  %v2244_v28 = vpop.f32.mrf.mxu2  ;;  %8791 = vst [vmem:[#allocation6_spill] sm:$0xff] %v7684_v36  ;;  %v4432_v58 = vunpack.c.l.b16 %v4304_v43  ;;  %v8793_v8 = vunpack.c.l.bf16 %v7532_v26  ;;  %v8794_v20 = vunpack.c.h.bf16 %v7532_v26  ;;  %v8802_v36 = vld [vmem:[#allocation72_spill] sm:$0xff] }
 0x39d   : > { %v2347_v14 = vmax.f32 %v2315_v50, 0.0  ;;  %v1586_v38 = vpop.f32.mrf.mxu3  ;;  %v7688_v29 = vpack.c.b16 %v3846_v34, %v3845_v56  ;;  %v8795_v50 = vpack.c.bf16 %v7560_v35, %v7556_v31  ;;  %v8796_v31 = vld [vmem:[#allocation42_spill] sm:$0xff] }
 0x39e   : > { %v4433_v4 = vunpack.c.l.b16 %v4305_v12  ;;  %v1624_v25 = vadd.f32 %v1586_v38, %v8792_v10  ;;  %v2142_v13 = vpop.f32.mrf.mxu1  ;;  %v3967_v57 = vmax.f32 %v8793_v8, %v7579_v47  ;;  %v3968_v43 = vmax.f32 %v8794_v20, %v7583_v22  ;;  %v2047_v47 = vpop.f32.mrf.mxu0 }
 0x39f   : > { %v2143_v49 = vadd.f32 %v2142_v13, %v2045_v54  ;;  %5170 = vmatmul.msk.bf16.gmra.mxu3 %vm2881_vm12, %v2842_v30  ;;  %5190 = vmatmul.msk.bf16.gmra.mxu0 %vm2881_vm12, %v2842_v30  ;;  %v2379_v18 = vpack.c.bf16 %v2347_v14, %v2347_v14  ;;  %v8604_v38 = vunpack.c.l.bf16 %v7688_v29  ;;  %v8603_v11 = vunpack.c.h.bf16 %v7688_v29 }
 0x3a0   : > { %5211 = vmatmul.msk.bf16.gmra.mxu1 %vm2881_vm12, %v2842_v30  ;;  %v2442_v14 = vunpack.c.l.b16 %v2378_v46  ;;  %v7705_v12 = vpack.c.b16 %v4433_v4, %v4432_v58  ;;  %v1660_v56 = vadd.f32 %v7294_v51, %v1624_v25  ;;  %v3785_v35 = vpack.c.bf16 %v8796_v31, %v8796_v31  ;;  %v8797_v46 = vld [vmem:[#allocation43_spill] sm:$0xff] }
 0x3a1   : > { %v2280_v54 = vadd.f32 %v2242_v37, %v2143_v49  ;;  %v2443_v21 = vunpack.c.l.b16 %v2379_v18  ;;  %v7710_v34 = vmax.f32 %v3967_v57, %v8604_v38  ;;  %v7714_v26 = vmax.f32 %v3968_v43, %v8603_v11  ;;  %v8798_v49 = vld [vmem:[#allocation70_spill] sm:$0xff] }
 0x3a2   : > { %5230 = vmatmul.msk.bf16.gmra.mxu2 %vm543_vm7, %v8795_v50  ;;  %v3786_v4 = vpack.c.bf16 %v8797_v46, %v8797_v46  ;;  %v1692_v58 = vmax.f32 %v1660_v56, 0.0  ;;  %v8799_v43 = vshrl.u32 %v7633_v1, 16  ;;  %v3847_v16 = vunpack.c.l.b16 %v3785_v35 }
 0x3a3   : > { %v7716_v22 = vpack.c.b16 %v2443_v21, %v2442_v14  ;;  %v2316_v10 = vadd.f32 %v7318_v52, %v2280_v54  ;;  %v8800_v14 = vld [vmem:[#allocation39_spill] sm:$0xff] }
 0x3a4   : > { %v2247_v37 = vpop.f32.mrf.mxu2  ;;  %v2661_v54 = vor.u32 %v7658_v53, %v8799_v43  ;;  %v3455_v21 = vsel %vm5444_vm14, 4286578559, %v8800_v14 }
 0x3a5   : > { %v1588_v25 = vpop.f32.mrf.mxu3  ;;  %2730 = vrot.lane.b32.xlu1 %v7716_v22, %s5298_s27  ;;  %v8605_v13 = vshrl.u32 %v7716_v22, 16  ;;  %v2571_v30 = vshll.u32 %v7716_v22, 16 }
 0x3a6   : > { %v1625_v18 = vadd.f32 %v1588_v25, %v8798_v49  ;;  %v2144_v8 = vpop.f32.mrf.mxu1  ;;  %v3848_v25 = vunpack.c.l.b16 %v3786_v4  ;;  %v2348_v49 = vmax.f32 %v2316_v10, 0.0  ;;  %v2050_v4 = vpop.f32.mrf.mxu0  ;;  %v2613_v10 = vsel %vm5444_vm14, 0, %v7137_v5 }
 0x3a7   : > { %v7732_v57 = vrot.slane %v8605_v13, 7  ;;  %v2145_v20 = vadd.f32 %v2144_v8, %v2047_v47  ;;  %v7737_v50 = vrot.slane %v2571_v30, 1  ;;  %v2715_v47 = vpop.permute.xlu0 %2714  ;;  %v4306_v8 = vpack.c.bf16 %v1692_v58, %v1692_v58  ;;  %v8801_v13 = vld [vmem:[#allocation9_spill] sm:$0xff] }
 0x3a8   : > { %v1661_v56 = vadd.f32 %v7294_v51, %v1625_v18  ;;  %v3535_v35 = vsel %vm5456_vm15, 4286578559, %v8801_v13 }
 0x3a9   : > { %v2281_v11 = vadd.f32 %v2244_v28, %v2145_v20  ;;  %v2663_v38 = vsel %vm1046_vm10, %v2661_v54, %v7737_v50  ;;  %v2573_v43 = vor.u32 %v2571_v30, %v7732_v57  ;;  %v3563_v28 = vunpack.c.l.bf16 %v3455_v21 }
 0x3aa   : > { %v1693_v1 = vmax.f32 %v1661_v56, 0.0  ;;  %v2700_v53 = vsel %vm5456_vm15, 0, %v2663_v38  ;;  %v2801_v30 = vsel %vm1227_vm4, %v2613_v10, %v2715_v47  ;;  %v2380_v54 = vpack.c.bf16 %v2348_v49, %v2348_v49 }
 0x3ab   : > { %v2317_v18 = vadd.f32 %v7318_v52, %v2281_v11  ;;  %2776 = vrot.lane.b32.xlu0 %v2700_v53, %s5299_s25  ;;  %v7758_v38 = vsel %vm831_vm8, %v7656_v63, %v2573_v43  ;;  %v7761_v56 = vpack.c.b16 %v3848_v25, %v3847_v16  ;;  %v4434_v53 = vunpack.c.l.b16 %v4306_v8 }
 0x3ac   : > { %v4307_v58 = vpack.c.bf16 %v1693_v1, %v1693_v1  ;;  %v2249_v20 = vpop.f32.mrf.mxu2  ;;  %v3564_v16 = vunpack.c.h.bf16 %v3455_v21  ;;  %v8804_v8 = vunpack.c.h.bf16 %v7615_v3  ;;  %v8805_v10 = vpack.c.bf16 %v7641_v27, %v7637_v33  ;;  %v5282_v27 = vld [vmem:[%s5381_s24 + $0xc8] sm:$0xff] }
 0x3ad   : > { %v2349_v13 = vmax.f32 %v2317_v18, 0.0  ;;  %v1591_v14 = vpop.f32.mrf.mxu3  ;;  %v2763_v11 = vpop.permute.xlu1 %2762  ;;  %v3909_v49 = vunpack.c.l.bf16 %v7761_v56  ;;  %v3910_v47 = vunpack.c.h.bf16 %v7761_v56  ;;  %v2444_v21 = vunpack.c.l.b16 %v2380_v54 }
 0x3ae   : > { %v4435_v41 = vunpack.c.l.b16 %v4307_v58  ;;  %v1626_v60 = vadd.f32 %v1591_v14, %v8802_v36  ;;  %v2844_v5 = vsel %vm2832_vm11, %v2801_v30, %v2763_v11  ;;  %v2147_v1 = vpop.f32.mrf.mxu1  ;;  %v8803_v36 = vunpack.c.l.bf16 %v7615_v3 }
 0x3af   : > { %v2148_v32 = vadd.f32 %v2147_v1, %v2050_v4  ;;  %5171 = vmatmul.msk.bf16.gmra.mxu3 %vm2881_vm12, %v2844_v5  ;;  %5191 = vmatmul.msk.bf16.gmra.mxu0 %vm2881_vm12, %v2844_v5  ;;  %v2381_v63 = vpack.c.bf16 %v2349_v13, %v2349_v13  ;;  %v3970_v43 = vmax.f32 %v8804_v8, %v7665_v45  ;;  %v5281_v45 = vld [vmem:[%s5381_s24 + $0xc0] sm:$0xff] }
 0x3b0   : > { %5212 = vmatmul.msk.bf16.gmra.mxu1 %vm2881_vm12, %v2844_v5  ;;  %v3969_v25 = vmax.f32 %v8803_v36, %v7662_v62  ;;  %v7776_v18 = vpack.c.b16 %v4435_v41, %v4434_v53  ;;  %v1662_v30 = vadd.f32 %v7294_v51, %v1626_v60  ;;  %v3723_v41 = vunpack.c.l.bf16 %v3535_v35  ;;  %v2052_v5 = vpop.f32.mrf.mxu0 }
 0x3b1   : > { %v2282_v4 = vadd.f32 %v2247_v37, %v2148_v32  ;;  %v2445_v58 = vunpack.c.l.b16 %v2381_v63  ;;  %v7789_v3 = vmax.f32 %v3970_v43, %v3910_v47  ;;  %v3724_v32 = vunpack.c.h.bf16 %v3535_v35  ;;  %v8806_v35 = vld [vmem:[#allocation74_spill] sm:$0xff] }
 0x3b2   : > { %5231 = vmatmul.msk.bf16.gmra.mxu2 %vm543_vm7, %v8805_v10  ;;  %v7785_v13 = vmax.f32 %v3969_v25, %v3909_v49  ;;  %v3627_v33 = vmax.f32 %v3563_v28, %v5281_v45  ;;  %v3628_v37 = vmax.f32 %v3564_v16, %v5282_v27  ;;  %v1694_v1 = vmax.f32 %v1662_v30, 0.0 }
 0x3b3   : > { %v7791_v62 = vpack.c.b16 %v2445_v58, %v2444_v21  ;;  %v2318_v14 = vadd.f32 %v7318_v52, %v2282_v4  ;;  %v8807_v16 = vshrl.u32 %v7716_v22, 16  ;;  %v2717_v58 = vpop.permute.xlu2 %2716 }
 0x3b4   : > { %v7795_v54 = vpop.f32.mrf.mxu2  ;;  %v4095_v60 = vpack.c.bf16 %v7789_v3, %v7785_v13  ;;  %v7809_v10 = vmax.f32 %v3627_v33, %v3723_v41  ;;  %v7811_v21 = vmax.f32 %v3628_v37, %v3724_v32 }
 0x3b5   : > { %v1593_v11 = vpop.f32.mrf.mxu3  ;;  %2732 = vrot.lane.b32.xlu0 %v7791_v62, %s5298_s27  ;;  %v2579_v53 = vshll.u32 %v7791_v62, 16  ;;  %v2664_v25 = vor.u32 %v7737_v50, %v8807_v16  ;;  %v2576_v4 = vshrl.u32 %v7791_v62, 16  ;;  %v2350_v45 = vmax.f32 %v2318_v14, 0.0 }
 0x3b6   : > { %v1627_v63 = vadd.f32 %v1593_v11, %v8806_v35  ;;  %v2149_v28 = vpop.f32.mrf.mxu1  ;;  %v4308_v11 = vpack.c.bf16 %v1694_v1, %v1694_v1  ;;  %v3787_v41 = vpack.c.bf16 %v7809_v10, %v7809_v10 }
 0x3b7   : > { %v2150_v36 = vadd.f32 %v2149_v28, %v2052_v5  ;;  %v2665_v8 = vrot.slane %v2579_v53, 1  ;;  %v2578_v37 = vrot.slane %v2576_v4, 7  ;;  %v2382_v14 = vpack.c.bf16 %v2350_v45, %v2350_v45 }
 0x3b8   : > { %v1663_v43 = vadd.f32 %v7294_v51, %v1627_v63  ;;  %v2614_v51 = vsel %vm5444_vm14, 0, %v7213_v61  ;;  %v3849_v61 = vunpack.c.l.b16 %v3787_v41 }
 0x3b9   : > { %v2283_v30 = vadd.f32 %v2249_v20, %v2150_v36  ;;  %v2666_v27 = vsel %vm1046_vm10, %v2664_v25, %v2665_v8  ;;  %v3788_v20 = vpack.c.bf16 %v7811_v21, %v7811_v21  ;;  %v2804_v62 = vsel %vm1227_vm4, %v2614_v51, %v2717_v58 }
 0x3ba   : > { %v1695_v5 = vmax.f32 %v1663_v43, 0.0  ;;  %v2701_v22 = vsel %vm5456_vm15, 0, %v2666_v27  ;;  %v2581_v16 = vor.u32 %v2579_v53, %v2578_v37  ;;  %v8808_v58 = vunpack.c.l.bf16 %v7688_v29 }
 0x3bb   : > { %v2319_v50 = vadd.f32 %v7318_v52, %v2283_v30  ;;  %2778 = vrot.lane.b32.xlu2 %v2701_v22, %s5299_s25  ;;  %v3850_v63 = vunpack.c.l.b16 %v3788_v20  ;;  %v4436_v52 = vunpack.c.l.b16 %v4308_v11  ;;  %v8809_v30 = vld [vmem:[#allocation15_spill] sm:$0xff]  ;;  %v8810_v53 = vunpack.c.h.bf16 %v7688_v29 }
 0x3bc   : > { %v4309_v32 = vpack.c.bf16 %v1695_v5, %v1695_v5  ;;  %v7826_v33 = vpop.f32.mrf.mxu2  ;;  %v3971_v45 = vmax.f32 %v8808_v58, %v8796_v31  ;;  %v3536_v27 = vsel %vm5456_vm15, 4286578559, %v8809_v30  ;;  %v7847_v22 = vsel %vm831_vm8, %v7732_v57, %v2581_v16  ;;  %v7871_v16 = vpop.f32.mrf.mxu0 }
 0x3bd   : > { %v2351_v1 = vmax.f32 %v2319_v50, 0.0  ;;  %v2765_v35 = vpop.permute.xlu0 %2764  ;;  %v7831_v43 = vpack.c.b16 %v3850_v63, %v3849_v61  ;;  %v3972_v11 = vmax.f32 %v8810_v53, %v8797_v46  ;;  %v8811_v51 = vpack.c.bf16 %v7714_v26, %v7710_v34 }
 0x3be   : > { %v4437_v28 = vunpack.c.l.b16 %v4309_v32  ;;  %v2846_v36 = vsel %vm2832_vm11, %v2804_v62, %v2765_v35  ;;  %v2446_v31 = vunpack.c.l.b16 %v2382_v14  ;;  %v3725_v62 = vunpack.c.l.bf16 %v3536_v27 }
 0x3bf   : > { %5172 = vmatmul.msk.bf16.gmra.mxu3 %vm2881_vm12, %v2846_v36  ;;  %5192 = vmatmul.msk.bf16.gmra.mxu0 %vm2881_vm12, %v2846_v36  ;;  %v2383_v25 = vpack.c.bf16 %v2351_v1, %v2351_v1  ;;  %v3911_v41 = vunpack.c.l.bf16 %v7831_v43  ;;  %v3912_v20 = vunpack.c.h.bf16 %v7831_v43  ;;  %v3726_v32 = vunpack.c.h.bf16 %v3536_v27  ;;  %v8820_v43 = vld [vmem:[#allocation69_spill] sm:$0xff] }
 0x3c0   : > { %5213 = vmatmul.msk.bf16.gmra.mxu1 %vm2881_vm12, %v2846_v36  ;;  %v7843_v5 = vpack.c.b16 %v4437_v28, %v4436_v52  ;;  %v2667_v35 = vor.u32 %v2665_v8, %v2576_v4  ;;  %v8812_v52 = vld [vmem:[#allocation10_spill] sm:$0xff]  ;;  %v2719_v36 = vpop.permute.xlu1 %2718  ;;  %v2615_v8 = vsel %vm5444_vm14, 0, %v7285_v59 }
 0x3c1   : > { %v2447_v50 = vunpack.c.l.b16 %v2383_v25  ;;  %v7857_v46 = vmax.f32 %v3971_v45, %v3911_v41  ;;  %v7861_v57 = vmax.f32 %v3972_v11, %v3912_v20  ;;  %v7869_v28 = vmax.f32 %v8812_v52, %v3725_v62  ;;  %v8813_v25 = vld [vmem:[#allocation11_spill] sm:$0xff] }
 0x3c2   : > { %5232 = vmatmul.msk.bf16.gmra.mxu2 %vm543_vm7, %v8811_v51  ;;  %v7874_v58 = vmax.f32 %v8813_v25, %v3726_v32  ;;  %v2807_v51 = vsel %vm1227_vm4, %v2615_v8, %v2719_v36 }
 0x3c3   : > { %v2463_v29 = vpack.c.b16 %v2447_v50, %v2446_v31  ;;  %v4096_v1 = vpack.c.bf16 %v7861_v57, %v7857_v46  ;;  %v3789_v27 = vpack.c.bf16 %v7869_v28, %v7869_v28  ;;  %v7976_v46 = vld [vmem:[%s8529_s10] ss:$0 sm:$0xff] }
 0x3c4   : > { %v7863_v34 = vpop.f32.mrf.mxu2  ;;  %v3790_v53 = vpack.c.bf16 %v7874_v58, %v7874_v58  ;;  %v7916_v36 = vpop.f32.mrf.mxu0 }
 0x3c5   : > { %2734 = vrot.lane.b32.xlu2 %v2463_v29, %s5298_s27  ;;  %v2587_v26 = vshll.u32 %v2463_v29, 16  ;;  %v2584_v14 = vshrl.u32 %v2463_v29, 16  ;;  %v3851_v62 = vunpack.c.l.b16 %v3789_v27 }
 0x3c6   : > { %v3852_v59 = vunpack.c.l.b16 %v3790_v53 }
 0x3c7   : > { %v2668_v61 = vrot.slane %v2587_v26, 1  ;;  %v2586_v63 = vrot.slane %v2584_v14, 7 }
 0x3c9   : > { %v2669_v45 = vsel %vm1046_vm10, %v2667_v35, %v2668_v61  ;;  %v2670_v30 = vor.u32 %v2668_v61, %v2584_v14  ;;  %v2589_v11 = vor.u32 %v2587_v26, %v2586_v63  ;;  %v2767_v35 = vpop.permute.xlu2 %2766  ;;  %v7899_v61 = vpack.c.b16 %v3852_v59, %v3851_v62 }
 0x3ca   : > { %v2702_v4 = vsel %vm5456_vm15, 0, %v2669_v45  ;;  %v2848_v26 = vsel %vm2832_vm11, %v2807_v51, %v2767_v35  ;;  %v3973_v63 = vmax.f32 %v3909_v49, %v7809_v10  ;;  %v7931_v10 = vld [vmem:[%s8523_s4] ss:$0 sm:$0xff]  ;;  %v2721_v45 = vpop.permute.xlu0 %2720 }
 0x3cb   : > { %2780 = vrot.lane.b32.xlu1 %v2702_v4, %s5299_s25  ;;  %v2687_v50 = vsel %vm6334_vm6, %v2670_v30, 0  ;;  %v7893_v14 = vsel %vm831_vm8, %v2578_v37, %v2589_v11  ;;  %v3974_v37 = vmax.f32 %v3910_v47, %v7811_v21  ;;  %v3914_v52 = vunpack.c.h.bf16 %v7899_v61  ;;  %v8815_v47 = vld [vmem:[#allocation76_spill] sm:$0xff] }
 0x3cc   : > { %v4173_v29 = vpop.f32.mrf.mxu2  ;;  %v2703_v32 = vsel %vm5456_vm15, 0, %v2687_v50  ;;  %v4169_v21 = vadd.f32 %v7931_v10, %v7826_v33 }
 0x3cd   : > { %4456 = vrot.lane.b32.xlu2 %v6849_v17, %s5298_s27  ;;  %2782 = vrot.lane.b32.xlu0 %v2703_v32, %s5299_s25  ;;  %v3913_v17 = vunpack.c.l.bf16 %v7899_v61  ;;  %v7924_v56 = vmax.f32 %v3974_v37, %v3914_v52  ;;  %v4174_v11 = vadd.f32 %v7931_v10, %v4173_v29 }
 0x3ce   : > { %v4247_v8 = vmax.f32 %v4169_v21, 0.0 }
 0x3cf   : > { %5173 = vmatmul.msk.bf16.gmra.mxu3 %vm2881_vm12, %v2848_v26  ;;  %5193 = vmatmul.msk.bf16.gmra.mxu0 %vm2881_vm12, %v2848_v26  ;;  %v7920_v49 = vmax.f32 %v3973_v63, %v3913_v17  ;;  %v4249_v29 = vmax.f32 %v4174_v11, 0.0 }
 0x3d0   : > { %5214 = vmatmul.msk.bf16.gmra.mxu1 %vm2881_vm12, %v2848_v26  ;;  %v4343_v50 = vpack.c.bf16 %v4247_v8, %v4247_v8 }
 0x3d1   : > { %v4097_v3 = vpack.c.bf16 %v7924_v56, %v7920_v49  ;;  %v4345_v57 = vpack.c.bf16 %v4249_v29, %v4249_v29 }
 0x3d2   : > { %5233 = vmatmul.msk.bf16.gmra.mxu2 %vm543_vm7, %v4095_v60  ;;  %v4167_v60 = vadd.f32 %v7931_v10, %v7795_v54  ;;  %v4631_v37 = vunpack.c.l.b16 %v4343_v50 }
 0x3d3   : > { %4454 = vrot.lane.b32.xlu1 %v8815_v47, %s5298_s27 }
 0x3d4   : > { %v4176_v13 = vpop.f32.mrf.mxu2  ;;  %v4246_v30 = vmax.f32 %v4167_v60, 0.0 }
 0x3d5   : > { %4462 = vrot.lane.b32.xlu2 %v7005_v9, %s5298_s27  ;;  %4458 = vrot.lane.b32.xlu0 %v6895_v23, %s5298_s27  ;;  %v4177_v25 = vadd.f32 %v7931_v10, %v4176_v13  ;;  %v2616_v9 = vsel %vm5444_vm14, 0, %v7385_v48  ;;  %v4172_v48 = vadd.f32 %v7931_v10, %v7863_v34 }
 0x3d6   : > { %v2810_v54 = vsel %vm1227_vm4, %v2616_v9, %v2721_v45  ;;  %v4342_v31 = vpack.c.bf16 %v4246_v30, %v4246_v30  ;;  %v2723_v45 = vpop.permute.xlu2 %2722 }
 0x3d7   : > { %v4250_v4 = vmax.f32 %v4177_v25, 0.0  ;;  %v3135_v62 = vpop.f32.mrf.mxu1  ;;  %v4248_v34 = vmax.f32 %v4172_v48, 0.0 }
 0x3d8   : > { %v4630_v35 = vunpack.c.l.b16 %v4342_v31 }
 0x3da   : > { %v4662_v25 = vpack.c.b16 %v4631_v37, %v4630_v35 }
 0x3db   : > { %4460 = vrot.lane.b32.xlu1 %v6939_v15, %s5298_s27 }
 0x3dc   : > { %v7949_v27 = vpop.f32.mrf.mxu0  ;;  %v4178_v23 = vpop.f32.mrf.mxu2 }
 0x3dd   : > { %v4179_v33 = vadd.f32 %v7931_v10, %v4178_v23  ;;  %v2769_v53 = vpop.permute.xlu1 %2768  ;;  %4468 = vrot.lane.b32.xlu2 %v7219_v42, %s5298_s27  ;;  %4464 = vrot.lane.b32.xlu0 %v7073_v7, %s5298_s27  ;;  %v4346_v42 = vpack.c.bf16 %v4250_v4, %v4250_v4  ;;  %v4633_v23 = vunpack.c.l.b16 %v4345_v57 }
 0x3de   : > { %v2850_v15 = vsel %vm2832_vm11, %v2810_v54, %v2769_v53 }
 0x3df   : > { %v4251_v51 = vmax.f32 %v4179_v33, 0.0  ;;  %5174 = vmatmul.msk.bf16.gmra.mxu3 %vm2881_vm12, %v2850_v15  ;;  %5194 = vmatmul.msk.bf16.gmra.mxu0 %vm2881_vm12, %v2850_v15  ;;  %v4634_v47 = vunpack.c.l.b16 %v4346_v42  ;;  %v3137_v8 = vpop.f32.mrf.mxu1 }
 0x3e0   : > { %5215 = vmatmul.msk.bf16.gmra.mxu1 %vm2881_vm12, %v2850_v15 }
 0x3e1   : > { %v4347_v32 = vpack.c.bf16 %v4251_v51, %v4251_v51 }
 0x3e2   : > { %5234 = vmatmul.msk.bf16.gmra.mxu2 %vm543_vm7, %v4096_v1  ;;  %v2927_v7 = vpop.f32.mrf.mxu3 }
 0x3e3   : > { %v3031_v59 = vadd.f32 %v7871_v16, %v2927_v7  ;;  %4466 = vrot.lane.b32.xlu1 %v7157_v39, %s5298_s27  ;;  %v4635_v13 = vunpack.c.l.b16 %v4347_v32  ;;  %v4344_v39 = vpack.c.bf16 %v4248_v34, %v4248_v34 }
 0x3e4   : > { %v7971_v26 = vpop.f32.mrf.mxu0  ;;  %v4181_v63 = vpop.f32.mrf.mxu2 }
 0x3e5   : > { %v3215_v60 = vadd.f32 %v3135_v62, %v3031_v59  ;;  %4474 = vrot.lane.b32.xlu2 %v7474_v44, %s5298_s27  ;;  %4470 = vrot.lane.b32.xlu0 %v7305_v55, %s5298_s27  ;;  %v4182_v1 = vadd.f32 %v7931_v10, %v4181_v63  ;;  %v4664_v21 = vpack.c.b16 %v4635_v13, %v4634_v47  ;;  %v4632_v9 = vunpack.c.l.b16 %v4344_v39  ;;  %v8816_v59 = vld [vmem:[#allocation37_spill] sm:$0xff] }
 0x3e6   : > { %v2617_v55 = vsel %vm5444_vm14, 0, %v7449_v40  ;;  %v3537_v35 = vsel %vm5456_vm15, 4286578559, %v8816_v59 }
 0x3e7   : > { %v3251_v16 = vadd.f32 %v7976_v46, %v3215_v60  ;;  %v4252_v44 = vmax.f32 %v4182_v1, 0.0  ;;  %v2813_v53 = vsel %vm1227_vm4, %v2617_v55, %v2723_v45  ;;  %v4663_v31 = vpack.c.b16 %v4633_v23, %v4632_v9  ;;  %v2725_v6 = vpop.permute.xlu1 %2724  ;;  %v8818_v45 = vld [vmem:[#allocation16_spill] sm:$0xff]  ;;  %v8819_v9 = vld [vmem:[#allocation17_spill] sm:$0xff]  ;;  %v2773_v55 = vpop.permute.xlu2 %2772 }
 0x3e9   : > { %v3283_v15 = vmax.f32 %v3251_v16, 0.0  ;;  %v4348_v50 = vpack.c.bf16 %v4252_v44, %v4252_v44  ;;  %v2618_v16 = vsel %vm5444_vm14, 0, %v7528_v24 }
 0x3ea   : > { %v2929_v30 = vpop.f32.mrf.mxu3 }
 0x3eb   : > { %v3033_v54 = vadd.f32 %v7916_v36, %v2929_v30  ;;  %4472 = vrot.lane.b32.xlu1 %v7395_v2, %s5298_s27  ;;  %v4310_v42 = vpack.c.bf16 %v3283_v15, %v3283_v15  ;;  %v4636_v63 = vunpack.c.l.b16 %v4348_v50 }
 0x3ec   : > { %v7990_v4 = vpop.f32.mrf.mxu0  ;;  %v4183_v33 = vpop.f32.mrf.mxu2 }
 0x3ed   : > { %v3216_v48 = vadd.f32 %v3137_v8, %v3033_v54  ;;  %v4184_v11 = vadd.f32 %v7931_v10, %v4183_v33  ;;  %4682 = vrot.lane.b32.xlu2 %v4664_v21, %s5301_s16  ;;  %4678 = vrot.lane.b32.xlu0 %v4662_v25, %s5301_s16  ;;  %v2771_v2 = vpop.permute.xlu0 %2770  ;;  %v4518_v49 = vunpack.c.l.b16 %v4310_v42  ;;  %v2816_v25 = vsel %vm1227_vm4, %v2618_v16, %v2725_v6  ;;  %v8822_v16 = vld [vmem:[#allocation55_spill] sm:$0xff] }
 0x3ee   : > { %v2852_v36 = vsel %vm2832_vm11, %v2813_v53, %v2771_v2 }
 0x3ef   : > { %v3252_v40 = vadd.f32 %v7976_v46, %v3216_v48  ;;  %v4253_v51 = vmax.f32 %v4184_v11, 0.0  ;;  %5175 = vmatmul.msk.bf16.gmra.mxu3 %vm2881_vm12, %v2852_v36  ;;  %5195 = vmatmul.msk.bf16.gmra.mxu0 %vm2881_vm12, %v2852_v36  ;;  %v2854_v48 = vsel %vm2832_vm11, %v2816_v25, %v2773_v55 }
 0x3f0   : > { %5216 = vmatmul.msk.bf16.gmra.mxu1 %vm2881_vm12, %v2852_v36 }
 0x3f1   : > { %v3284_v62 = vmax.f32 %v3252_v40, 0.0  ;;  %v4349_v32 = vpack.c.bf16 %v4253_v51, %v4253_v51 }
 0x3f2   : > { %5235 = vmatmul.msk.bf16.gmra.mxu2 %vm543_vm7, %v4097_v3  ;;  %v2932_v7 = vpop.f32.mrf.mxu3  ;;  %v3727_v3 = vunpack.c.l.bf16 %v3537_v35 }
 0x3f3   : > { %v3036_v34 = vadd.f32 %v7949_v27, %v2932_v7  ;;  %4680 = vrot.lane.b32.xlu1 %v4663_v31, %s5301_s16  ;;  %v4311_v29 = vpack.c.bf16 %v3284_v62, %v3284_v62  ;;  %v4637_v13 = vunpack.c.l.b16 %v4349_v32  ;;  %v3728_v27 = vunpack.c.h.bf16 %v3537_v35 }
 0x3f4   : > { %v8010_v37 = vpop.f32.mrf.mxu0  ;;  %v8027_v30 = vmax.f32 %v8818_v45, %v3727_v3  ;;  %v3975_v35 = vmax.f32 %v3911_v41, %v7869_v28 }
 0x3f5   : > { %v4186_v47 = vpop.f32.mrf.mxu2  ;;  %4480 = vrot.lane.b32.xlu2 %v7705_v12, %s5298_s27  ;;  %4476 = vrot.lane.b32.xlu0 %v7552_v19, %s5298_s27  ;;  %v4519_v56 = vunpack.c.l.b16 %v4311_v29  ;;  %v4665_v1 = vpack.c.b16 %v4637_v13, %v4636_v63  ;;  %v8817_v19 = vld [vmem:[#allocation56_spill] sm:$0xff]  ;;  %v8030_v23 = vmax.f32 %v8819_v9, %v3728_v27  ;;  %v3976_v63 = vmax.f32 %v3912_v20, %v7874_v58  ;;  %v8821_v58 = vld [vmem:[#allocation38_spill] sm:$0xff] }
 0x3f6   : > { %v4187_v60 = vadd.f32 %v7931_v10, %v4186_v47  ;;  %v3793_v20 = vpack.c.bf16 %v8820_v43, %v8820_v43 }
 0x3f7   : > { %v8017_v39 = vpack.c.b16 %v4519_v56, %v4518_v49  ;;  %v3792_v53 = vpack.c.bf16 %v8030_v23, %v8030_v23  ;;  %v2727_v3 = vpop.permute.xlu0 %2726 }
 0x3f8   : > { %v4254_v57 = vmax.f32 %v4187_v60, 0.0  ;;  %v4015_v45 = vunpack.c.l.b16 %v3793_v20 }
 0x3f9   : > { %v3854_v36 = vunpack.c.l.b16 %v3792_v53 }
 0x3fa   : > { %v2934_v21 = vpop.f32.mrf.mxu3  ;;  %v4350_v44 = vpack.c.bf16 %v4254_v57, %v4254_v57 }
 0x3fb   : > { %v3038_v12 = vadd.f32 %v7971_v26, %v2934_v21  ;;  %4478 = vrot.lane.b32.xlu1 %v8817_v19, %s5298_s27  ;;  %v3791_v26 = vpack.c.bf16 %v8027_v30, %v8027_v30  ;;  %v2619_v21 = vsel %vm5444_vm14, 0, %v8822_v16 }
 0x3fc   : > { %v8032_v8 = vpop.f32.mrf.mxu0  ;;  %v4638_v40 = vunpack.c.l.b16 %v4350_v44 }
 0x3fd   : > { %v4188_v54 = vpop.f32.mrf.mxu2  ;;  %v3140_v24 = vpop.f32.mrf.mxu1  ;;  %4684 = vrot.lane.b32.xlu0 %v4665_v1, %s5301_s16  ;;  %v3853_v2 = vunpack.c.l.b16 %v3791_v26 }
 0x3fe   : > { %v4189_v33 = vadd.f32 %v7931_v10, %v4188_v54  ;;  %v3217_v15 = vadd.f32 %v3140_v24, %v3036_v34  ;;  %v2819_v54 = vsel %vm1227_vm4, %v2619_v21, %v2727_v3 }
 0x3ff   : > { %5176 = vmatmul.msk.bf16.gmra.mxu3 %vm2881_vm12, %v2854_v48  ;;  %5196 = vmatmul.msk.bf16.gmra.mxu0 %vm2881_vm12, %v2854_v48  ;;  %v8044_v31 = vpack.c.b16 %v3854_v36, %v3853_v2 }
 0x400   : > { %v4255_v11 = vmax.f32 %v4189_v33, 0.0  ;;  %5217 = vmatmul.msk.bf16.gmra.mxu1 %vm2881_vm12, %v2854_v48  ;;  %v3253_v50 = vadd.f32 %v7976_v46, %v3217_v15 }
 0x401   : > { %v3915_v7 = vunpack.c.l.bf16 %v8044_v31  ;;  %v3916_v34 = vunpack.c.h.bf16 %v8044_v31  ;;  %v2621_v31 = vsel %vm5444_vm14, 0, %v7758_v38 }
 0x402   : > { %v4351_v51 = vpack.c.bf16 %v4255_v11, %v4255_v11  ;;  %v2937_v42 = vpop.f32.mrf.mxu3  ;;  %v3285_v13 = vmax.f32 %v3253_v50, 0.0  ;;  %v3977_v50 = vmax.f32 %v3913_v17, %v8027_v30 }
 0x403   : > { %v3041_v32 = vadd.f32 %v7990_v4, %v2937_v42  ;;  %v4079_v49 = vmax.f32 %v3975_v35, %v3915_v7  ;;  %v4080_v56 = vmax.f32 %v3976_v63, %v3916_v34  ;;  %v3978_v42 = vmax.f32 %v3914_v52, %v8030_v23  ;;  %v8823_v52 = vld [vmem:[#allocation6_spill] sm:$0xff] }
 0x404   : > { %v4639_v62 = vunpack.c.l.b16 %v4351_v51  ;;  %v8050_v29 = vpop.f32.mrf.mxu0  ;;  %v4312_v27 = vpack.c.bf16 %v3285_v13, %v3285_v13  ;;  %v2620_v23 = vsel %vm5444_vm14, 0, %v8823_v52 }
 0x405   : > { %v4191_v59 = vpop.f32.mrf.mxu2  ;;  %v3142_v47 = vpop.f32.mrf.mxu1  ;;  %4482 = vrot.lane.b32.xlu0 %v7776_v18, %s5298_s27  ;;  %v4098_v28 = vpack.c.bf16 %v4080_v56, %v4079_v49  ;;  %v3794_v18 = vpack.c.bf16 %v8821_v58, %v8821_v58 }
 0x406   : > { %v4666_v4 = vpack.c.b16 %v4639_v62, %v4638_v40  ;;  %v3218_v60 = vadd.f32 %v3142_v47, %v3038_v12  ;;  %v4520_v24 = vunpack.c.l.b16 %v4312_v27  ;;  %v4192_v2 = vadd.f32 %v7931_v10, %v4191_v59  ;;  %v2729_v56 = vpop.permute.xlu2 %2728 }
 0x407   : > { %5236 = vmatmul.msk.bf16.gmra.mxu2 %vm543_vm7, %v4098_v28  ;;  %v4016_v9 = vunpack.c.l.b16 %v3794_v18 }
 0x408   : > { %4686 = vrot.lane.b32.xlu1 %v4666_v4, %s5301_s16  ;;  %v3254_v41 = vadd.f32 %v7976_v46, %v3218_v60  ;;  %v4256_v4 = vmax.f32 %v4192_v2, 0.0 }
 0x409   : > { %v4017_v11 = vpack.c.b16 %v4016_v9, %v4015_v45 }
 0x40a   : > { %v3286_v6 = vmax.f32 %v3254_v41, 0.0  ;;  %v2939_v57 = vpop.f32.mrf.mxu3  ;;  %v4352_v30 = vpack.c.bf16 %v4256_v4, %v4256_v4 }
 0x40b   : > { %v3043_v1 = vadd.f32 %v8010_v37, %v2939_v57  ;;  %v4051_v62 = vunpack.c.l.bf16 %v4017_v11  ;;  %v4052_v35 = vunpack.c.h.bf16 %v4017_v11  ;;  %v3980_v11 = vmax.f32 %v3916_v34, %v8821_v58 }
 0x40c   : > { %v4313_v25 = vpack.c.bf16 %v3286_v6, %v3286_v6  ;;  %v8075_v12 = vpop.f32.mrf.mxu0  ;;  %v2822_v6 = vsel %vm1227_vm4, %v2620_v23, %v2729_v56 }
 0x40d   : > { %v4193_v19 = vpop.f32.mrf.mxu2  ;;  %v3145_v55 = vpop.f32.mrf.mxu1  ;;  %v4081_v47 = vmax.f32 %v3977_v50, %v4051_v62 }
 0x40e   : > { %v2775_v44 = vpop.permute.xlu1 %2774  ;;  %v4521_v33 = vunpack.c.l.b16 %v4313_v25  ;;  %v3219_v26 = vadd.f32 %v3145_v55, %v3041_v32  ;;  %v4194_v36 = vadd.f32 %v7931_v10, %v4193_v19 }
 0x40f   : > { %v2856_v53 = vsel %vm2832_vm11, %v2819_v54, %v2775_v44 }
 0x410   : > { %4484 = vrot.lane.b32.xlu1 %v7843_v5, %s5298_s27  ;;  %5177 = vmatmul.msk.bf16.gmra.mxu3 %vm2881_vm12, %v2856_v53  ;;  %v8084_v37 = vpack.c.b16 %v4521_v33, %v4520_v24  ;;  %v3255_v15 = vadd.f32 %v7976_v46, %v3219_v26  ;;  %v4257_v13 = vmax.f32 %v4194_v36, 0.0 }
 0x411   : > { %5197 = vmatmul.msk.bf16.gmra.mxu0 %vm2881_vm12, %v2856_v53  ;;  %5218 = vmatmul.msk.bf16.gmra.mxu1 %vm2881_vm12, %v2856_v53 }
 0x412   : > { %v2942_v48 = vpop.f32.mrf.mxu3  ;;  %v3287_v63 = vmax.f32 %v3255_v15, 0.0  ;;  %v4353_v20 = vpack.c.bf16 %v4257_v13, %v4257_v13 }
 0x413   : > { %v3046_v40 = vadd.f32 %v8032_v8, %v2942_v48  ;;  %v4082_v8 = vmax.f32 %v3978_v42, %v4052_v35  ;;  %v3979_v48 = vmax.f32 %v3915_v7, %v8820_v43 }
 0x414   : > { %v8090_v51 = vpop.f32.mrf.mxu0  ;;  %v4314_v41 = vpack.c.bf16 %v3287_v63, %v3287_v63  ;;  %v4641_v45 = vunpack.c.l.b16 %v4353_v20 }
 0x415   : > { %v4196_v5 = vpop.f32.mrf.mxu2  ;;  %v3147_v32 = vpop.f32.mrf.mxu1  ;;  %v4099_v49 = vpack.c.bf16 %v4082_v8, %v4081_v47 }
 0x416   : > { %v3220_v59 = vadd.f32 %v3147_v32, %v3043_v1  ;;  %v4522_v16 = vunpack.c.l.b16 %v4314_v41  ;;  %v4197_v44 = vadd.f32 %v7931_v10, %v4196_v5  ;;  %v8824_v5 = vld [vmem:[#allocation2_spill] sm:$0xff]  ;;  %v2779_v56 = vpop.permute.xlu2 %2778 }
 0x417   : > { %5237 = vmatmul.msk.bf16.gmra.mxu2 %vm543_vm7, %v4099_v49  ;;  %v4083_v50 = vmax.f32 %v3979_v48, %v8824_v5  ;;  %v2731_v35 = vpop.permute.xlu1 %2730 }
 0x418   : > { %v3256_v60 = vadd.f32 %v7976_v46, %v3220_v59  ;;  %v4258_v62 = vmax.f32 %v4197_v44, 0.0  ;;  %v2825_v47 = vsel %vm1227_vm4, %v2621_v31, %v2731_v35 }
 0x41a   : > { %v3288_v28 = vmax.f32 %v3256_v60, 0.0  ;;  %v2944_v17 = vpop.f32.mrf.mxu3  ;;  %v4354_v58 = vpack.c.bf16 %v4258_v62, %v4258_v62 }
 0x41b   : > { %v3048_v61 = vadd.f32 %v8050_v29, %v2944_v17  ;;  %v4640_v29 = vunpack.c.l.b16 %v4352_v30  ;;  %v2860_v30 = vsel %vm2832_vm11, %v2825_v47, %v2779_v56 }
 0x41c   : > { %v4315_v18 = vpack.c.bf16 %v3288_v28, %v3288_v28  ;;  %v8104_v3 = vpop.f32.mrf.mxu0  ;;  %v4642_v20 = vunpack.c.l.b16 %v4354_v58 }
 0x41d   : > { %v4198_v27 = vpop.f32.mrf.mxu2  ;;  %v3150_v57 = vpop.f32.mrf.mxu1  ;;  %v4667_v26 = vpack.c.b16 %v4641_v45, %v4640_v29 }
 0x41e   : > { %v2777_v1 = vpop.permute.xlu0 %2776  ;;  %v4523_v21 = vunpack.c.l.b16 %v4315_v18  ;;  %v3221_v25 = vadd.f32 %v3150_v57, %v3046_v40  ;;  %v4199_v24 = vadd.f32 %v7931_v10, %v4198_v27 }
 0x41f   : > { %v2858_v19 = vsel %vm2832_vm11, %v2822_v6, %v2777_v1  ;;  %4688 = vrot.lane.b32.xlu2 %v4667_v26, %s5301_s16 }
 0x420   : > { %5178 = vmatmul.msk.bf16.gmra.mxu3 %vm2881_vm12, %v2858_v19  ;;  %v8111_v9 = vpack.c.b16 %v4523_v21, %v4522_v16  ;;  %v3257_v54 = vadd.f32 %v7976_v46, %v3221_v25  ;;  %v4259_v32 = vmax.f32 %v4199_v24, 0.0 }
 0x421   : > { %5198 = vmatmul.msk.bf16.gmra.mxu0 %vm2881_vm12, %v2858_v19  ;;  %5219 = vmatmul.msk.bf16.gmra.mxu1 %vm2881_vm12, %v2858_v19 }
 0x422   : > { %v2947_v55 = vpop.f32.mrf.mxu3  ;;  %v3289_v36 = vmax.f32 %v3257_v54, 0.0  ;;  %v4355_v4 = vpack.c.bf16 %v4259_v32, %v4259_v32 }
 0x423   : > { %v3051_v33 = vadd.f32 %v8075_v12, %v2947_v55  ;;  %v8825_v12 = vld [vmem:[#allocation5_spill] sm:$0xff] }
 0x424   : > { %v8117_v53 = vpop.f32.mrf.mxu0  ;;  %v4084_v42 = vmax.f32 %v3980_v11, %v8825_v12  ;;  %v4316_v7 = vpack.c.bf16 %v3289_v36, %v3289_v36  ;;  %v2622_v11 = vsel %vm5444_vm14, 0, %v7847_v22 }
 0x425   : > { %v4201_v15 = vpop.f32.mrf.mxu2  ;;  %v3152_v2 = vpop.f32.mrf.mxu1 }
 0x426   : > { %v3222_v40 = vadd.f32 %v3152_v2, %v3048_v61  ;;  %v4100_v59 = vpack.c.bf16 %v4084_v42, %v4083_v50  ;;  %v4524_v28 = vunpack.c.l.b16 %v4316_v7  ;;  %v4643_v61 = vunpack.c.l.b16 %v4355_v4 }
 0x427   : > { %v4202_v18 = vadd.f32 %v7931_v10, %v4201_v15  ;;  %v2733_v44 = vpop.permute.xlu0 %2732 }
 0x428   : > { %v3258_v63 = vadd.f32 %v7976_v46, %v3222_v40  ;;  %5238 = vmatmul.msk.bf16.gmra.mxu2 %vm543_vm7, %v4100_v59  ;;  %v4668_v6 = vpack.c.b16 %v4643_v61, %v4642_v20  ;;  %v2828_v5 = vsel %vm1227_vm4, %v2622_v11, %v2733_v44  ;;  %v2623_v20 = vsel %vm5444_vm14, 0, %v7893_v14 }
 0x429   : > { %v4260_v29 = vmax.f32 %v4202_v18, 0.0  ;;  %vm4918_vm7 = vcmask 257024  }
 0x42a   : > { %v3290_v34 = vmax.f32 %v3258_v63, 0.0  ;;  %v2949_v43 = vpop.f32.mrf.mxu3  ;;  %4690 = vrot.lane.b32.xlu0 %v4668_v6, %s5301_s16 }
 0x42b   : > { %v3053_v13 = vadd.f32 %v8090_v51, %v2949_v43  ;;  %v4356_v15 = vpack.c.bf16 %v4260_v29, %v4260_v29 }
 0x42c   : > { %v4317_v8 = vpack.c.bf16 %v3290_v34, %v3290_v34  ;;  %v8135_v60 = vpop.f32.mrf.mxu0 }
 0x42d   : > { %v4203_v49 = vpop.f32.mrf.mxu2  ;;  %v3155_v41 = vpop.f32.mrf.mxu1  ;;  %v4644_v59 = vunpack.c.l.b16 %v4356_v15 }
 0x42e   : > { %v4525_v17 = vunpack.c.l.b16 %v4317_v8  ;;  %v3223_v38 = vadd.f32 %v3155_v41, %v3051_v33  ;;  %v4204_v27 = vadd.f32 %v7931_v10, %v4203_v49 }
 0x430   : > { %5179 = vmatmul.msk.bf16.gmra.mxu3 %vm2881_vm12, %v2860_v30  ;;  %v8141_v51 = vpack.c.b16 %v4525_v17, %v4524_v28  ;;  %v3259_v52 = vadd.f32 %v7976_v46, %v3223_v38  ;;  %v4261_v45 = vmax.f32 %v4204_v27, 0.0  ;;  %v2735_v17 = vpop.permute.xlu2 %2734 }
 0x431   : > { %5199 = vmatmul.msk.bf16.gmra.mxu0 %vm2881_vm12, %v2860_v30  ;;  %5220 = vmatmul.msk.bf16.gmra.mxu1 %vm2881_vm12, %v2860_v30 }
 0x432   : > { %v8144_v23 = vpop.f32.mrf.mxu3  ;;  %v3291_v25 = vmax.f32 %v3259_v52, 0.0  ;;  %v4357_v48 = vpack.c.bf16 %v4261_v45, %v4261_v45  ;;  %v2831_v52 = vsel %vm1227_vm4, %v2623_v20, %v2735_v17 }
 0x434   : > { %v8148_v57 = vpop.f32.mrf.mxu0  ;;  %v4318_v24 = vpack.c.bf16 %v3291_v25, %v3291_v25  ;;  %v4645_v31 = vunpack.c.l.b16 %v4357_v48 }
 0x435   : > { %v4206_v1 = vpop.f32.mrf.mxu2  ;;  %v3157_v16 = vpop.f32.mrf.mxu1 }
 0x436   : > { %v4207_v21 = vadd.f32 %v7931_v10, %v4206_v1  ;;  %v3224_v19 = vadd.f32 %v3157_v16, %v3053_v13  ;;  %v4526_v32 = vunpack.c.l.b16 %v4318_v24  ;;  %v4669_v4 = vpack.c.b16 %v4645_v31, %v4644_v59 }
 0x438   : > { %v3260_v54 = vadd.f32 %v7976_v46, %v3224_v19  ;;  %v4262_v55 = vmax.f32 %v4207_v21, 0.0  ;;  %4692 = vrot.lane.b32.xlu1 %v4669_v4, %s5301_s16 }
 0x43a   : > { %v3292_v33 = vmax.f32 %v3260_v54, 0.0  ;;  %v8153_v26 = vpop.f32.mrf.mxu3  ;;  %v4358_v50 = vpack.c.bf16 %v4262_v55, %v4262_v55 }
 0x43c   : > { %v4319_v2 = vpack.c.bf16 %v3292_v33, %v3292_v33  ;;  %v8158_v36 = vpop.f32.mrf.mxu0  ;;  %v4646_v34 = vunpack.c.l.b16 %v4358_v50  ;;  %v8826_v50 = vmov 0  }
 0x43d   : > { %v4208_v40 = vpop.f32.mrf.mxu2  ;;  %v8161_v12 = vpop.f32.mrf.mxu1 }
 0x43e   : > { %v4209_v42 = vadd.f32 %v7931_v10, %v4208_v40  ;;  %v2781_v62 = vpop.permute.xlu1 %2780  ;;  %v4527_v35 = vunpack.c.l.b16 %v4319_v2  ;;  %v3058_v40 = vadd.f32 %v8117_v53, %v8153_v26 }
 0x43f   : > { %v2862_v63 = vsel %vm2832_vm11, %v2828_v5, %v2781_v62  ;;  %v2783_v30 = vpop.permute.xlu0 %2782 }
 0x440   : > { %v4263_v7 = vmax.f32 %v4209_v42, 0.0  ;;  %5180 = vmatmul.msk.bf16.gmra.mxu3 %vm2881_vm12, %v2862_v63  ;;  %v8166_v22 = vpack.c.b16 %v4527_v35, %v4526_v32  ;;  %v2864_v1 = vsel %vm2832_vm11, %v2831_v52, %v2783_v30  ;;  %v3056_v42 = vadd.f32 %v8104_v3, %v8144_v23 }
 0x441   : > { %5200 = vmatmul.msk.bf16.gmra.mxu0 %vm2881_vm12, %v2862_v63  ;;  %5221 = vmatmul.msk.bf16.gmra.mxu1 %vm2881_vm12, %v2862_v63 }
 0x442   : > { %v4359_v43 = vpack.c.bf16 %v4263_v7, %v4263_v7  ;;  %v8170_v58 = vpop.f32.mrf.mxu3  ;;  %v3225_v31 = vadd.f32 %v8161_v12, %v3056_v42 }
 0x444   : > { %v4647_v47 = vunpack.c.l.b16 %v4359_v43  ;;  %v8172_v13 = vpop.f32.mrf.mxu0  ;;  %v3261_v3 = vadd.f32 %v7976_v46, %v3225_v31 }
 0x445   : > { %v4211_v8 = vpop.f32.mrf.mxu2  ;;  %v3162_v49 = vpop.f32.mrf.mxu1 }
 0x446   : > { %v4212_v56 = vadd.f32 %v7931_v10, %v4211_v8  ;;  %v4670_v41 = vpack.c.b16 %v4647_v47, %v4646_v34  ;;  %v3226_v62 = vadd.f32 %v3162_v49, %v3058_v40  ;;  %v3293_v49 = vmax.f32 %v3261_v3, 0.0 }
 0x447   : > { %v8239_v31 = vpop.permute.xlu0 %4458 }
 0x448   : > { %4694 = vrot.lane.b32.xlu2 %v4670_v41, %s5301_s16  ;;  %v4264_v28 = vmax.f32 %v4212_v56, 0.0  ;;  %v3262_v53 = vadd.f32 %v7976_v46, %v3226_v62  ;;  %v4320_v52 = vpack.c.bf16 %v3293_v49, %v3293_v49 }
 0x44a   : > { %v8177_v38 = vpop.f32.mrf.mxu3  ;;  %v4360_v18 = vpack.c.bf16 %v4264_v28, %v4264_v28  ;;  %v3294_v23 = vmax.f32 %v3262_v53, 0.0 }
 0x44c   : > { %v3070_v16 = vpop.f32.mrf.mxu0  ;;  %v4648_v0 = vunpack.c.l.b16 %v4360_v18  ;;  %v4321_v28 = vpack.c.bf16 %v3294_v23, %v3294_v23  ;;  %v3063_v18 = vadd.f32 %v8148_v57, %v8177_v38 }
 0x44d   : > { %v4213_v61 = vpop.f32.mrf.mxu2  ;;  %v8183_v27 = vpop.f32.mrf.mxu1 }
 0x44e   : > { %v4214_v6 = vadd.f32 %v7931_v10, %v4213_v61 }
 0x450   : > { %v4265_v21 = vmax.f32 %v4214_v6, 0.0  ;;  %4566 = vrot.lane.b32.xlu2 %v8017_v39, %s5299_s25  ;;  %5181 = vmatmul.msk.bf16.gmra.mxu3 %vm2881_vm12, %v2864_v1  ;;  %v8197_v39 = vpop.permute.xlu2 %4456 }
 0x451   : > { %5222 = vmatmul.msk.bf16.gmra.mxu1 %vm2881_vm12, %v2864_v1 }
 0x452   : > { %v4361_v14 = vpack.c.bf16 %v4265_v21, %v4265_v21  ;;  %v8191_v25 = vpop.f32.mrf.mxu3  ;;  %v4529_v21 = vunpack.c.l.b16 %v4321_v28 }
 0x454   : > { %v4649_v19 = vunpack.c.l.b16 %v4361_v14  ;;  %v3072_v44 = vpop.f32.mrf.mxu0 }
 0x455   : > { %v4216_v29 = vpop.f32.mrf.mxu2  ;;  %v3167_v45 = vpop.f32.mrf.mxu1 }
 0x456   : > { %v4217_v54 = vadd.f32 %v7931_v10, %v4216_v29  ;;  %v4671_v55 = vpack.c.b16 %v4649_v19, %v4648_v0  ;;  %v3228_v0 = vadd.f32 %v3167_v45, %v3063_v18 }
 0x458   : > { %4696 = vrot.lane.b32.xlu0 %v4671_v55, %s5301_s16  ;;  %v4266_v24 = vmax.f32 %v4217_v54, 0.0  ;;  %v8214_v47 = vpop.permute.xlu2 %4462  ;;  %v4528_v55 = vunpack.c.l.b16 %v4320_v52 }
 0x45a   : > { %v8195_v33 = vpop.f32.mrf.mxu3  ;;  %v4362_v48 = vpack.c.bf16 %v4266_v24, %v4266_v24 }
 0x45b   : > { %v3068_v28 = vadd.f32 %v8172_v13, %v8195_v33  ;;  %v8251_v13 = vpop.permute.xlu1 %4454 }
 0x45c   : > { %v4650_v32 = vunpack.c.l.b16 %v4362_v48  ;;  %v3075_v63 = vpop.f32.mrf.mxu0 }
 0x45d   : > { %v4218_v15 = vpop.f32.mrf.mxu2  ;;  %v8199_v11 = vpop.f32.mrf.mxu1 }
 0x45e   : > { %v4219_v2 = vadd.f32 %v7931_v10, %v4218_v15 }
 0x460   : > { %v4267_v5 = vmax.f32 %v4219_v2, 0.0  ;;  %4568 = vrot.lane.b32.xlu0 %v8084_v37, %s5299_s25  ;;  %v8225_v1 = vpop.permute.xlu2 %4468 }
 0x461   : > { %3209 = vmatmul.bf16.gmra.mxu1 %v8826_v50 }
 0x462   : > { %v4363_v35 = vpack.c.bf16 %v4267_v5, %v4267_v5  ;;  %v2967_v59 = vpop.f32.mrf.mxu3 }
 0x463   : > { %v3071_v12 = vadd.f32 %v3070_v16, %v2967_v59  ;;  %v3061_v16 = vadd.f32 %v8135_v60, %v8170_v58  ;;  %v4555_v60 = vpack.c.b16 %v4529_v21, %v4528_v55 }
 0x464   : > { %v4651_v7 = vunpack.c.l.b16 %v4363_v35  ;;  %v8218_v56 = vpop.f32.mrf.mxu0 }
 0x465   : > { %v4221_v34 = vpop.f32.mrf.mxu2  ;;  %v8211_v26 = vpop.f32.mrf.mxu1  ;;  %v3227_v24 = vadd.f32 %v8183_v27, %v3061_v16 }
 0x466   : > { %v4222_v37 = vadd.f32 %v7931_v10, %v4221_v34  ;;  %v4672_v43 = vpack.c.b16 %v4651_v7, %v4650_v32  ;;  %v3230_v52 = vadd.f32 %v8211_v26, %v3068_v28 }
 0x467   : > { %v3263_v50 = vadd.f32 %v7976_v46, %v3227_v24 }
 0x468   : > { %4698 = vrot.lane.b32.xlu1 %v4672_v43, %s5301_s16  ;;  %v4268_v4 = vmax.f32 %v4222_v37, 0.0  ;;  %v8237_v62 = vpop.permute.xlu2 %4474  ;;  %v3266_v26 = vadd.f32 %v7976_v46, %v3230_v52 }
 0x469   : > { %v3295_v7 = vmax.f32 %v3263_v50, 0.0 }
 0x46a   : > { %v2969_v8 = vpop.f32.mrf.mxu3  ;;  %v4364_v17 = vpack.c.bf16 %v4268_v4, %v4268_v4 }
 0x46b   : > { %v3073_v38 = vadd.f32 %v3072_v44, %v2969_v8 }
 0x46c   : > { %v4652_v14 = vunpack.c.l.b16 %v4364_v17  ;;  %v3080_v58 = vpop.f32.mrf.mxu0 }
 0x46d   : > { %v4223_v41 = vpop.f32.mrf.mxu2  ;;  %v3175_v30 = vpop.f32.mrf.mxu1 }
 0x46e   : > { %v4224_v20 = vadd.f32 %v7931_v10, %v4223_v41  ;;  %v3231_v61 = vadd.f32 %v3175_v30, %v3071_v12  ;;  %v4322_v41 = vpack.c.bf16 %v3295_v7, %v3295_v7 }
 0x470   : > { %v4269_v6 = vmax.f32 %v4224_v20, 0.0  ;;  %4570 = vrot.lane.b32.xlu1 %v8111_v9, %s5299_s25  ;;  %v3267_v29 = vadd.f32 %v7976_v46, %v3231_v61  ;;  %v3264_v9 = vadd.f32 %v7976_v46, %v3228_v0  ;;  %v4530_v33 = vunpack.c.l.b16 %v4322_v41  ;;  %v8254_v0 = vpop.permute.xlu2 %4682 }
 0x472   : > { %v4365_v19 = vpack.c.bf16 %v4269_v6, %v4269_v6  ;;  %v2972_v54 = vpop.f32.mrf.mxu3  ;;  %v3299_v45 = vmax.f32 %v3267_v29, 0.0  ;;  %v3296_v44 = vmax.f32 %v3264_v9, 0.0 }
 0x473   : > { %v3076_v34 = vadd.f32 %v3075_v63, %v2972_v54  ;;  %v3066_v63 = vadd.f32 %v8158_v36, %v8191_v25  ;;  %v8257_v25 = vpop.permute.xlu0 %4464 }
 0x474   : > { %v4653_v57 = vunpack.c.l.b16 %v4365_v19  ;;  %v4326_v32 = vpack.c.bf16 %v3299_v45, %v3299_v45  ;;  %v4323_v43 = vpack.c.bf16 %v3296_v44, %v3296_v44  ;;  %v3082_v30 = vpop.f32.mrf.mxu0 }
 0x475   : > { %v4226_v15 = vpop.f32.mrf.mxu2  ;;  %v3177_v48 = vpop.f32.mrf.mxu1 }
 0x476   : > { %v4227_v2 = vadd.f32 %v7931_v10, %v4226_v15  ;;  %v4673_v40 = vpack.c.b16 %v4653_v57, %v4652_v14  ;;  %v3232_v5 = vadd.f32 %v3177_v48, %v3073_v38  ;;  %v4534_v8 = vunpack.c.l.b16 %v4326_v32 }
 0x477   : > { %v4531_v61 = vunpack.c.l.b16 %v4323_v43  ;;  %v3298_v57 = vmax.f32 %v3266_v26, 0.0 }
 0x478   : > { %4700 = vrot.lane.b32.xlu2 %v4673_v40, %s5301_s16  ;;  %4576 = vrot.lane.b32.xlu1 %v4555_v60, %s5299_s25  ;;  %v3268_v27 = vadd.f32 %v7976_v46, %v3232_v5  ;;  %v4270_v42 = vmax.f32 %v4227_v2, 0.0  ;;  %v8264_v60 = vpop.permute.xlu1 %4460 }
 0x479   : > { %v4556_v29 = vpack.c.b16 %v4531_v61, %v4530_v33  ;;  %v4325_v45 = vpack.c.bf16 %v3298_v57, %v3298_v57 }
 0x47a   : > { %v3300_v35 = vmax.f32 %v3268_v27, 0.0  ;;  %v2974_v59 = vpop.f32.mrf.mxu3  ;;  %v4366_v3 = vpack.c.bf16 %v4270_v42, %v4270_v42  ;;  %v8266_v42 = vpop.permute.xlu2 %4480 }
 0x47b   : > { %v3078_v36 = vadd.f32 %v8218_v56, %v2974_v59  ;;  %v8268_v32 = vpop.permute.xlu0 %4470 }
 0x47c   : > { %v4327_v53 = vpack.c.bf16 %v3300_v35, %v3300_v35  ;;  %v3085_v38 = vpop.f32.mrf.mxu0 }
 0x47d   : > { %v4228_v37 = vpop.f32.mrf.mxu2  ;;  %v3180_v23 = vpop.f32.mrf.mxu1 }
 0x47e   : > { %v4229_v4 = vadd.f32 %v7931_v10, %v4228_v37  ;;  %v4535_v49 = vunpack.c.l.b16 %v4327_v53  ;;  %v3233_v12 = vadd.f32 %v3180_v23, %v3076_v34  ;;  %v4654_v10 = vunpack.c.l.b16 %v4366_v3 }
 0x480   : > { %v4271_v17 = vmax.f32 %v4229_v4, 0.0  ;;  %4572 = vrot.lane.b32.xlu2 %v8141_v51, %s5299_s25  ;;  %v4558_v20 = vpack.c.b16 %v4535_v49, %v4534_v8  ;;  %v3269_v6 = vadd.f32 %v7976_v46, %v3233_v12  ;;  %v3229_v51 = vadd.f32 %v8199_v11, %v3066_v63  ;;  %v8276_v12 = vpop.permute.xlu1 %4466 }
 0x482   : > { %v4367_v18 = vpack.c.bf16 %v4271_v17, %v4271_v17  ;;  %4582 = vrot.lane.b32.xlu1 %v4558_v20, %s5299_s25  ;;  %v2977_v16 = vpop.f32.mrf.mxu3  ;;  %v3301_v54 = vmax.f32 %v3269_v6, 0.0  ;;  %v3265_v24 = vadd.f32 %v7976_v46, %v3229_v51 }
 0x483   : > { %v3081_v2 = vadd.f32 %v3080_v58, %v2977_v16  ;;  %v4533_v58 = vunpack.c.l.b16 %v4325_v45  ;;  %v4679_v28 = vpop.permute.xlu0 %4678 }
 0x484   : > { %v4655_v21 = vunpack.c.l.b16 %v4367_v18  ;;  %v4328_v56 = vpack.c.bf16 %v3301_v54, %v3301_v54  ;;  %v3297_v48 = vmax.f32 %v3265_v24, 0.0  ;;  %v3087_v43 = vpop.f32.mrf.mxu0 }
 0x485   : > { %v3182_v14 = vpop.f32.mrf.mxu1 }
 0x486   : > { %v4674_v19 = vpack.c.b16 %v4655_v21, %v4654_v10  ;;  %v3234_v55 = vadd.f32 %v3182_v14, %v3078_v36  ;;  %v4536_v50 = vunpack.c.l.b16 %v4328_v56  ;;  %v4324_v35 = vpack.c.bf16 %v3297_v48, %v3297_v48  ;;  %v8827_v56 = vld [vmem:[#allocation34_spill] sm:$0xff] }
 0x488   : > { %4702 = vrot.lane.b32.xlu0 %v4674_v19, %s5301_s16  ;;  %4578 = vrot.lane.b32.xlu2 %v4556_v29, %s5299_s25  ;;  %v3270_v11 = vadd.f32 %v7976_v46, %v3234_v55  ;;  %v4532_v37 = vunpack.c.l.b16 %v4324_v35  ;;  %v8284_v21 = vpop.permute.xlu1 %4472 }
 0x48a   : > { %v3302_v15 = vmax.f32 %v3270_v11, 0.0  ;;  %v2979_v9 = vpop.f32.mrf.mxu3  ;;  %v8272_v7 = vpop.f32.mrf.mxu2  ;;  %v4557_v23 = vpack.c.b16 %v4533_v58, %v4532_v37 }
 0x48b   : > { %v3083_v3 = vadd.f32 %v3082_v30, %v2979_v9  ;;  %v8290_v19 = vpop.permute.xlu0 %4476 }
 0x48c   : > { %v4329_v40 = vpack.c.bf16 %v3302_v15, %v3302_v15  ;;  %v4711_v15 = vsel %vm1227_vm4, %v8827_v56, %v8251_v13 }
 0x48e   : > { %v3185_v5 = vpop.f32.mrf.mxu1  ;;  %v4537_v27 = vunpack.c.l.b16 %v4329_v40  ;;  %v3090_v18 = vpop.f32.mrf.mxu0 }
 0x48f   : > { %v3235_v44 = vadd.f32 %v3185_v5, %v3081_v2 }
 0x490   : > { %4574 = vrot.lane.b32.xlu0 %v8166_v22, %s5299_s25  ;;  %v4559_v59 = vpack.c.b16 %v4537_v27, %v4536_v50  ;;  %v8279_v22 = vpop.permute.xlu2 %4688  ;;  %v8300_v5 = vpop.permute.xlu1 %4680 }
 0x491   : > { %v3271_v34 = vadd.f32 %v7976_v46, %v3235_v44 }
 0x492   : > { %4584 = vrot.lane.b32.xlu2 %v4559_v59, %s5299_s25  ;;  %v8282_v61 = vpop.f32.mrf.mxu2 }
 0x493   : > { %v2982_v53 = vpop.f32.mrf.mxu3  ;;  %v3303_v8 = vmax.f32 %v3271_v34, 0.0  ;;  %v8303_v58 = vpop.permute.xlu0 %4684 }
 0x494   : > { %v3086_v52 = vadd.f32 %v3085_v38, %v2982_v53 }
 0x495   : > { %v4330_v17 = vpack.c.bf16 %v3303_v8, %v3303_v8 }
 0x496   : > { %v3187_v4 = vpop.f32.mrf.mxu1  ;;  %v3092_v57 = vpop.f32.mrf.mxu0 }
 0x497   : > { %v3236_v49 = vadd.f32 %v3187_v4, %v3083_v3  ;;  %v4538_v6 = vunpack.c.l.b16 %v4330_v17 }
 0x498   : > { %4580 = vrot.lane.b32.xlu0 %v4557_v23, %s5299_s25  ;;  %v8318_v17 = vpop.permute.xlu1 %4478 }
 0x499   : > { %v3272_v41 = vadd.f32 %v7976_v46, %v3236_v49 }
 0x49a   : > { %v8292_v54 = vpop.f32.mrf.mxu2 }
 0x49b   : > { %v3304_v63 = vmax.f32 %v3272_v41, 0.0  ;;  %v2984_v20 = vpop.f32.mrf.mxu3 }
 0x49c   : > { %v3088_v29 = vadd.f32 %v3087_v43, %v2984_v20 }
 0x49d   : > { %v4331_v30 = vpack.c.bf16 %v3304_v63, %v3304_v63 }
 0x49e   : > { %v3190_v10 = vpop.f32.mrf.mxu1  ;;  %v3095_v8 = vpop.f32.mrf.mxu0 }
 0x49f   : > { %v4539_v16 = vunpack.c.l.b16 %v4331_v30  ;;  %v3237_v33 = vadd.f32 %v3190_v10, %v3086_v52  ;;  %v8320_v30 = vpop.permute.xlu0 %4482  ;;  %v8325_v10 = vld [vmem:[%s8529_s10] ss:$0 sm:$0xff] }
 0x4a1   : > { %v4560_v51 = vpack.c.b16 %v4539_v16, %v4538_v6  ;;  %v3273_v36 = vadd.f32 %v7976_v46, %v3237_v33 }
 0x4a2   : > { %v8287_v26 = vpop.permute.xlu2 %4694  ;;  %v8310_v23 = vpop.f32.mrf.mxu2 }
 0x4a3   : > { %4586 = vrot.lane.b32.xlu0 %v4560_v51, %s5299_s25  ;;  %v2987_v14 = vpop.f32.mrf.mxu3  ;;  %v3305_v55 = vmax.f32 %v3273_v36, 0.0 }
 0x4a4   : > { %v3091_v27 = vadd.f32 %v3090_v18, %v2987_v14 }
 0x4a5   : > { %v4332_v9 = vpack.c.bf16 %v3305_v55, %v3305_v55 }
 0x4a6   : > { %v3192_v24 = vpop.f32.mrf.mxu1  ;;  %v3097_v51 = vpop.f32.mrf.mxu0 }
 0x4a7   : > { %v3238_v11 = vadd.f32 %v3192_v24, %v3088_v29  ;;  %v4540_v34 = vunpack.c.l.b16 %v4332_v9  ;;  %v8328_v29 = vpop.permute.xlu1 %4686 }
 0x4a9   : > { %v3274_v38 = vadd.f32 %v7976_v46, %v3238_v11 }
 0x4aa   : > { %v4567_v48 = vpop.permute.xlu2 %4566 }
 0x4ab   : > { %v3306_v2 = vmax.f32 %v3274_v38, 0.0  ;;  %v4743_v40 = vsel %vm2832_vm11, %v4711_v15, %v4567_v48  ;;  %v2989_v45 = vpop.f32.mrf.mxu3  ;;  %v4241_v6 = vpop.f32.mrf.mxu2 }
 0x4ac   : > { %v4775_v50 = vsel %vm2881_vm12, %v4743_v40, %v4679_v28  ;;  %v3093_v28 = vadd.f32 %v3092_v57, %v2989_v45  ;;  %v8330_v38 = vpop.permute.xlu0 %4690  ;;  %v8337_v45 = vld [vmem:[%s8523_s4] ss:$0 sm:$0xff] }
 0x4ad   : > { %v4333_v44 = vpack.c.bf16 %v3306_v2, %v3306_v2  ;;  %v4822_v35 = vunpack.c.l.b16 %v4775_v50  ;;  %v4823_v59 = vunpack.c.h.b16 %v4775_v50  ;;  %v4242_v50 = vadd.f32 %v8337_v45, %v4241_v6 }
 0x4ae   : > { %v3195_v13 = vpop.f32.mrf.mxu1 }
 0x4af   : > { %v4541_v53 = vunpack.c.l.b16 %v4333_v44  ;;  %v4854_v37 = vpack.c.b16 %v4822_v35, %v4822_v35  ;;  %v4855_v43 = vpack.c.b16 %v4823_v59, %v4823_v59  ;;  %v3239_v3 = vadd.f32 %v3195_v13, %v3091_v27  ;;  %v3100_v44 = vpop.f32.mrf.mxu0 }
 0x4b1   : > { %v4561_v4 = vpack.c.b16 %v4541_v53, %v4540_v34  ;;  %4919 = vst.msk [vmem:[%s8308_s28] sm:$0xf] %vm4918_vm7, %v4854_v37  ;;  %v3275_v49 = vadd.f32 %v7976_v46, %v3239_v3  ;;  %v8341_v34 = vpop.permute.xlu1 %4484  ;;  %v4276_v53 = vmax.f32 %v4242_v50, 0.0 }
 0x4b2   : > { %4920 = vst.msk [vmem:[%s8308_s28 + $0x4] sm:$0xf] %vm4918_vm7, %v4855_v43 }
 0x4b3   : > { %4588 = vrot.lane.b32.xlu1 %v4561_v4, %s5299_s25  ;;  %v2992_v41 = vpop.f32.mrf.mxu3  ;;  %v3307_v20 = vmax.f32 %v3275_v49, 0.0  ;;  %v4243_v9 = vpop.f32.mrf.mxu2 }
 0x4b4   : > { %v3096_v36 = vadd.f32 %v3095_v8, %v2992_v41  ;;  %v4244_v27 = vadd.f32 %v8337_v45, %v4243_v9  ;;  %v4372_v41 = vpack.c.bf16 %v4276_v53, %v4276_v53 }
 0x4b5   : > { %v4334_v46 = vpack.c.bf16 %v3307_v20, %v3307_v20 }
 0x4b6   : > { %v3197_v63 = vpop.f32.mrf.mxu1  ;;  %v4277_v43 = vmax.f32 %v4244_v27, 0.0 }
 0x4b7   : > { %v3240_v52 = vadd.f32 %v3197_v63, %v3093_v28  ;;  %v4542_v24 = vunpack.c.l.b16 %v4334_v46 }
 0x4b8   : > { %v4373_v63 = vpack.c.bf16 %v4277_v43, %v4277_v43  ;;  %v8829_v43 = vld [vmem:[#allocation45_spill] sm:$0xff] }
 0x4b9   : > { %v3276_v18 = vadd.f32 %v8325_v10, %v3240_v52  ;;  %v8346_v46 = vpop.permute.xlu1 %4692 }
 0x4bb   : > { %v3308_v16 = vmax.f32 %v3276_v18, 0.0  ;;  %v2994_v33 = vpop.f32.mrf.mxu3 }
 0x4bc   : > { %v3098_v48 = vadd.f32 %v3097_v51, %v2994_v33  ;;  %v8828_v51 = vld [vmem:[#allocation41_spill] sm:$0xff] }
 0x4bd   : > { %v4335_v14 = vpack.c.bf16 %v3308_v16, %v3308_v16  ;;  %v3102_v16 = vpop.f32.mrf.mxu0 }
 0x4be   : > { %v3200_v55 = vpop.f32.mrf.mxu1 }
 0x4bf   : > { %v4543_v11 = vunpack.c.l.b16 %v4335_v14  ;;  %v3241_v57 = vadd.f32 %v3200_v55, %v3096_v36  ;;  %v4713_v36 = vsel %vm1227_vm4, %v8828_v51, %v8197_v39  ;;  %v4660_v14 = vunpack.c.l.b16 %v4372_v41 }
 0x4c0   : > { %v4661_v55 = vunpack.c.l.b16 %v4373_v63 }
 0x4c1   : > { %v4562_v56 = vpack.c.b16 %v4543_v11, %v4542_v24  ;;  %v3277_v15 = vadd.f32 %v8325_v10, %v3241_v57 }
 0x4c2   : > { %v4677_v39 = vpack.c.b16 %v4661_v55, %v4660_v14 }
 0x4c3   : > { %4590 = vrot.lane.b32.xlu2 %v4562_v56, %s5299_s25  ;;  %v2997_v2 = vpop.f32.mrf.mxu3  ;;  %v3309_v35 = vmax.f32 %v3277_v15, 0.0 }
 0x4c4   : > { %v3101_v8 = vadd.f32 %v3100_v44, %v2997_v2 }
 0x4c5   : > { %v4336_v3 = vpack.c.bf16 %v3309_v35, %v3309_v35 }
 0x4c6   : > { %v3202_v40 = vpop.f32.mrf.mxu1 }
 0x4c7   : > { %v3242_v59 = vadd.f32 %v3202_v40, %v3098_v48  ;;  %v4544_v20 = vunpack.c.l.b16 %v4336_v3  ;;  %v4717_v3 = vsel %vm1227_vm4, %v8829_v43, %v8264_v60 }
 0x4c9   : > { %v3278_v13 = vadd.f32 %v8325_v10, %v3242_v59  ;;  %v4232_v59 = vadd.f32 %v8337_v45, %v8272_v7 }
 0x4ca   : > { %v8344_v37 = vpop.permute.xlu0 %4696 }
 0x4cb   : > { %v3310_v4 = vmax.f32 %v3278_v13, 0.0  ;;  %v2999_v18 = vpop.f32.mrf.mxu3  ;;  %v4234_v13 = vadd.f32 %v8337_v45, %v8282_v61  ;;  %v4272_v61 = vmax.f32 %v4232_v59, 0.0 }
 0x4cc   : > { %v3103_v9 = vadd.f32 %v3102_v16, %v2999_v18 }
 0x4cd   : > { %v4337_v49 = vpack.c.bf16 %v3310_v4, %v3310_v4  ;;  %v4368_v55 = vpack.c.bf16 %v4272_v61, %v4272_v61 }
 0x4ce   : > { %v3205_v28 = vpop.f32.mrf.mxu1 }
 0x4cf   : > { %v4545_v52 = vunpack.c.l.b16 %v4337_v49  ;;  %v3243_v6 = vadd.f32 %v3205_v28, %v3101_v8  ;;  %v3105_v49 = vpop.f32.mrf.mxu0 }
 0x4d1   : > { %v4563_v33 = vpack.c.b16 %v4545_v52, %v4544_v20  ;;  %v3279_v57 = vadd.f32 %v8325_v10, %v3243_v6  ;;  %v4273_v20 = vmax.f32 %v4234_v13, 0.0 }
 0x4d2   : > { %v8351_v24 = vpop.permute.xlu2 %4700  ;;  %v4569_v11 = vpop.permute.xlu0 %4568 }
 0x4d3   : > { %4592 = vrot.lane.b32.xlu0 %v4563_v33, %s5299_s25  ;;  %v4745_v56 = vsel %vm2832_vm11, %v4713_v36, %v4569_v11  ;;  %v3311_v50 = vmax.f32 %v3279_v57, 0.0  ;;  %v3002_v53 = vpop.f32.mrf.mxu3  ;;  %v4369_v57 = vpack.c.bf16 %v4273_v20, %v4273_v20 }
 0x4d4   : > { %v4777_v15 = vsel %vm2881_vm12, %v4745_v56, %v8300_v5  ;;  %v3106_v6 = vadd.f32 %v3105_v49, %v3002_v53 }
 0x4d5   : > { %v4824_v48 = vunpack.c.l.b16 %v4777_v15  ;;  %v4825_v2 = vunpack.c.h.b16 %v4777_v15  ;;  %v4338_v41 = vpack.c.bf16 %v3311_v50, %v3311_v50  ;;  %v8830_v15 = vld [vmem:[#allocation44_spill] sm:$0xff]  ;;  %v4657_v59 = vunpack.c.l.b16 %v4369_v57 }
 0x4d6   : > { %v3207_v40 = vpop.f32.mrf.mxu1 }
 0x4d7   : > { %v4856_v27 = vpack.c.b16 %v4824_v48, %v4824_v48  ;;  %v4857_v44 = vpack.c.b16 %v4825_v2, %v4825_v2  ;;  %v3244_v35 = vadd.f32 %v3207_v40, %v3103_v9  ;;  %v4546_v33 = vunpack.c.l.b16 %v4338_v41  ;;  %v8831_v9 = vld [vmem:[#allocation54_spill] sm:$0xff]  ;;  %v3107_v13 = vpop.f32.mrf.mxu0 }
 0x4d8   : > { %v4723_v48 = vsel %vm1227_vm4, %v8831_v9, %v8276_v12 }
 0x4d9   : > { %4921 = vst.msk [vmem:[%s8308_s28 + $0x8] sm:$0xf] %vm4918_vm7, %v4856_v27  ;;  %v3280_v5 = vadd.f32 %v8325_v10, %v3244_v35 }
 0x4da   : > { %4922 = vst.msk [vmem:[%s8308_s28 + $0xc] sm:$0xf] %vm4918_vm7, %v4857_v44  ;;  %v8370_v4 = vpop.permute.xlu1 %4698  ;;  %v4573_v8 = vpop.permute.xlu2 %4572  ;;  %v4656_v44 = vunpack.c.l.b16 %v4368_v55 }
 0x4db   : > { %v3312_v7 = vmax.f32 %v3280_v5, 0.0  ;;  %v4749_v28 = vsel %vm2832_vm11, %v4717_v3, %v4573_v8  ;;  %4708 = vrot.lane.b32.xlu0 %v4677_v39, %s5301_s16  ;;  %v3004_v40 = vpop.f32.mrf.mxu3 }
 0x4dc   : > { %v4781_v63 = vsel %vm2881_vm12, %v4749_v28, %v8303_v58  ;;  %v4715_v58 = vsel %vm1227_vm4, %v8830_v15, %v8239_v31  ;;  %v3108_v3 = vadd.f32 %v3107_v13, %v3004_v40  ;;  %v4675_v20 = vpack.c.b16 %v4657_v59, %v4656_v44 }
 0x4dd   : > { %v4339_v52 = vpack.c.bf16 %v3312_v7, %v3312_v7  ;;  %v4828_v60 = vunpack.c.l.b16 %v4781_v63  ;;  %v4829_v18 = vunpack.c.h.b16 %v4781_v63 }
 0x4de   : > { %v3210_v16 = vpop.f32.mrf.mxu1 }
 0x4df   : > { %v4547_v51 = vunpack.c.l.b16 %v4339_v52  ;;  %v4860_v36 = vpack.c.b16 %v4828_v60, %v4828_v60  ;;  %v4861_v14 = vpack.c.b16 %v4829_v18, %v4829_v18  ;;  %v3245_v11 = vadd.f32 %v3210_v16, %v3106_v6  ;;  %v8832_v52 = vld [vmem:[#allocation51_spill] sm:$0xff] }
 0x4e0   : > { %v4721_v60 = vsel %vm1227_vm4, %v8832_v52, %v8257_v25  ;;  %v4239_v18 = vadd.f32 %v8337_v45, %v8310_v23  ;;  %v8833_v23 = vld [vmem:[#allocation61_spill] sm:$0xff] }
 0x4e1   : > { %v4564_v56 = vpack.c.b16 %v4547_v51, %v4546_v33  ;;  %4925 = vst.msk [vmem:[%s8308_s28 + $0x18] sm:$0xf] %vm4918_vm7, %v4860_v36  ;;  %v3281_v35 = vadd.f32 %v8325_v10, %v3245_v11  ;;  %v8836_v52 = vld [vmem:[#allocation57_spill] sm:$0xff] }
 0x4e2   : > { %4926 = vst.msk [vmem:[%s8308_s28 + $0x1c] sm:$0xf] %vm4918_vm7, %v4861_v14  ;;  %v4571_v2 = vpop.permute.xlu1 %4570  ;;  %v4579_v39 = vpop.permute.xlu2 %4578  ;;  %v4275_v11 = vmax.f32 %v4239_v18, 0.0 }
 0x4e3   : > { %v4747_v50 = vsel %vm2832_vm11, %v4715_v58, %v4571_v2  ;;  %v4755_v27 = vsel %vm2832_vm11, %v4723_v48, %v4579_v39  ;;  %4594 = vrot.lane.b32.xlu1 %v4564_v56, %s5299_s25  ;;  %v3313_v61 = vmax.f32 %v3281_v35, 0.0 }
 0x4e4   : > { %v4779_v31 = vsel %vm2881_vm12, %v4747_v50, %v8254_v0  ;;  %v4787_v12 = vsel %vm2881_vm12, %v4755_v27, %v8330_v38  ;;  %v4237_v38 = vadd.f32 %v8337_v45, %v8292_v54  ;;  %v4729_v45 = vsel %vm1227_vm4, %v8833_v23, %v8284_v21 }
 0x4e5   : > { %v4826_v53 = vunpack.c.l.b16 %v4779_v31  ;;  %v4827_v5 = vunpack.c.h.b16 %v4779_v31  ;;  %v4834_v43 = vunpack.c.l.b16 %v4787_v12  ;;  %v4835_v8 = vunpack.c.h.b16 %v4787_v12 }
 0x4e6   : > { %v3212_v49 = vpop.f32.mrf.mxu1  ;;  %v4340_v54 = vpack.c.bf16 %v3313_v61, %v3313_v61  ;;  %v4371_v40 = vpack.c.bf16 %v4275_v11, %v4275_v11 }
 0x4e7   : > { %v4858_v41 = vpack.c.b16 %v4826_v53, %v4826_v53  ;;  %v4859_v7 = vpack.c.b16 %v4827_v5, %v4827_v5  ;;  %v4866_v28 = vpack.c.b16 %v4834_v43, %v4834_v43  ;;  %v4867_v0 = vpack.c.b16 %v4835_v8, %v4835_v8 }
 0x4e8   : > { %v3246_v63 = vadd.f32 %v3212_v49, %v3108_v3  ;;  %v4548_v9 = vunpack.c.l.b16 %v4340_v54  ;;  %v4659_v59 = vunpack.c.l.b16 %v4371_v40 }
 0x4e9   : > { %4923 = vst.msk [vmem:[%s8308_s28 + $0x10] sm:$0xf] %vm4918_vm7, %v4858_v41 }
 0x4ea   : > { %4924 = vst.msk [vmem:[%s8308_s28 + $0x14] sm:$0xf] %vm4918_vm7, %v4859_v7  ;;  %v3282_v6 = vadd.f32 %v8325_v10, %v3246_v63  ;;  %v4577_v16 = vpop.permute.xlu1 %4576  ;;  %v4274_v10 = vmax.f32 %v4237_v38, 0.0 }
 0x4eb   : > { %4931 = vst.msk [vmem:[%s8308_s28 + $0x30] sm:$0xf] %vm4918_vm7, %v4866_v28  ;;  %v4753_v33 = vsel %vm2832_vm11, %v4721_v60, %v4577_v16  ;;  %4704 = vrot.lane.b32.xlu1 %v4675_v20, %s5301_s16  ;;  %v4725_v60 = vsel %vm1227_vm4, %v8836_v52, %v8225_v1  ;;  %v8837_v1 = vld [vmem:[#allocation63_spill] sm:$0xff] }
 0x4ec   : > { %4932 = vst.msk [vmem:[%s8308_s28 + $0x34] sm:$0xf] %vm4918_vm7, %v4867_v0  ;;  %v3314_v51 = vmax.f32 %v3282_v6, 0.0  ;;  %v4785_v25 = vsel %vm2881_vm12, %v4753_v33, %v8279_v22  ;;  %v4585_v55 = vpop.permute.xlu2 %4584  ;;  %v4370_v39 = vpack.c.bf16 %v4274_v10, %v4274_v10 }
 0x4ed   : > { %v4832_v36 = vunpack.c.l.b16 %v4785_v25  ;;  %v4833_v14 = vunpack.c.h.b16 %v4785_v25  ;;  %v4761_v56 = vsel %vm2832_vm11, %v4729_v45, %v4585_v55  ;;  %v8838_v55 = vld [vmem:[#allocation47_spill] sm:$0xff] }
 0x4ee   : > { %v4341_v57 = vpack.c.bf16 %v3314_v51, %v3314_v51  ;;  %v4793_v22 = vsel %vm2881_vm12, %v4761_v56, %v8344_v37  ;;  %v8834_v37 = vld [vmem:[#allocation59_spill] sm:$0xff]  ;;  %v4658_v12 = vunpack.c.l.b16 %v4370_v39  ;;  %v4731_v51 = vsel %vm1227_vm4, %v8837_v1, %v8237_v62 }
 0x4ef   : > { %v4864_v15 = vpack.c.b16 %v4832_v36, %v4832_v36  ;;  %v4865_v58 = vpack.c.b16 %v4833_v14, %v4833_v14  ;;  %v4840_v21 = vunpack.c.l.b16 %v4793_v22  ;;  %v4841_v2 = vunpack.c.h.b16 %v4793_v22 }
 0x4f0   : > { %v4549_v48 = vunpack.c.l.b16 %v4341_v57  ;;  %v4727_v35 = vsel %vm1227_vm4, %v8834_v37, %v8268_v32  ;;  %v4676_v3 = vpack.c.b16 %v4659_v59, %v4658_v12  ;;  %v8835_v32 = vld [vmem:[#allocation48_spill] sm:$0xff]  ;;  %v4735_v11 = vsel %vm1227_vm4, %v8838_v55, %v8318_v17 }
 0x4f1   : > { %4929 = vst.msk [vmem:[%s8308_s28 + $0x28] sm:$0xf] %vm4918_vm7, %v4864_v15  ;;  %v4872_v27 = vpack.c.b16 %v4840_v21, %v4840_v21  ;;  %v4873_v44 = vpack.c.b16 %v4841_v2, %v4841_v2  ;;  %v4719_v7 = vsel %vm1227_vm4, %v8835_v32, %v8214_v47  ;;  %v8840_v37 = vld [vmem:[#allocation60_spill] sm:$0xff] }
 0x4f2   : > { %v4565_v50 = vpack.c.b16 %v4549_v48, %v4548_v9  ;;  %4930 = vst.msk [vmem:[%s8308_s28 + $0x2c] sm:$0xf] %vm4918_vm7, %v4865_v58  ;;  %v8839_v9 = vld [vmem:[#allocation65_spill] sm:$0xff] }
 0x4f3   : > { %4937 = vst.msk [vmem:[%s8308_s28 + $0x48] sm:$0xf] %vm4918_vm7, %v4872_v27  ;;  %v4733_v48 = vsel %vm1227_vm4, %v8839_v9, %v8290_v19 }
 0x4f4   : > { %4596 = vrot.lane.b32.xlu2 %v4565_v50, %s5299_s25  ;;  %4938 = vst.msk [vmem:[%s8308_s28 + $0x4c] sm:$0xf] %vm4918_vm7, %v4873_v44  ;;  %v4583_v31 = vpop.permute.xlu1 %4582 }
 0x4f5   : > { %v4759_v13 = vsel %vm2832_vm11, %v4727_v35, %v4583_v31  ;;  %v4741_v35 = vsel %vm1227_vm4, %v8840_v37, %v8341_v34 }
 0x4f6   : > { %v4791_v53 = vsel %vm2881_vm12, %v4759_v13, %v8287_v26 }
 0x4f7   : > { %v4838_v5 = vunpack.c.l.b16 %v4791_v53  ;;  %v4839_v43 = vunpack.c.h.b16 %v4791_v53 }
 0x4f9   : > { %v4870_v8 = vpack.c.b16 %v4838_v5, %v4838_v5  ;;  %v4871_v49 = vpack.c.b16 %v4839_v43, %v4839_v43  ;;  %v8841_v43 = vld [vmem:[#allocation49_spill] sm:$0xff] }
 0x4fa   : > { %v4703_v41 = vpop.permute.xlu0 %4702 }
 0x4fb   : > { %4935 = vst.msk [vmem:[%s8308_s28 + $0x40] sm:$0xf] %vm4918_vm7, %v4870_v8 }
 0x4fc   : > { %4706 = vrot.lane.b32.xlu2 %v4676_v3, %s5301_s16  ;;  %4936 = vst.msk [vmem:[%s8308_s28 + $0x44] sm:$0xf] %vm4918_vm7, %v4871_v49  ;;  %v4739_v3 = vsel %vm1227_vm4, %v8841_v43, %v8320_v30 }
 0x502   : > { %v4575_v28 = vpop.permute.xlu0 %4574 }
 0x503   : > { %v4751_v26 = vsel %vm2832_vm11, %v4719_v7, %v4575_v28 }
 0x504   : > { %v4783_v61 = vsel %vm2881_vm12, %v4751_v26, %v8328_v29 }
 0x505   : > { %v4830_v0 = vunpack.c.l.b16 %v4783_v61  ;;  %v4831_v63 = vunpack.c.h.b16 %v4783_v61  ;;  %v8842_v61 = vld [vmem:[#allocation46_spill] sm:$0xff] }
 0x506   : > { %v4737_v30 = vsel %vm1227_vm4, %v8842_v61, %v8266_v42 }
 0x507   : > { %v4862_v20 = vpack.c.b16 %v4830_v0, %v4830_v0  ;;  %v4863_v38 = vpack.c.b16 %v4831_v63, %v4831_v63 }
 0x509   : > { %4927 = vst.msk [vmem:[%s8308_s28 + $0x20] sm:$0xf] %vm4918_vm7, %v4862_v20 }
 0x50a   : > { %4928 = vst.msk [vmem:[%s8308_s28 + $0x24] sm:$0xf] %vm4918_vm7, %v4863_v38  ;;  %v4581_v47 = vpop.permute.xlu0 %4580 }
 0x50b   : > { %v4757_v18 = vsel %vm2832_vm11, %v4725_v60, %v4581_v47 }
 0x50c   : > { %v4789_v29 = vsel %vm2881_vm12, %v4757_v18, %v8346_v46 }
 0x50d   : > { %v4836_v6 = vunpack.c.l.b16 %v4789_v29  ;;  %v4837_v16 = vunpack.c.h.b16 %v4789_v29 }
 0x50f   : > { %v4868_v33 = vpack.c.b16 %v4836_v6, %v4836_v6  ;;  %v4869_v54 = vpack.c.b16 %v4837_v16, %v4837_v16 }
 0x511   : > { %4933 = vst.msk [vmem:[%s8308_s28 + $0x38] sm:$0xf] %vm4918_vm7, %v4868_v33 }
 0x512   : > { %4934 = vst.msk [vmem:[%s8308_s28 + $0x3c] sm:$0xf] %vm4918_vm7, %v4869_v54 }
 0x515   : > { %v4587_v25 = vpop.permute.xlu0 %4586 }
 0x516   : > { %v4763_v23 = vsel %vm2832_vm11, %v4731_v51, %v4587_v25 }
 0x517   : > { %v4795_v46 = vsel %vm2881_vm12, %v4763_v23, %v8370_v4 }
 0x518   : > { %v4842_v45 = vunpack.c.l.b16 %v4795_v46  ;;  %v4843_v10 = vunpack.c.h.b16 %v4795_v46 }
 0x51a   : > { %v4874_v36 = vpack.c.b16 %v4842_v45, %v4842_v45  ;;  %v4875_v14 = vpack.c.b16 %v4843_v10, %v4843_v10 }
 0x51c   : > { %4939 = vst.msk [vmem:[%s8308_s28 + $0x50] sm:$0xf] %vm4918_vm7, %v4874_v36 }
 0x51d   : > { %4940 = vst.msk [vmem:[%s8308_s28 + $0x54] sm:$0xf] %vm4918_vm7, %v4875_v14  ;;  %v4591_v62 = vpop.permute.xlu2 %4590 }
 0x51e   : > { %v4767_v57 = vsel %vm2832_vm11, %v4735_v11, %v4591_v62 }
 0x51f   : > { %v4799_v56 = vsel %vm2881_vm12, %v4767_v57, %v4703_v41 }
 0x520   : > { %v4846_v4 = vunpack.c.l.b16 %v4799_v56  ;;  %v4847_v15 = vunpack.c.h.b16 %v4799_v56 }
 0x522   : > { %v4878_v58 = vpack.c.b16 %v4846_v4, %v4846_v4  ;;  %v4879_v22 = vpack.c.b16 %v4847_v15, %v4847_v15 }
 0x524   : > { %4943 = vst.msk [vmem:[%s8308_s28 + $0x60] sm:$0xf] %vm4918_vm7, %v4878_v58 }
 0x525   : > { %4944 = vst.msk [vmem:[%s8308_s28 + $0x64] sm:$0xf] %vm4918_vm7, %v4879_v22  ;;  %v4589_v17 = vpop.permute.xlu1 %4588 }
 0x526   : > { %v4765_v21 = vsel %vm2832_vm11, %v4733_v48, %v4589_v17 }
 0x527   : > { %v4797_v2 = vsel %vm2881_vm12, %v4765_v21, %v8351_v24 }
 0x528   : > { %v4844_v39 = vunpack.c.l.b16 %v4797_v2  ;;  %v4845_v40 = vunpack.c.h.b16 %v4797_v2 }
 0x52a   : > { %v4876_v50 = vpack.c.b16 %v4844_v39, %v4844_v39  ;;  %v4877_v27 = vpack.c.b16 %v4845_v40, %v4845_v40 }
 0x52c   : > { %4941 = vst.msk [vmem:[%s8308_s28 + $0x58] sm:$0xf] %vm4918_vm7, %v4876_v50 }
 0x52d   : > { %4942 = vst.msk [vmem:[%s8308_s28 + $0x5c] sm:$0xf] %vm4918_vm7, %v4877_v27 }
 0x545   : > { %v4593_v44 = vpop.permute.xlu0 %4592 }
 0x546   : > { %v4769_v0 = vsel %vm2832_vm11, %v4737_v30, %v4593_v44 }
 0x54d   : > { %v4709_v19 = vpop.permute.xlu0 %4708 }
 0x54e   : > { %v4597_v31 = vpop.permute.xlu2 %4596 }
 0x54f   : > { %v4773_v12 = vsel %vm2832_vm11, %v4741_v35, %v4597_v31 }
 0x550   : > { %v4805_v24 = vsel %vm2881_vm12, %v4773_v12, %v4709_v19 }
 0x551   : > { %v4852_v59 = vunpack.c.l.b16 %v4805_v24  ;;  %v4853_v13 = vunpack.c.h.b16 %v4805_v24 }
 0x553   : > { %v4884_v53 = vpack.c.b16 %v4852_v59, %v4852_v59  ;;  %v4885_v5 = vpack.c.b16 %v4853_v13, %v4853_v13 }
 0x555   : > { %4949 = vst.msk [vmem:[%s8308_s28 + $0x78] sm:$0xf] %vm4918_vm7, %v4884_v53  ;;  %v4595_v8 = vpop.permute.xlu1 %4594 }
 0x556   : > { %4950 = vst.msk [vmem:[%s8308_s28 + $0x7c] sm:$0xf] %vm4918_vm7, %v4885_v5  ;;  %v4771_v34 = vsel %vm2832_vm11, %v4739_v3, %v4595_v8  ;;  %v4707_v49 = vpop.permute.xlu2 %4706 }
 0x557   : > { %v4803_v41 = vsel %vm2881_vm12, %v4771_v34, %v4707_v49 }
 0x558   : > { %v4850_v32 = vunpack.c.l.b16 %v4803_v41  ;;  %v4851_v7 = vunpack.c.h.b16 %v4803_v41 }
 0x55a   : > { %v4882_v28 = vpack.c.b16 %v4850_v32, %v4850_v32  ;;  %v4883_v26 = vpack.c.b16 %v4851_v7, %v4851_v7 }
 0x55c   : > { %4947 = vst.msk [vmem:[%s8308_s28 + $0x70] sm:$0xf] %vm4918_vm7, %v4882_v28 }
 0x55d   : > { %4948 = vst.msk [vmem:[%s8308_s28 + $0x74] sm:$0xf] %vm4918_vm7, %v4883_v26  ;;  %v4705_v63 = vpop.permute.xlu1 %4704 }
 0x55e   : > { %v4801_v20 = vsel %vm2881_vm12, %v4769_v0, %v4705_v63 }
 0x55f   : > { %v4848_v38 = vunpack.c.l.b16 %v4801_v20  ;;  %v4849_v52 = vunpack.c.h.b16 %v4801_v20 }
 0x561   : > { %v4880_v60 = vpack.c.b16 %v4848_v38, %v4848_v38  ;;  %v4881_v47 = vpack.c.b16 %v4849_v52, %v4849_v52 }
 0x563   : > { %4945 = vst.msk [vmem:[%s8308_s28 + $0x68] sm:$0xf] %vm4918_vm7, %v4880_v60 }
 0x564   : > { %4946 = vst.msk [vmem:[%s8308_s28 + $0x6c] sm:$0xf] %vm4918_vm7, %v4881_v47 }
 0x565 PF: > { %s21_s17 = sadd.s32 1, %s5291_s17  }
 0x566   : > { %p18_p4 = scmp.ge.s32.totalorder %s21_s17, 4  }
 0x568   :  { %20 = sbr.rel (!%p18_p4) target bundleno = 1 (0x1), region = 100 }

</bundles_post_ra>
